<compile_context>
chip_gen: v5e
topology: v5e:2x2
jax: 0.10.0
libtpu: 0.0.40
codegen_flags: <defaults>
</compile_context>

<pallas_src>
import jax
import jax.numpy as jnp
from jax.experimental import pallas as pl
from jax.experimental.pallas import tpu as pltpu


def _round_up(x, m):
    return ((x + m - 1) // m) * m


def adversary_kernel(c_ref, x_ref, w_ref, b_ref, o_ref):
    # c_ref: (1,) f32 in SMEM (scalar prefetch)
    # x_ref: (TB, D) f32   w_ref: (D, O) bf16   b_ref: (1, O) f32   o_ref: (TB, O) f32
    scale = 1.0 + jnp.abs(c_ref[0])
    z = x_ref[...].astype(jnp.float32) * scale
    # numerically-stable row softmax, all in f32 on the VPU/EUP
    m = jnp.max(z, axis=-1, keepdims=True)
    e = jnp.exp(z - m)
    s = e * pl.reciprocal(jnp.sum(e, axis=-1, keepdims=True), approx=True)
    # bf16 operands into the MXU, f32 accumulation
    out = jnp.dot(s.astype(w_ref.dtype), w_ref[...],
                  preferred_element_type=jnp.float32)
    o_ref[...] = (out + b_ref[...]).astype(o_ref.dtype)


def _xla_forward(x, c, w_t, b):
    scale = 1.0 + jnp.abs(c)
    z = x * scale
    s = jax.nn.softmax(z, axis=-1) if x.shape[1] > 1 else jax.nn.sigmoid(z)
    return s @ w_t + jnp.reshape(b, (1, -1))


def adversary_forward(x, c, w_t, b, *, target_step_bytes=2 << 20,
                      min_pallas_bytes=1 << 20):
    """x: (B, D) f32; c: scalar; w_t: (D, O) (transposed Linear weight); b: (O,)."""
    B, D = x.shape
    Dw, O = w_t.shape
    assert D == Dw and x.ndim == 2

    # Tiny problems and D == 1 (sigmoid path, >99% of lanes wasted): a fused
    # XLA elementwise + small matmul is strictly faster than a Pallas launch.
    if D == 1 or B * D * x.dtype.itemsize < min_pallas_bytes:
        return _xla_forward(x, c, w_t, b)

    # ---- tile sizing: bytes-targeted, multiple of 16, >=2 grid steps ---------
    D_l = _round_up(D, 128)               # lane-padded widths (VMEM footprint)
    O_l = _round_up(O, 128)
    row_bytes = (D_l + O_l) * 4
    tb = max(16, (target_step_bytes // row_bytes) // 16 * 16)
    if B >= 32:                            # make the "parallel" axis real on v7x
        tb = min(tb, _round_up(pl.cdiv(B, 2), 16))
    tb = min(tb, B)
    if tb < B:
        tb = max(16, (tb // 16) * 16)
        if tb >= B:
            tb = B                         # single full block (always legal)
    TB = tb
    grid = (pl.cdiv(B, TB),)               # ragged last tile handled by Pallas

    # ---- parameters (constant-folded under jit when closed over) -------------
    w_p = w_t.astype(jnp.bfloat16)
    b_p = jnp.reshape(b, (1, O)).astype(jnp.float32)
    c1 = jnp.reshape(c, (1,)).astype(jnp.float32)

    # ---- VMEM budget (generation-aware cap) ----------------------------------
    vmem_need = (2 * TB * D_l * 4          # double-buffered x tiles (f32)
                 + 2 * TB * O_l * 4        # double-buffered out tiles (f32)
                 + 2 * _round_up(D, 8) * O_l * 2   # bf16 weight (double-buffered)
                 + 2 * 8 * O_l * 4         # bias
                 + 4 * TB * D_l * 4        # f32 intermediates (z, e, s) + bf16 s
                 + TB * O_l * 4            # pre-bias f32 MXU result
                 + (2 << 20))              # headroom
    try:
        phys_vmem = int(pltpu.get_tpu_info().vmem_capacity_bytes)
    except Exception:
        phys_vmem = 64 << 20               # conservative (v7x) default
    vmem_limit = int(min(max(vmem_need, 8 << 20), int(phys_vmem * 0.75)))
    # TODO(synk): if the resident bf16 weight (D*O) approaches the VMEM cap, add a
    # K-tiled ("arbitrary") grid axis over D with an f32 accumulator scratch.

    cost = pl.CostEstimate(
        flops=2 * B * D * O,
        transcendentals=B * D,
        bytes_accessed=4 * B * D + 2 * D * O + 4 * O + 4 * B * O,
    )

    grid_spec = pltpu.PrefetchScalarGridSpec(
        num_scalar_prefetch=1,             # c lands in SMEM
        grid=grid,
        in_specs=[
            pl.BlockSpec((TB, D), lambda i, c_ref: (i, 0)),   # x tile
            pl.BlockSpec((D, O), lambda i, c_ref: (0, 0)),    # weight (resident)
            pl.BlockSpec((1, O), lambda i, c_ref: (0, 0)),    # bias
        ],
        out_specs=pl.BlockSpec((TB, O), lambda i, c_ref: (i, 0)),
    )

    return pl.pallas_call(
        adversary_kernel,
        out_shape=jax.ShapeDtypeStruct((B, O), x.dtype),      # unpadded output
        grid_spec=grid_spec,
        compiler_params=pltpu.CompilerParams(
            dimension_semantics=("parallel",),
            vmem_limit_bytes=vmem_limit,
        ),
        cost_estimate=cost,
    )(c1, x, w_p, b_p)

# TODO(synk): with_y / with_logits concatenation and the use_mlp (512-hidden) path
# are not exercised by the default constructor; they would be a concat in glue +
# a second fused matmul+ReLU kernel.


def adversary_reference(x, c, w_t, b):
    return _xla_forward(x, c, w_t, b)


if __name__ == "__main__":
    key = jax.random.PRNGKey(0)
    k_x, k_w, k_b, k_x2, k_x3, k_w1 = jax.random.split(key, 6)

    # ---------- Pallas path: D=256, O=64 (big enough to clear the XLA gate) ----
    B, D, O = 2048, 256, 64
    x = jax.random.normal(k_x, (B, D), dtype=jnp.float32)
    w = jax.random.normal(k_w, (O, D), dtype=jnp.float32) * 0.05   # PyTorch (O, D)
    b = jax.random.normal(k_b, (O,), dtype=jnp.float32) * 0.05
    c = jnp.asarray(1.0, dtype=jnp.float32)
    w_t = w.T                                                       # (D, O)

    out = jax.block_until_ready(adversary_forward(x, c, w_t, b))
    ref = adversary_reference(x, c, w_t, b)
    assert out.shape == (B, O)
    # bf16 MXU operands + approx reciprocal -> ~1e-3 relative error budget
    assert jnp.allclose(out, ref, atol=1e-2, rtol=1e-2), "mismatch vs reference"

    # ---------- Pallas path, ragged batch (not a multiple of the tile) ---------
    B2 = 1037
    x2 = jax.random.normal(k_x2, (B2, D), dtype=jnp.float32)
    out2 = jax.block_until_ready(adversary_forward(x2, c, w_t, b))
    ref2 = adversary_reference(x2, c, w_t, b)
    assert out2.shape == (B2, O)
    assert jnp.allclose(out2, ref2, atol=1e-2, rtol=1e-2), "mismatch (ragged batch)"

    # ---------- tiny default-style config: routed to fused XLA -----------------
    Bs, Ds, Os = 8, 32, 16
    xs = jax.random.normal(k_x3, (Bs, Ds), dtype=jnp.float32)
    ws = jax.random.normal(k_w, (Os, Ds), dtype=jnp.float32) * 0.05
    bs = jax.random.normal(k_b, (Os,), dtype=jnp.float32) * 0.05
    outs = jax.block_until_ready(adversary_forward(xs, c, ws.T, bs))
    refs = adversary_reference(xs, c, ws.T, bs)
    assert jnp.allclose(outs, refs, atol=1e-5, rtol=1e-5), "mismatch (small/XLA path)"

    # ---------- D == 1 sigmoid fallback (plain XLA path) -----------------------
    x1 = jax.random.normal(k_x3, (Bs, 1), dtype=jnp.float32)
    w1 = jax.random.normal(k_w1, (Os, 1), dtype=jnp.float32) * 0.05
    out1 = jax.block_until_ready(adversary_forward(x1, c, w1.T, bs))
    ref1 = adversary_reference(x1, c, w1.T, bs)
    assert jnp.allclose(out1, ref1, atol=1e-5, rtol=1e-5), "mismatch (sigmoid path)"

    print("KERNEL_OK")
</pallas_src>

<mosaic_0001>
module attributes {stable_mosaic.version = 11 : i64} {
  func.func @adversary_kernel(%arg0: i32, %arg1: memref<1xf32, #tpu.memory_space<smem>>, %arg2: memref<1024x256xf32, #tpu.memory_space<vmem>>, %arg3: memref<256x64xbf16, #tpu.memory_space<vmem>>, %arg4: memref<1x64xf32, #tpu.memory_space<vmem>>, %arg5: memref<1024x64xf32, #tpu.memory_space<vmem>>) attributes {dimension_semantics = [#tpu.dimension_semantics<parallel>], iteration_bounds = array<i64: 2>, scalar_prefetch = 1 : i64, scratch_operands = 0 : i64, tpu.core_type = #tpu.core_type<tc>, window_params = [{transform_indices = @transform_0, window_bounds = array<i64: 1024, 256>}, {pipeline_mode = #tpu.pipeline_mode<synchronous>, transform_indices = @transform_1, window_bounds = array<i64: 256, 64>}, {pipeline_mode = #tpu.pipeline_mode<synchronous>, transform_indices = @transform_2, window_bounds = array<i64: 1, 64>}, {transform_indices = @transform_3, window_bounds = array<i64: 1024, 64>}]} {
    %c0 = arith.constant 0 : index
    %0 = memref.load %arg1[%c0] : memref<1xf32, #tpu.memory_space<smem>>
    %1 = math.absf %0 : f32
    %cst = arith.constant 1.000000e+00 : f32
    %2 = arith.addf %cst, %1 : f32
    %c0_0 = arith.constant 0 : index
    %c0_1 = arith.constant 0 : index
    %3 = vector.load %arg2[%c0_0, %c0_1] : memref<1024x256xf32, #tpu.memory_space<vmem>>, vector<1024x256xf32>
    %4 = vector.broadcast %2 : f32 to vector<1024x256xf32>
    %5 = arith.mulf %3, %4 : vector<1024x256xf32>
    %cst_2 = arith.constant dense<0xFF800000> : vector<1024xf32>
    %6 = vector.multi_reduction <maximumf>, %5, %cst_2 [1] : vector<1024x256xf32> to vector<1024xf32>
    %7 = vector.shape_cast %6 : vector<1024xf32> to vector<1024x1xf32>
    %8 = vector.broadcast %7 : vector<1024x1xf32> to vector<1024x256xf32>
    %9 = arith.subf %5, %8 : vector<1024x256xf32>
    %10 = math.exp %9 : vector<1024x256xf32>
    %cst_3 = arith.constant dense<0.000000e+00> : vector<1024xf32>
    %11 = vector.multi_reduction <add>, %10, %cst_3 [1] : vector<1024x256xf32> to vector<1024xf32>
    %12 = vector.shape_cast %11 : vector<1024xf32> to vector<1024x1xf32>
    %13 = tpu.reciprocal %12 {approx = true} : vector<1024x1xf32> -> vector<1024x1xf32>
    %14 = vector.broadcast %13 : vector<1024x1xf32> to vector<1024x256xf32>
    %15 = arith.mulf %10, %14 : vector<1024x256xf32>
    %16 = arith.truncf %15 : vector<1024x256xf32> to vector<1024x256xbf16>
    %c0_4 = arith.constant 0 : index
    %c0_5 = arith.constant 0 : index
    %17 = vector.load %arg3[%c0_4, %c0_5] : memref<256x64xbf16, #tpu.memory_space<vmem>>, vector<256x64xbf16>
    %cst_6 = arith.constant dense<0.000000e+00> : vector<1024x64xf32>
    %18 = tpu.matmul %16, %17, %cst_6 {dimension_numbers = #tpu.dot_dimension_numbers<[1], [0], [0], [1], [0, 0, 1, 1], [], []>} : vector<1024x256xbf16>, vector<256x64xbf16>, vector<1024x64xf32> -> vector<1024x64xf32>
    %c0_7 = arith.constant 0 : index
    %c0_8 = arith.constant 0 : index
    %19 = vector.load %arg4[%c0_7, %c0_8] : memref<1x64xf32, #tpu.memory_space<vmem>>, vector<1x64xf32>
    %20 = vector.broadcast %19 : vector<1x64xf32> to vector<1024x64xf32>
    %21 = arith.addf %18, %20 : vector<1024x64xf32>
    %c0_9 = arith.constant 0 : index
    %c0_10 = arith.constant 0 : index
    %22 = vector.load %arg5[%c0_9, %c0_10] : memref<1024x64xf32, #tpu.memory_space<vmem>>, vector<1024x64xf32>
    tpu.vector_store %arg5[%c0_9, %c0_10], %21 {strides = array<i32>} : memref<1024x64xf32, #tpu.memory_space<vmem>>, vector<1024x64xf32>,
    return
  }
  func.func @transform_0(%arg0: i32, %arg1: memref<1xf32, #tpu.memory_space<smem>>) -> (i32, i32) {
    %c0_i32 = arith.constant 0 : i32
    %c0_i32_0 = arith.constant 0 : i32
    return %arg0, %c0_i32 : i32, i32
  }
  func.func @transform_1(%arg0: i32, %arg1: memref<1xf32, #tpu.memory_space<smem>>) -> (i32, i32) {
    %c0_i32 = arith.constant 0 : i32
    %c0_i32_0 = arith.constant 0 : i32
    %c0_i32_1 = arith.constant 0 : i32
    return %c0_i32, %c0_i32_0 : i32, i32
  }
  func.func @transform_2(%arg0: i32, %arg1: memref<1xf32, #tpu.memory_space<smem>>) -> (i32, i32) {
    %c0_i32 = arith.constant 0 : i32
    %c0_i32_0 = arith.constant 0 : i32
    %c0_i32_1 = arith.constant 0 : i32
    return %c0_i32, %c0_i32_0 : i32, i32
  }
  func.func @transform_3(%arg0: i32, %arg1: memref<1xf32, #tpu.memory_space<smem>>) -> (i32, i32) {
    %c0_i32 = arith.constant 0 : i32
    %c0_i32_0 = arith.constant 0 : i32
    return %arg0, %c0_i32 : i32, i32
  }
}

</mosaic_0001>

<bundles_post_ra>
// kernel: tpu_custom_call.1
= control target key start
LH: loop header
LB: loop body
LE: loop exit
PB: predicated region body
PF: predicated region fallthrough
CT: control target
= control target key end

     0   :  { %s8154_s0 = inlined_call_operand.<no memory space> [shape: f32[1], index: 0, kind: input, shape index: {}]   ;;  %s8155_s1 = inlined_call_operand.hbm [shape: f32[2048,256], index: 1, kind: input, shape index: {}]   ;;  %s8156_s2 = inlined_call_operand.vmem [shape: bf16[256,64], index: 2, kind: input, shape index: {}]   ;;  %s8157_s3 = inlined_call_operand.hbm [shape: f32[1,64], index: 3, kind: input, shape index: {}]   ;;  %s8158_s4 = inlined_call_operand.vmem [shape: f32[2048,64], index: 4, kind: output, shape index: {}]  }
   0x1   :  { %9 = sst [smem:[#allocation3]] %s8154_s0 }
   0x2   :  { %10 = vsyncpa [#allocation5], 0 }
   0x3   :  { %12 = vsyncpa [#allocation5 + $0x1], 0 }
   0x4   :  { %13 = vsyncpa [#allocation7], 0  ;;  %s4843_s17 = smov 0   ;;  %s4845_s18 = smov 0  }
   0x5   :  { %s4847_s19 = smov 0   ;;  %s4849_s20 = smov 0  }
   0x6 LB: > { %s3773_s0 = sadd.s32 4294967295, %s4810_s20   ;;  %s4863_s21 = sadd.s32 1, %s4810_s20   ;;  %s4810_s20 = sphi %s4849_s20, %s8713_s20   ;;  %s4806_s19 = sphi %s4847_s19, %s8712_s19   ;;  %s4802_s18 = sphi %s4845_s18, %s8711_s18   ;;  %s4798_s17 = sphi %s4843_s17, %s8710_s17  }
   0x7   : > { %s23_s22 = ssub.s32 %s4810_s20, %s4863_s21  ;;  %s26_s23 = sadd.s32 1, %s4806_s19 }
   0x8   : > { %p24_p0 = scmp.eq.s32.totalorder %s23_s22, 0  ;;  %p33_p1 = scmp.ne.s32.totalorder %s4806_s19, %s4802_s18 }
   0x9   : > { %p34_p2 = scmp.eq.s32.totalorder %s4810_s20, 0  ;;  %p39_p3 = scmp.ne.s32.totalorder %s4802_s18, %s4798_s17 }
   0xa   : > { %s4873_s24 = scalar_select %p24_p0, %s4806_s19, %s26_s23  }
   0xb   : > { %p4875_p4 = por %p34_p2, %p33_p1  ;;  %p4881_p5 = scmp.eq.s32.totalorder %s3773_s0, 0 }
   0xc   : > { %p3775_p6 = scmp.ge.s32.totalorder %s4810_s20, 1  ;;  %p118_p7 = scmp.lt.s32.totalorder %s4810_s20, 3 }
   0xd   : > { %p4889_p8 = por %p4881_p5, %p39_p3  ;;  %s133_s5 = sshll.u32 %s8157_s3, 4  ;;  %s134_s5 = int_to_ptr.hbm [resolvable:$true] %s133_s5 }
   0xe   : > { %p4893_p9 = pnand %p3775_p6, %p118_p7  ;;  %s4812_s6 = smov [#allocation6]  }
   0xf   : > { %s135_s7 = sshll.u32 %s4812_s6, 4  ;;  %p3902_p12 = scmp.lt.s32.totalorder %s4810_s20, 2  ;;  %s136_s7 = int_to_ptr.vmem [resolvable:$true] %s135_s7 }
  0x10   : > { %p3893_p10 = pneg %p4893_p9  ;;  %s146_s8 = sand.u32 1, %s4806_s19  }
  0x11   : > { %s3854_s9 = sshll.u32 %s4810_s20, 11  ;;  %p4909_p13 = pnand %p3902_p12, %p4875_p4 }
  0x12   : > { %p3894_p11 = pnand %p3893_p10, %p4881_p5  ;;  %s3778_s11 = sshll.u32 %s146_s8, 11 }
  0x13   : > { %s156_s14 = scalar_lea.hbm %s8155_s1, %s3854_s9  ;;  %s150_s16 = scalar_lea.vmem [#allocation4], %s3778_s11 }
  0x14   : > { %3896 = dma.hbm_to_vmem [thread:$0]  (!%p3894_p11), %s134_s5, 16, %s136_s7, [#allocation7]  }
  0x15   : > { %s157_s15 = sshll.u32 %s156_s14, 4  ;;  %s159_s17 = sshll.u32 %s150_s16, 4  ;;  %s158_s15 = int_to_ptr.hbm [resolvable:$true] %s157_s15  ;;  %s160_s17 = int_to_ptr.vmem [resolvable:$true] %s159_s17 }
  0x16   : > { %s147_s22 = scalar_lea.sflag [#allocation5], %s146_s8  ;;  %s4742_s23 = sshra.s32 %s158_s15, 4  ;;  %s4743_s23 = int_to_ptr.hbm [resolvable:$true] %s4742_s23 }
  0x17   : > { %s4744_s25 = scalar_lea.hbm %s4743_s23, 2048  ;;  %p4746_p1 = pneg %p4909_p13 }
  0x18   : > { %p4745_p0 = scmp.ne.s32.totalorder %s4743_s23, %s4744_s25  ;;  %s4749_s5 = scalar_lea.hbm %s8155_s1, 4096 }
  0x19   : > { %p4750_p4 = scmp.lt.s32.totalorder %s4743_s23, %s8155_s1  ;;  %p4751_p6 = scmp.lt.s32.totalorder %s4749_s5, %s4744_s25 }
  0x1a   : > { %p4747_p2 = pnand %p4746_p1, %p4745_p0 }
  0x1b   : > { %p4752_p7 = por %p4751_p6, %p4750_p4 }
  0x1c   : > { %p4748_p3 = pneg %p4747_p2 }
  0x1e   : > { %p4753_p10 = pnand %p4752_p7, %p4748_p3 }
  0x20   : > { %4756 = shalt.err (!%p4753_p10)
}
  0x21   : > { %s4813_s8 = smov 256   ;;  %s4814_s9 = smov 16  }
  0x22   : > { %3900 = dma.hbm_to_vmem [thread:$0]  (!%p4909_p13), %s158_s15, 32768, %s160_s17, %s147_s22, %s4813_s8, %s4813_s8, %s4814_s9  }
  0x23   : > { %171 = sbr.rel (%p4893_p9) target bundleno = 1482 (0x5ca), region = 32 }
  0x28   : > { %s173_s11 = sand.u32 1, %s4802_s18  }
  0x29   : > { %s3783_s12 = sshll.u32 %s173_s11, 11  ;;  %s174_s13 = scalar_lea.sflag [#allocation5], %s173_s11 }
  0x2a   : > { %s4929_s14 = scalar_lea.vmem [#allocation4], %s3783_s12 }
  0x2b   : > { %4789 = dma.done.wait (%p4889_p8), %s174_s13, 32768  }
  0x2c   : > { %4791 = vsyncadd (%p4889_p8), %s174_s13, 4294934528 }
  0x2d   : > { %4793 = dma.done.wait (%p4881_p5), [#allocation7], 16  }
  0x2e   : > { %4795 = vsyncadd (%p4881_p5), [#allocation7], 4294967280  ;;  %s213_s28 = sld [smem:[#allocation3]]  ;;  %v224_v0 = vld [vmem:[%s4929_s14 + $0x40] sm:$0xff]  ;;  %v225_v1 = vld [vmem:[%s4929_s14 + $0x48] sm:$0xff]  ;;  %s6112_s8 = sshll.u32 %s3773_s0, 7 }
  0x2f   : > { %v220_v2 = vld [vmem:[%s4929_s14 + $0x20] sm:$0xff]  ;;  %v221_v3 = vld [vmem:[%s4929_s14 + $0x28] sm:$0xff]  ;;  %v226_v11 = vld [vmem:[%s4929_s14 + $0x50] sm:$0xff]  ;;  %p208_p5 = scmp.lt.s32.totalorder %s6112_s8, 255  ;;  %vm3567_vm0 = vcmask 523264  }
  0x30   : > { %v216_v4 = vld [vmem:[%s4929_s14] sm:$0xff]  ;;  %v217_v5 = vld [vmem:[%s4929_s14 + $0x8] sm:$0xff]  ;;  %v227_v14 = vld [vmem:[%s4929_s14 + $0x58] sm:$0xff] }
  0x31   : > { %v222_v15 = vld [vmem:[%s4929_s14 + $0x30] sm:$0xff]  ;;  %v223_v16 = vld [vmem:[%s4929_s14 + $0x38] sm:$0xff]  ;;  %v344_v30 = vld [vmem:[%s4929_s14 + $0x400] sm:$0xff]  ;;  %s8715_s8 = smov (!%p208_p5, %s6112_s8), 255 }
  0x32   : > { %v218_v19 = vld [vmem:[%s4929_s14 + $0x10] sm:$0xff]  ;;  %v219_v20 = vld [vmem:[%s4929_s14 + $0x18] sm:$0xff]  ;;  %v345_v32 = vld [vmem:[%s4929_s14 + $0x408] sm:$0xff]  ;;  %s3786_s20 = sshll.u32 %s8715_s8, 3 }
  0x33   : > { %v230_v33 = vld [vmem:[%s4929_s14 + $0x70] sm:$0xff]  ;;  %v231_v34 = vld [vmem:[%s4929_s14 + $0x78] sm:$0xff]  ;;  %v228_v35 = vld [vmem:[%s4929_s14 + $0x60] sm:$0xff]  ;;  %s6173_s11 = scalar_lea.vmem %s8158_s4, %s3786_s20 }
  0x34   : > { %s214_s10 = sand.u32 2147483647, %s213_s28  ;;  %v229_v36 = vld [vmem:[%s4929_s14 + $0x68] sm:$0xff]  ;;  %v234_v45 = vld [vmem:[%s4929_s14 + $0x90] sm:$0xff]  ;;  %v235_v47 = vld [vmem:[%s4929_s14 + $0x98] sm:$0xff] }
  0x35   : > { %s215_s27 = sadd.f32 1.0, %s214_s10  ;;  %v232_v48 = vld [vmem:[%s4929_s14 + $0x80] sm:$0xff]  ;;  %v233_v49 = vld [vmem:[%s4929_s14 + $0x88] sm:$0xff]  ;;  %v346_v50 = vld [vmem:[%s4929_s14 + $0x410] sm:$0xff] }
  0x36   : > { %v347_v51 = vld [vmem:[%s4929_s14 + $0x418] sm:$0xff]  ;;  %v348_v60 = vld [vmem:[%s4929_s14 + $0x420] sm:$0xff]  ;;  %v349_v62 = vld [vmem:[%s4929_s14 + $0x428] sm:$0xff] }
  0x37   : > { %v4945_v6 = vstv %s215_s27  ;;  %v238_v63 = vld [vmem:[%s4929_s14 + $0xb0] sm:$0xff] }
  0x38   : > { %v4948_v7 = vmul.f32 %v4945_v6, %v224_v0  ;;  %v4951_v8 = vmul.f32 %v4945_v6, %v225_v1  ;;  %v4954_v9 = vmul.f32 %v4945_v6, %v220_v2  ;;  %v4957_v10 = vmul.f32 %v4945_v6, %v221_v3  ;;  %v239_v0 = vld [vmem:[%s4929_s14 + $0xb8] sm:$0xff]  ;;  %v236_v1 = vld [vmem:[%s4929_s14 + $0xa0] sm:$0xff]  ;;  %v237_v2 = vld [vmem:[%s4929_s14 + $0xa8] sm:$0xff] }
  0x39   : > { %v4961_v12 = vmul.f32 %v4945_v6, %v216_v4  ;;  %v4964_v13 = vmul.f32 %v4945_v6, %v217_v5  ;;  %v4978_v22 = vmul.f32 %v4945_v6, %v226_v11  ;;  %v4981_v23 = vmul.f32 %v4945_v6, %v227_v14 }
  0x3a   : > { %v741_v17 = vmax.f32 %v4948_v7, %v4951_v8  ;;  %v735_v18 = vmax.f32 %v4954_v9, %v4957_v10  ;;  %v4984_v24 = vmul.f32 %v4945_v6, %v222_v15  ;;  %v4987_v25 = vmul.f32 %v4945_v6, %v223_v16 }
  0x3b   : > { %v729_v21 = vmax.f32 %v4961_v12, %v4964_v13  ;;  %v4990_v26 = vmul.f32 %v4945_v6, %v218_v19  ;;  %v4993_v27 = vmul.f32 %v4945_v6, %v219_v20  ;;  %v744_v28 = vmax.f32 %v4978_v22, %v4981_v23  ;;  %v243_v20 = vld [vmem:[%s4929_s14 + $0xd8] sm:$0xff] }
  0x3c   : > { %742 = vmax.xlane.f32.xlu2 %v741_v17  ;;  %736 = vmax.xlane.f32.xlu1 %v735_v18  ;;  %v738_v29 = vmax.f32 %v4984_v24, %v4987_v25  ;;  %v5008_v37 = vmul.f32 %v4945_v6, %v344_v30  ;;  %v5011_v38 = vmul.f32 %v4945_v6, %v345_v32  ;;  %v242_v18 = vld [vmem:[%s4929_s14 + $0xd0] sm:$0xff]  ;;  %v351_v30 = vld [vmem:[%s4929_s14 + $0x438] sm:$0xff] }
  0x3d   : > { %730 = vmax.xlane.f32.xlu0 %v729_v21  ;;  %v732_v31 = vmax.f32 %v4990_v26, %v4993_v27  ;;  %v5014_v39 = vmul.f32 %v4945_v6, %v230_v33  ;;  %v5017_v40 = vmul.f32 %v4945_v6, %v231_v34  ;;  %v5020_v41 = vmul.f32 %v4945_v6, %v228_v35  ;;  %v240_v21 = vld [vmem:[%s4929_s14 + $0xc0] sm:$0xff] }
  0x3e   : > { %v5023_v42 = vmul.f32 %v4945_v6, %v229_v36  ;;  %v921_v43 = vmax.f32 %v5008_v37, %v5011_v38  ;;  %v5038_v52 = vmul.f32 %v4945_v6, %v234_v45  ;;  %v5041_v53 = vmul.f32 %v4945_v6, %v235_v47  ;;  %v354_v45 = vld [vmem:[%s4929_s14 + $0x450] sm:$0xff]  ;;  %v355_v47 = vld [vmem:[%s4929_s14 + $0x458] sm:$0xff] }
  0x3f   : > { %v750_v44 = vmax.f32 %v5014_v39, %v5017_v40  ;;  %v5044_v54 = vmul.f32 %v4945_v6, %v232_v48  ;;  %v5047_v55 = vmul.f32 %v4945_v6, %v233_v49  ;;  %v5050_v56 = vmul.f32 %v4945_v6, %v346_v50  ;;  %v352_v48 = vld [vmem:[%s4929_s14 + $0x440] sm:$0xff]  ;;  %v353_v49 = vld [vmem:[%s4929_s14 + $0x448] sm:$0xff] }
  0x40   : > { %v747_v46 = vmax.f32 %v5020_v41, %v5023_v42  ;;  %v5053_v57 = vmul.f32 %v4945_v6, %v347_v51  ;;  %v756_v58 = vmax.f32 %v5038_v52, %v5041_v53  ;;  %v5068_v3 = vmul.f32 %v4945_v6, %v348_v60  ;;  %v244_v50 = vld [vmem:[%s4929_s14 + $0xe0] sm:$0xff]  ;;  %v245_v51 = vld [vmem:[%s4929_s14 + $0xe8] sm:$0xff] }
  0x41   : > { %v753_v59 = vmax.f32 %v5044_v54, %v5047_v55  ;;  %v5071_v4 = vmul.f32 %v4945_v6, %v349_v62  ;;  %v5074_v5 = vmul.f32 %v4945_v6, %v238_v63  ;;  %v5077_v11 = vmul.f32 %v4945_v6, %v239_v0 }
  0x42   : > { %v924_v61 = vmax.f32 %v5050_v56, %v5053_v57  ;;  %v5080_v14 = vmul.f32 %v4945_v6, %v236_v1  ;;  %v5083_v15 = vmul.f32 %v4945_v6, %v237_v2  ;;  %v5101_v32 = vmul.f32 %v4945_v6, %v243_v20 }
  0x43   : > { %8346 = vst [vmem:[#allocation10_spill] sm:$0xff] %v5074_v5  ;;  %v927_v16 = vmax.f32 %v5068_v3, %v5071_v4  ;;  %v762_v17 = vmax.f32 %v5074_v5, %v5077_v11  ;;  %v5104_v33 = vmul.f32 %v4945_v6, %v240_v21  ;;  %v5113_v36 = vmul.f32 %v4945_v6, %v351_v30  ;;  %v372_v5 = vld [vmem:[%s4929_s14 + $0x4e0] sm:$0xff] }
  0x44   : > { %745 = vmax.xlane.f32.xlu2 %v744_v28  ;;  %739 = vmax.xlane.f32.xlu1 %v738_v29  ;;  %8347 = vst [vmem:[#allocation11_spill] sm:$0xff] %v5077_v11  ;;  %v759_v19 = vmax.f32 %v5080_v14, %v5083_v15  ;;  %v241_v28 = vld [vmem:[%s4929_s14 + $0xc8] sm:$0xff]  ;;  %v350_v29 = vld [vmem:[%s4929_s14 + $0x430] sm:$0xff]  ;;  %v5134_v60 = vmul.f32 %v4945_v6, %v352_v48  ;;  %v375_v11 = vld [vmem:[%s4929_s14 + $0x4f8] sm:$0xff] }
  0x45   : > { %733 = vmax.xlane.f32.xlu0 %v732_v31  ;;  %v5098_v31 = vmul.f32 %v4945_v6, %v242_v18  ;;  %8348 = vst [vmem:[#allocation12_spill] sm:$0xff] %v5104_v33  ;;  %v5107_v34 = vmul.f32 %v4945_v6, %v241_v28  ;;  %v5110_v35 = vmul.f32 %v4945_v6, %v350_v29  ;;  %v246_v18 = vld [vmem:[%s4929_s14 + $0xf0] sm:$0xff] }
  0x46   : > { %v5140_v62 = vmul.f32 %v4945_v6, %v244_v50  ;;  %v5143_v63 = vmul.f32 %v4945_v6, %v245_v51  ;;  %v5162_v28 = vmul.f32 %v4945_v6, %v246_v18  ;;  %v361_v18 = vld [vmem:[%s4929_s14 + $0x488] sm:$0xff] }
  0x47   : > { %8349 = vst [vmem:[#allocation13_spill] sm:$0xff] %v5107_v34 }
  0x48   : > { %8350 = vst [vmem:[#allocation14_spill] sm:$0xff] %v5140_v62  ;;  %v771_v2 = vmax.f32 %v5140_v62, %v5143_v63 }
  0x49   : > { %8351 = vst [vmem:[#allocation15_spill] sm:$0xff] %v5143_v63 }
  0x4a   : > { %8354 = vst [vmem:[#allocation18_spill] sm:$0xff] %v5162_v28 }
  0x4c   : > { %922 = vmax.xlane.f32.xlu2 %v921_v43  ;;  %751 = vmax.xlane.f32.xlu1 %v750_v44  ;;  %v768_v43 = vmax.f32 %v5098_v31, %v5101_v32  ;;  %v765_v44 = vmax.f32 %v5104_v33, %v5107_v34  ;;  %v379_v34 = vld [vmem:[%s4929_s14 + $0x518] sm:$0xff]  ;;  %v377_v33 = vld [vmem:[%s4929_s14 + $0x508] sm:$0xff] }
  0x4d   : > { %748 = vmax.xlane.f32.xlu0 %v747_v46  ;;  %v930_v46 = vmax.f32 %v5110_v35, %v5113_v36 }
  0x54   : > { %757 = vmax.xlane.f32.xlu2 %v756_v58  ;;  %754 = vmax.xlane.f32.xlu1 %v753_v59  ;;  %v5128_v58 = vmul.f32 %v4945_v6, %v354_v45  ;;  %v5131_v59 = vmul.f32 %v4945_v6, %v355_v47  ;;  %v359_v45 = vld [vmem:[%s4929_s14 + $0x478] sm:$0xff]  ;;  %v357_v47 = vld [vmem:[%s4929_s14 + $0x468] sm:$0xff] }
  0x55   : > { %925 = vmax.xlane.f32.xlu0 %v924_v61  ;;  %v5137_v61 = vmul.f32 %v4945_v6, %v353_v49  ;;  %v5179_v49 = vmul.f32 %v4945_v6, %v359_v45  ;;  %v5185_v51 = vmul.f32 %v4945_v6, %v357_v47  ;;  %v366_v47 = vld [vmem:[%s4929_s14 + $0x4b0] sm:$0xff] }
  0x56   : > { %v936_v0 = vmax.f32 %v5128_v58, %v5131_v59 }
  0x57   : > { %v933_v1 = vmax.f32 %v5134_v60, %v5137_v61 }
  0x5c   : > { %928 = vmax.xlane.f32.xlu2 %v927_v16  ;;  %763 = vmax.xlane.f32.xlu1 %v762_v17  ;;  %v248_v16 = vld [vmem:[%s4929_s14 + $0x100] sm:$0xff]  ;;  %v249_v17 = vld [vmem:[%s4929_s14 + $0x108] sm:$0xff] }
  0x5d   : > { %760 = vmax.xlane.f32.xlu0 %v759_v19  ;;  %v247_v19 = vld [vmem:[%s4929_s14 + $0xf8] sm:$0xff]  ;;  %v5156_v20 = vmul.f32 %v4945_v6, %v248_v16  ;;  %v5159_v21 = vmul.f32 %v4945_v6, %v249_v17  ;;  %v360_v17 = vld [vmem:[%s4929_s14 + $0x480] sm:$0xff] }
  0x5e   : > { %v5165_v29 = vmul.f32 %v4945_v6, %v247_v19  ;;  %v363_v16 = vld [vmem:[%s4929_s14 + $0x498] sm:$0xff] }
  0x5f   : > { %8352 = vst [vmem:[#allocation16_spill] sm:$0xff] %v5156_v20  ;;  %v777_v30 = vmax.f32 %v5156_v20, %v5159_v21 }
  0x60   : > { %8353 = vst [vmem:[#allocation17_spill] sm:$0xff] %v5159_v21  ;;  %v368_v21 = vld [vmem:[%s4929_s14 + $0x4c0] sm:$0xff] }
  0x61   : > { %8355 = vst [vmem:[#allocation19_spill] sm:$0xff] %v5165_v29 }
  0x64   : > { %769 = vmax.xlane.f32.xlu2 %v768_v43  ;;  %766 = vmax.xlane.f32.xlu1 %v765_v44  ;;  %v774_v43 = vmax.f32 %v5162_v28, %v5165_v29  ;;  %v358_v44 = vld [vmem:[%s4929_s14 + $0x470] sm:$0xff]  ;;  %v5242_v29 = vmul.f32 %v4945_v6, %v368_v21 }
  0x65   : > { %931 = vmax.xlane.f32.xlu0 %v930_v46  ;;  %v356_v46 = vld [vmem:[%s4929_s14 + $0x460] sm:$0xff]  ;;  %v5176_v48 = vmul.f32 %v4945_v6, %v358_v44  ;;  %v5205_v44 = vmul.f32 %v4945_v6, %v361_v18 }
  0x66   : > { %v5182_v50 = vmul.f32 %v4945_v6, %v356_v46  ;;  %8359 = vst [vmem:[#allocation23_spill] sm:$0xff] %v5242_v29 }
  0x6c   : > { %937 = vmax.xlane.f32.xlu2 %v936_v0  ;;  %934 = vmax.xlane.f32.xlu1 %v933_v1  ;;  %v942_v0 = vmax.f32 %v5176_v48, %v5179_v49  ;;  %v939_v1 = vmax.f32 %v5182_v50, %v5185_v51 }
  0x6d   : > { %772 = vmax.xlane.f32.xlu0 %v771_v2  ;;  %v362_v2 = vld [vmem:[%s4929_s14 + $0x490] sm:$0xff] }
  0x6e   : > { %v5196_v19 = vmul.f32 %v4945_v6, %v362_v2  ;;  %v364_v2 = vld [vmem:[%s4929_s14 + $0x4a0] sm:$0xff] }
  0x6f   : > { %v5222_v18 = vmul.f32 %v4945_v6, %v364_v2 }
  0x71   : > { %8356 = vst [vmem:[#allocation20_spill] sm:$0xff] %v5222_v18 }
  0x74   : > { %778 = vmax.xlane.f32.xlu1 %v777_v30  ;;  %v5199_v30 = vmul.f32 %v4945_v6, %v363_v16  ;;  %v5216_v16 = vmul.f32 %v4945_v6, %v366_v47  ;;  %v370_v47 = vld [vmem:[%s4929_s14 + $0x4d0] sm:$0xff] }
  0x75   : > { %775 = vmax.xlane.f32.xlu0 %v774_v43  ;;  %v5202_v43 = vmul.f32 %v4945_v6, %v360_v17  ;;  %v5236_v2 = vmul.f32 %v4945_v6, %v370_v47  ;;  %v374_v47 = vld [vmem:[%s4929_s14 + $0x4f0] sm:$0xff] }
  0x76   : > { %v948_v45 = vmax.f32 %v5196_v19, %v5199_v30  ;;  %v5256_v21 = vmul.f32 %v4945_v6, %v374_v47 }
  0x77   : > { %v945_v46 = vmax.f32 %v5202_v43, %v5205_v44 }
  0x78   : > { %8361 = vst [vmem:[#allocation25_spill] sm:$0xff] %v5256_v21 }
  0x7c   : > { %943 = vmax.xlane.f32.xlu1 %v942_v0  ;;  %v367_v0 = vld [vmem:[%s4929_s14 + $0x4b8] sm:$0xff] }
  0x7d   : > { %940 = vmax.xlane.f32.xlu0 %v939_v1  ;;  %v365_v1 = vld [vmem:[%s4929_s14 + $0x4a8] sm:$0xff]  ;;  %v5219_v17 = vmul.f32 %v4945_v6, %v367_v0  ;;  %v371_v0 = vld [vmem:[%s4929_s14 + $0x4d8] sm:$0xff] }
  0x7e   : > { %v5225_v63 = vmul.f32 %v4945_v6, %v365_v1  ;;  %v5239_v1 = vmul.f32 %v4945_v6, %v371_v0  ;;  %v373_v0 = vld [vmem:[%s4929_s14 + $0x4e8] sm:$0xff] }
  0x7f   : > { %v954_v62 = vmax.f32 %v5216_v16, %v5219_v17 }
  0x80   : > { %8357 = vst [vmem:[#allocation21_spill] sm:$0xff] %v5225_v63  ;;  %v960_v20 = vmax.f32 %v5236_v2, %v5239_v1 }
  0x81   : > { %8358 = vst [vmem:[#allocation22_spill] sm:$0xff] %v5239_v1 }
  0x84   : > { %949 = vmax.xlane.f32.xlu1 %v948_v45  ;;  %v951_v45 = vmax.f32 %v5222_v18, %v5225_v63 }
  0x85   : > { %946 = vmax.xlane.f32.xlu0 %v945_v46  ;;  %v369_v46 = vld [vmem:[%s4929_s14 + $0x4c8] sm:$0xff] }
  0x86   : > { %v5245_v28 = vmul.f32 %v4945_v6, %v369_v46  ;;  %v5262_v46 = vmul.f32 %v4945_v6, %v372_v5  ;;  %v5277_v5 = vmul.f32 %v4945_v6, %v379_v34 }
  0x88   : > { %8360 = vst [vmem:[#allocation24_spill] sm:$0xff] %v5245_v28 }
  0x89   : > { %8363 = vst [vmem:[#allocation27_spill] sm:$0xff] %v5262_v46 }
  0x8a   : > { %8366 = vst [vmem:[#allocation30_spill] sm:$0xff] %v5277_v5 }
  0x8c   : > { %955 = vmax.xlane.f32.xlu1 %v954_v62  ;;  %v957_v62 = vmax.f32 %v5242_v29, %v5245_v28  ;;  %v5265_v28 = vmul.f32 %v4945_v6, %v373_v0  ;;  %v378_v29 = vld [vmem:[%s4929_s14 + $0x510] sm:$0xff]  ;;  %v376_v0 = vld [vmem:[%s4929_s14 + $0x500] sm:$0xff] }
  0x8d   : > { %952 = vmax.xlane.f32.xlu0 %v951_v45  ;;  %v5259_v45 = vmul.f32 %v4945_v6, %v375_v11  ;;  %v5274_v11 = vmul.f32 %v4945_v6, %v378_v29 }
  0x8e   : > { %8364 = vst [vmem:[#allocation28_spill] sm:$0xff] %v5265_v28  ;;  %v963_v47 = vmax.f32 %v5262_v46, %v5265_v28  ;;  %v251_v28 = vld [vmem:[%s4929_s14 + $0x118] sm:$0xff] }
  0x8f   : > { %8362 = vst [vmem:[#allocation26_spill] sm:$0xff] %v5259_v45  ;;  %v5295_v34 = vmul.f32 %v4945_v6, %v251_v28 }
  0x90   : > { %8365 = vst [vmem:[#allocation29_spill] sm:$0xff] %v5274_v11 }
  0x91   : > { %8369 = vst [vmem:[#allocation33_spill] sm:$0xff] %v5295_v34 }
  0x94   : > { %961 = vmax.xlane.f32.xlu1 %v960_v20  ;;  %v966_v20 = vmax.f32 %v5256_v21, %v5259_v45  ;;  %v5284_v45 = vmul.f32 %v4945_v6, %v376_v0  ;;  %v5287_v21 = vmul.f32 %v4945_v6, %v377_v33 }
  0x95   : > { %958 = vmax.xlane.f32.xlu0 %v957_v62  ;;  %v972_v62 = vmax.f32 %v5274_v11, %v5277_v5 }
  0x96   : > { %8367 = vst [vmem:[#allocation31_spill] sm:$0xff] %v5287_v21 }
  0x9c   : > { %967 = vmax.xlane.f32.xlu1 %v966_v20  ;;  %v250_v20 = vld [vmem:[%s4929_s14 + $0x110] sm:$0xff] }
  0x9d   : > { %964 = vmax.xlane.f32.xlu0 %v963_v47  ;;  %v5292_v29 = vmul.f32 %v4945_v6, %v250_v20  ;;  %v969_v47 = vmax.f32 %v5284_v45, %v5287_v21 }
  0x9f   : > { %8368 = vst [vmem:[#allocation32_spill] sm:$0xff] %v5292_v29 }
  0xa4   : > { %973 = vmax.xlane.f32.xlu1 %v972_v62  ;;  %v780_v62 = vmax.f32 %v5292_v29, %v5295_v34 }
  0xa5   : > { %970 = vmax.xlane.f32.xlu0 %v969_v47 }
  0xa6   : > { %781 = vmax.xlane.f32.xlu2 %v780_v62 }
  0xaf   : > { %v743_v0 = vpop.xlane.xlu2 %742  ;;  %v737_v5 = vpop.xlane.xlu1 %736 }
  0xb0   : > { %v731_v33 = vpop.xlane.xlu0 %730  ;;  %v1117_v28 = vsub.f32 %v4954_v9, %v737_v5  ;;  %v1118_v18 = vsub.f32 %v4957_v10, %v737_v5  ;;  %v1122_v9 = vsub.f32 %v4951_v8, %v743_v0 }
  0xb1   : > { %v1113_v11 = vsub.f32 %v4961_v12, %v731_v33  ;;  %v1114_v46 = vsub.f32 %v4964_v13, %v731_v33  ;;  %v1121_v12 = vsub.f32 %v4948_v7, %v743_v0 }
  0xb2   : > { %v1377_v62 = vmul.f32 1.442695, %v1117_v28  ;;  %v1379_v34 = vmul.f32 1.442695, %v1118_v18 }
  0xb3   : > { %v1369_v20 = vmul.f32 1.442695, %v1113_v11  ;;  %v1371_v63 = vmul.f32 1.442695, %v1114_v46  ;;  %v1385_v33 = vmul.f32 1.442695, %v1121_v12 }
  0xb5   : > { %3940 = vpow2.f32 %v1369_v20 }
  0xb6   : > { %3942 = vpow2.f32 %v1371_v63 }
  0xb7   : > { %v5305_v1 = vpop.xlane.xlu2 %745  ;;  %v5307_v21 = vpop.xlane.xlu1 %739  ;;  %3944 = vpow2.f32 %v1377_v62  ;;  %v1387_v62 = vmul.f32 1.442695, %v1122_v9 }
  0xb8   : > { %v734_v47 = vpop.xlane.xlu0 %733  ;;  %3946 = vpow2.f32 %v1379_v34 }
  0xb9   : > { %v1115_v7 = vsub.f32 %v4990_v26, %v734_v47  ;;  %v1116_v8 = vsub.f32 %v4993_v27, %v734_v47 }
  0xbb   : > { %v5309_v29 = vpop.eup %3940  ;;  %v1375_v12 = vmul.f32 1.442695, %v1116_v8 }
  0xbc   : > { %v5312_v13 = vpop.eup %3942 }
  0xbd   : > { %v1881_v11 = vadd.f32 %v5312_v13, %v5309_v29  ;;  %v5323_v34 = vpop.eup %3944 }
  0xbe   : > { %v5325_v0 = vpop.eup %3946 }
  0xbf   : > { %v923_v10 = vpop.xlane.xlu2 %922  ;;  %v5315_v46 = vpop.xlane.xlu1 %751  ;;  %1882 = vadd.xlane.f32.xlu1 %v1881_v11  ;;  %v1887_v27 = vadd.f32 %v5325_v0, %v5323_v34 }
  0xc0   : > { %v1241_v63 = vsub.f32 %v5008_v37, %v923_v10  ;;  %v1242_v18 = vsub.f32 %v5011_v38, %v923_v10  ;;  %v749_v5 = vpop.xlane.xlu0 %748  ;;  %v1373_v37 = vmul.f32 1.442695, %v1115_v7 }
  0xc1   : > { %v1125_v38 = vsub.f32 %v5020_v41, %v749_v5  ;;  %v1126_v26 = vsub.f32 %v5023_v42, %v749_v5 }
  0xc2   : > { %v1625_v20 = vmul.f32 1.442695, %v1241_v63  ;;  %v1627_v28 = vmul.f32 1.442695, %v1242_v18 }
  0xc3   : > { %v1395_v42 = vmul.f32 1.442695, %v1126_v26 }
  0xc4   : > { %3948 = vpow2.f32 %v1625_v20 }
  0xc5   : > { %3950 = vpow2.f32 %v1627_v28 }
  0xc6   : > { %3952 = vpow2.f32 %v1385_v33  ;;  %v1393_v33 = vmul.f32 1.442695, %v1125_v38 }
  0xc7   : > { %3954 = vpow2.f32 %v1387_v62  ;;  %v5329_v10 = vpop.xlane.xlu2 %757  ;;  %v755_v11 = vpop.xlane.xlu1 %754  ;;  %1888 = vadd.xlane.f32.xlu1 %v1887_v27 }
  0xc8   : > { %v926_v47 = vpop.xlane.xlu0 %925  ;;  %3956 = vpow2.f32 %v1373_v37  ;;  %v1129_v5 = vsub.f32 %v5044_v54, %v755_v11  ;;  %v1130_v62 = vsub.f32 %v5047_v55, %v755_v11  ;;  %v1119_v55 = vsub.f32 %v4984_v24, %v5307_v21 }
  0xc9   : > { %v1243_v9 = vsub.f32 %v5050_v56, %v926_v47  ;;  %v1244_v63 = vsub.f32 %v5053_v57, %v926_v47  ;;  %3958 = vpow2.f32 %v1375_v12 }
  0xca   : > { %v5335_v18 = vpop.eup %3948  ;;  %3960 = vpow2.f32 %v1393_v33  ;;  %v1401_v8 = vmul.f32 1.442695, %v1129_v5  ;;  %v1403_v11 = vmul.f32 1.442695, %v1130_v62  ;;  %v1381_v24 = vmul.f32 1.442695, %v1119_v55 }
  0xcb   : > { %v5337_v41 = vpop.eup %3950  ;;  %v1629_v20 = vmul.f32 1.442695, %v1243_v9  ;;  %v1631_v57 = vmul.f32 1.442695, %v1244_v63  ;;  %3962 = vpow2.f32 %v1395_v42  ;;  %v1120_v42 = vsub.f32 %v4987_v25, %v5307_v21 }
  0xcc   : > { %v5340_v7 = vpop.eup %3952  ;;  %v2073_v28 = vadd.f32 %v5337_v41, %v5335_v18 }
  0xcd   : > { %v5344_v56 = vpop.eup %3954  ;;  %3964 = vpow2.f32 %v1629_v20  ;;  %v1383_v25 = vmul.f32 1.442695, %v1120_v42 }
  0xce   : > { %2074 = vadd.xlane.f32.xlu2 %v2073_v28  ;;  %v5349_v12 = vpop.eup %3956  ;;  %v1893_v54 = vadd.f32 %v5344_v56, %v5340_v7  ;;  %3966 = vpow2.f32 %v1631_v57 }
  0xcf   : > { %v929_v37 = vpop.xlane.xlu2 %928  ;;  %v5347_v38 = vpop.xlane.xlu1 %763  ;;  %3968 = vpow2.f32 %v1401_v8 }
  0xd0   : > { %v1245_v26 = vsub.f32 %v5068_v3, %v929_v37  ;;  %v1246_v27 = vsub.f32 %v5071_v4, %v929_v37  ;;  %v761_v47 = vpop.xlane.xlu0 %760  ;;  %v5355_v9 = vpop.eup %3958  ;;  %1894 = vadd.xlane.f32.xlu1 %v1893_v54 }
  0xd1   : > { %v5361_v5 = vpop.eup %3960  ;;  %v1884_v3 = vadd.f32 %v5355_v9, %v5349_v12  ;;  %v1133_v28 = vsub.f32 %v5080_v14, %v761_v47  ;;  %v1134_v21 = vsub.f32 %v5083_v15, %v761_v47 }
  0xd2   : > { %v1633_v63 = vmul.f32 1.442695, %v1245_v26  ;;  %v1635_v33 = vmul.f32 1.442695, %v1246_v27  ;;  %8370 = vst [vmem:[#allocation34_spill] sm:$0xff] %v5361_v5  ;;  %v5365_v4 = vpop.eup %3962 }
  0xd3   : > { %8371 = vst [vmem:[#allocation35_spill] sm:$0xff] %v5365_v4  ;;  %v5367_v20 = vpop.eup %3964  ;;  %v1899_v37 = vadd.f32 %v5365_v4, %v5361_v5 }
  0xd4   : > { %3970 = vpow2.f32 %v1633_v63  ;;  %v5370_v57 = vpop.eup %3966  ;;  %v1411_v63 = vmul.f32 1.442695, %v1134_v21 }
  0xd5   : > { %3972 = vpow2.f32 %v1635_v33  ;;  %v2076_v54 = vadd.f32 %v5370_v57, %v5367_v20  ;;  %v5381_v27 = vpop.eup %3968 }
  0xd6   : > { %3974 = vpow2.f32 %v1403_v11  ;;  %1885 = vadd.xlane.f32.xlu2 %v1884_v3  ;;  %8372 = vst [vmem:[#allocation36_spill] sm:$0xff] %v5381_v27  ;;  %v1409_v11 = vmul.f32 1.442695, %v1133_v28 }
  0xd7   : > { %v5373_v62 = vpop.xlane.xlu2 %769  ;;  %v5375_v8 = vpop.xlane.xlu1 %766  ;;  %3976 = vpow2.f32 %v1381_v24  ;;  %2077 = vadd.xlane.f32.xlu0 %v2076_v54 }
  0xd8   : > { %v932_v26 = vpop.xlane.xlu0 %931  ;;  %1900 = vadd.xlane.f32.xlu1 %v1899_v37  ;;  %3978 = vpow2.f32 %v1383_v25 }
  0xd9   : > { %v1247_v14 = vsub.f32 %v5110_v35, %v932_v26  ;;  %v1248_v15 = vsub.f32 %v5113_v36, %v932_v26  ;;  %3980 = vpow2.f32 %v1409_v11 }
  0xda   : > { %v5384_v55 = vpop.eup %3970  ;;  %3982 = vpow2.f32 %v1411_v63 }
  0xdb   : > { %v5387_v47 = vpop.eup %3972  ;;  %v1637_v42 = vmul.f32 1.442695, %v1247_v14  ;;  %v1639_v4 = vmul.f32 1.442695, %v1248_v15 }
  0xdc   : > { %v5389_v33 = vpop.eup %3974  ;;  %v2079_v3 = vadd.f32 %v5387_v47, %v5384_v55 }
  0xdd   : > { %8373 = vst [vmem:[#allocation37_spill] sm:$0xff] %v5389_v33  ;;  %v1905_v35 = vadd.f32 %v5389_v33, %v5381_v27  ;;  %v5395_v36 = vpop.eup %3976  ;;  %3984 = vpow2.f32 %v1637_v42 }
  0xde   : > { %2080 = vadd.xlane.f32.xlu2 %v2079_v3  ;;  %v5402_v26 = vpop.eup %3978  ;;  %3986 = vpow2.f32 %v1639_v4 }
  0xdf   : > { %v938_v24 = vpop.xlane.xlu2 %937  ;;  %v935_v28 = vpop.xlane.xlu1 %934 }
  0xe0   : > { %v1251_v25 = vsub.f32 %v5128_v58, %v938_v24  ;;  %v1252_v21 = vsub.f32 %v5131_v59, %v938_v24  ;;  %v1249_v37 = vsub.f32 %v5134_v60, %v935_v28  ;;  %v5400_v54 = vpop.xlane.xlu0 %772  ;;  %v1250_v14 = vsub.f32 %v5137_v61, %v935_v28  ;;  %1906 = vadd.xlane.f32.xlu1 %v1905_v35  ;;  %v5405_v3 = vpop.eup %3980  ;;  %v383_v28 = vld [vmem:[%s4929_s14 + $0x538] sm:$0xff] }
  0xe1   : > { %8374 = vst [vmem:[#allocation38_spill] sm:$0xff] %v5405_v3  ;;  %v1123_v58 = vsub.f32 %v4978_v22, %v5305_v1  ;;  %v1890_v59 = vadd.f32 %v5402_v26, %v5395_v36  ;;  %v5411_v60 = vpop.eup %3982  ;;  %v1124_v61 = vsub.f32 %v4981_v23, %v5305_v1  ;;  %v382_v22 = vld [vmem:[%s4929_s14 + $0x530] sm:$0xff] }
  0xe2   : > { %v1645_v11 = vmul.f32 1.442695, %v1251_v25  ;;  %v1647_v15 = vmul.f32 1.442695, %v1252_v21  ;;  %v1641_v63 = vmul.f32 1.442695, %v1249_v37  ;;  %v1911_v21 = vadd.f32 %v5411_v60, %v5405_v3 }
  0xe3   : > { %v1643_v42 = vmul.f32 1.442695, %v1250_v14  ;;  %8375 = vst [vmem:[#allocation39_spill] sm:$0xff] %v5411_v60  ;;  %v5415_v4 = vpop.eup %3984  ;;  %v1389_v25 = vmul.f32 1.442695, %v1123_v58  ;;  %v1140_v58 = vsub.f32 %v5101_v32, %v5373_v62  ;;  %v253_v32 = vld [vmem:[%s4929_s14 + $0x128] sm:$0xff] }
  0xe4   : > { %3988 = vpow2.f32 %v1645_v11  ;;  %v5417_v35 = vpop.eup %3986  ;;  %v1391_v1 = vmul.f32 1.442695, %v1124_v61  ;;  %v1139_v11 = vsub.f32 %v5098_v31, %v5373_v62 }
  0xe5   : > { %3990 = vpow2.f32 %v1647_v15  ;;  %v2082_v37 = vadd.f32 %v5417_v35, %v5415_v4  ;;  %v5434_v15 = vmul.f32 %v4945_v6, %v382_v22  ;;  %v1423_v60 = vmul.f32 1.442695, %v1140_v58 }
  0xe6   : > { %3992 = vpow2.f32 %v1641_v63  ;;  %1891 = vadd.xlane.f32.xlu2 %v1890_v59  ;;  %v5437_v63 = vmul.f32 %v4945_v6, %v383_v28  ;;  %v1421_v31 = vmul.f32 1.442695, %v1139_v11  ;;  %v1127_v11 = vsub.f32 %v5014_v39, %v5315_v46 }
  0xe7   : > { %3994 = vpow2.f32 %v1643_v42  ;;  %v5419_v24 = vpop.xlane.xlu1 %778  ;;  %2083 = vadd.xlane.f32.xlu0 %v2082_v37  ;;  %v252_v37 = vld [vmem:[%s4929_s14 + $0x120] sm:$0xff]  ;;  %v1128_v39 = vsub.f32 %v5017_v40, %v5315_v46 }
  0xe8   : > { %v5427_v23 = vpop.xlane.xlu0 %775  ;;  %1912 = vadd.xlane.f32.xlu1 %v1911_v21  ;;  %3996 = vpow2.f32 %v1389_v25  ;;  %v978_v22 = vmax.f32 %v5434_v15, %v5437_v63  ;;  %v5462_v5 = vmul.f32 %v4945_v6, %v252_v37 }
  0xe9   : > { %3998 = vpow2.f32 %v1391_v1 }
  0xea   : > { %v5429_v14 = vpop.eup %3988  ;;  %4000 = vpow2.f32 %v1421_v31 }
  0xeb   : > { %v5439_v42 = vpop.eup %3990  ;;  %4002 = vpow2.f32 %v1423_v60 }
  0xec   : > { %8376 = vst [vmem:[#allocation40_spill] sm:$0xff] %v5439_v42  ;;  %v5443_v59 = vpop.eup %3992  ;;  %v2088_v28 = vadd.f32 %v5439_v42, %v5429_v14 }
  0xed   : > { %v5445_v61 = vpop.eup %3994 }
  0xee   : > { %v2085_v21 = vadd.f32 %v5445_v61, %v5443_v59  ;;  %v5464_v42 = vpop.eup %3996 }
  0xef   : > { %v944_v3 = vpop.xlane.xlu1 %943  ;;  %2089 = vadd.xlane.f32.xlu0 %v2088_v28  ;;  %v1399_v28 = vmul.f32 1.442695, %v1128_v39 }
  0xf0   : > { %2086 = vadd.xlane.f32.xlu2 %v2085_v21  ;;  %v1255_v62 = vsub.f32 %v5176_v48, %v944_v3  ;;  %v1256_v25 = vsub.f32 %v5179_v49, %v944_v3  ;;  %v941_v1 = vpop.xlane.xlu0 %940  ;;  %979 = vmax.xlane.f32.xlu1 %v978_v22  ;;  %v5467_v49 = vmul.f32 %v4945_v6, %v253_v32  ;;  %v5469_v3 = vpop.eup %3998  ;;  %v1397_v21 = vmul.f32 1.442695, %v1127_v11 }
  0xf1   : > { %v1253_v33 = vsub.f32 %v5182_v50, %v941_v1  ;;  %v1254_v27 = vsub.f32 %v5185_v51, %v941_v1  ;;  %v1896_v31 = vadd.f32 %v5469_v3, %v5464_v42  ;;  %v5477_v32 = vpop.eup %4000 }
  0xf2   : > { %v1653_v58 = vmul.f32 1.442695, %v1255_v62  ;;  %v1655_v48 = vmul.f32 1.442695, %v1256_v25  ;;  %v783_v22 = vmax.f32 %v5462_v5, %v5467_v49  ;;  %8377 = vst [vmem:[#allocation41_spill] sm:$0xff] %v5477_v32 }
  0xf3   : > { %v1649_v50 = vmul.f32 1.442695, %v1253_v33  ;;  %v1651_v51 = vmul.f32 1.442695, %v1254_v27  ;;  %v5481_v33 = vpop.eup %4002 }
  0xf4   : > { %4004 = vpow2.f32 %v1653_v58  ;;  %8378 = vst [vmem:[#allocation42_spill] sm:$0xff] %v5481_v33 }
  0xf5   : > { %4006 = vpow2.f32 %v1655_v48 }
  0xf6   : > { %4008 = vpow2.f32 %v1649_v50  ;;  %v1920_v50 = vadd.f32 %v5481_v33, %v5477_v32  ;;  %v380_v33 = vld [vmem:[%s4929_s14 + $0x520] sm:$0xff] }
  0xf7   : > { %4010 = vpow2.f32 %v1651_v51  ;;  %v950_v37 = vpop.xlane.xlu1 %949 }
  0xf8   : > { %1897 = vadd.xlane.f32.xlu2 %v1896_v31  ;;  %v1259_v40 = vsub.f32 %v5196_v19, %v950_v37  ;;  %v1260_v46 = vsub.f32 %v5199_v30, %v950_v37  ;;  %v947_v27 = vpop.xlane.xlu0 %946  ;;  %4012 = vpow2.f32 %v1397_v21  ;;  %784 = vmax.xlane.f32.xlu1 %v783_v22 }
  0xf9   : > { %v1257_v1 = vsub.f32 %v5202_v43, %v947_v27  ;;  %4014 = vpow2.f32 %v1399_v28  ;;  %v1258_v58 = vsub.f32 %v5205_v44, %v947_v27 }
  0xfa   : > { %v5483_v60 = vpop.eup %4004  ;;  %v1661_v62 = vmul.f32 1.442695, %v1259_v40  ;;  %v1663_v25 = vmul.f32 1.442695, %v1260_v46 }
  0xfb   : > { %v5486_v11 = vpop.eup %4006  ;;  %v1657_v39 = vmul.f32 1.442695, %v1257_v1  ;;  %v1659_v51 = vmul.f32 1.442695, %v1258_v58 }
  0xfc   : > { %v5489_v48 = vpop.eup %4008  ;;  %4016 = vpow2.f32 %v1661_v62  ;;  %v2094_v19 = vadd.f32 %v5486_v11, %v5483_v60 }
  0xfd   : > { %v5493_v30 = vpop.eup %4010  ;;  %4018 = vpow2.f32 %v1663_v25  ;;  %v1131_v25 = vsub.f32 %v5038_v52, %v5329_v10 }
  0xfe   : > { %2095 = vadd.xlane.f32.xlu0 %v2094_v19  ;;  %v2091_v43 = vadd.f32 %v5493_v30, %v5489_v48  ;;  %v5499_v44 = vpop.eup %4012  ;;  %4020 = vpow2.f32 %v1657_v39 }
  0xff   : > { %v956_v21 = vpop.xlane.xlu1 %955  ;;  %v5503_v37 = vpop.eup %4014  ;;  %4022 = vpow2.f32 %v1659_v51  ;;  %v1405_v39 = vmul.f32 1.442695, %v1131_v25  ;;  %v381_v25 = vld [vmem:[%s4929_s14 + $0x528] sm:$0xff] }
 0x100   : > { %2092 = vadd.xlane.f32.xlu2 %v2091_v43  ;;  %v1263_v31 = vsub.f32 %v5216_v16, %v956_v21  ;;  %v1264_v22 = vsub.f32 %v5219_v17, %v956_v21  ;;  %v953_v28 = vpop.xlane.xlu0 %952  ;;  %1921 = vadd.xlane.f32.xlu1 %v1920_v50  ;;  %v1132_v17 = vsub.f32 %v5041_v53, %v5329_v10  ;;  %v8383_v53 = vld [vmem:[#allocation22_spill] sm:$0xff] }
 0x101   : > { %v1902_v1 = vadd.f32 %v5503_v37, %v5499_v44  ;;  %v5541_v32 = vmul.f32 %v4945_v6, %v381_v25 }
 0x102   : > { %v5505_v40 = vpop.eup %4016  ;;  %v1669_v46 = vmul.f32 1.442695, %v1263_v31  ;;  %v1671_v27 = vmul.f32 1.442695, %v1264_v22  ;;  %v1407_v51 = vmul.f32 1.442695, %v1132_v17 }
 0x103   : > { %8379 = vst [vmem:[#allocation43_spill] sm:$0xff] %v5505_v40  ;;  %v5507_v62 = vpop.eup %4018  ;;  %v8385_v31 = vld [vmem:[#allocation20_spill] sm:$0xff] }
 0x104   : > { %8380 = vst [vmem:[#allocation44_spill] sm:$0xff] %v5507_v62  ;;  %4024 = vpow2.f32 %v1669_v46  ;;  %v2100_v16 = vadd.f32 %v5507_v62, %v5505_v40  ;;  %v5517_v19 = vpop.eup %4020  ;;  %v1261_v22 = vsub.f32 %v8385_v31, %v953_v28  ;;  %v5538_v31 = vmul.f32 %v4945_v6, %v380_v33 }
 0x105   : > { %4026 = vpow2.f32 %v1671_v27  ;;  %8381 = vst [vmem:[#allocation45_spill] sm:$0xff] %v5517_v19  ;;  %v5522_v43 = vpop.eup %4022  ;;  %v8387_v27 = vld [vmem:[#allocation21_spill] sm:$0xff] }
 0x106   : > { %2101 = vadd.xlane.f32.xlu0 %v2100_v16  ;;  %8382 = vst [vmem:[#allocation46_spill] sm:$0xff] %v5522_v43  ;;  %v1262_v16 = vsub.f32 %v8387_v27, %v953_v28  ;;  %4028 = vpow2.f32 %v1405_v39  ;;  %v8388_v27 = vld [vmem:[#allocation27_spill] sm:$0xff]  ;;  %v975_v33 = vmax.f32 %v5538_v31, %v5541_v32 }
 0x107   : > { %v962_v58 = vpop.xlane.xlu1 %961  ;;  %4030 = vpow2.f32 %v1407_v51  ;;  %v8391_v51 = vld [vmem:[#allocation12_spill] sm:$0xff] }
 0x108   : > { %1903 = vadd.xlane.f32.xlu2 %v1902_v1  ;;  %v5519_v52 = vpop.xlane.xlu0 %958  ;;  %v1267_v50 = vsub.f32 %v5236_v2, %v962_v58  ;;  %v1268_v10 = vsub.f32 %v8383_v53, %v962_v58  ;;  %v2097_v2 = vadd.f32 %v5522_v43, %v5517_v19  ;;  %v1665_v53 = vmul.f32 1.442695, %v1261_v22  ;;  %v388_v43 = vld [vmem:[%s4929_s14 + $0x560] sm:$0xff]  ;;  %v389_v19 = vld [vmem:[%s4929_s14 + $0x568] sm:$0xff] }
 0x109   : > { %v1667_v28 = vmul.f32 1.442695, %v1262_v16  ;;  %v8393_v16 = vld [vmem:[#allocation13_spill] sm:$0xff] }
 0x10a   : > { %v5525_v21 = vpop.eup %4024  ;;  %v1677_v17 = vmul.f32 1.442695, %v1267_v50  ;;  %v1679_v58 = vmul.f32 1.442695, %v1268_v10  ;;  %v1137_v10 = vsub.f32 %v8391_v51, %v5375_v8  ;;  %v1138_v25 = vsub.f32 %v8393_v16, %v5375_v8 }
 0x10b   : > { %8384 = vst [vmem:[#allocation22_spill] sm:$0xff] %v5525_v21  ;;  %v5528_v46 = vpop.eup %4026 }
 0x10c   : > { %8386 = vst [vmem:[#allocation20_spill] sm:$0xff] %v5528_v46  ;;  %v2106_v1 = vadd.f32 %v5528_v46, %v5525_v21  ;;  %4032 = vpow2.f32 %v1677_v17  ;;  %v8389_v21 = vld [vmem:[#allocation28_spill] sm:$0xff]  ;;  %v5545_v50 = vpop.eup %4028  ;;  %v8394_v17 = vld [vmem:[#allocation10_spill] sm:$0xff]  ;;  %v1417_v51 = vmul.f32 1.442695, %v1137_v10 }
 0x10d   : > { %4034 = vpow2.f32 %v1679_v58  ;;  %8390 = vst [vmem:[#allocation21_spill] sm:$0xff] %v5545_v50  ;;  %v5551_v22 = vpop.eup %4030 }
 0x10e   : > { %2107 = vadd.xlane.f32.xlu0 %v2106_v1  ;;  %4036 = vpow2.f32 %v1665_v53  ;;  %8392 = vst [vmem:[#allocation27_spill] sm:$0xff] %v5551_v22  ;;  %v1908_v8 = vadd.f32 %v5551_v22, %v5545_v50  ;;  %v255_v50 = vld [vmem:[%s4929_s14 + $0x138] sm:$0xff] }
 0x10f   : > { %4038 = vpow2.f32 %v1667_v28  ;;  %v5557_v58 = vpop.xlane.xlu1 %967 }
 0x110   : > { %2098 = vadd.xlane.f32.xlu2 %v2097_v2  ;;  %v965_v39 = vpop.xlane.xlu0 %964 }
 0x111   : > { %v1269_v46 = vsub.f32 %v8388_v27, %v965_v39  ;;  %v1270_v62 = vsub.f32 %v8389_v21, %v965_v39  ;;  %v1135_v21 = vsub.f32 %v8394_v17, %v5347_v38  ;;  %v8395_v39 = vld [vmem:[#allocation11_spill] sm:$0xff] }
 0x112   : > { %v1136_v27 = vsub.f32 %v8395_v39, %v5347_v38  ;;  %v5561_v53 = vpop.eup %4032  ;;  %v1419_v38 = vmul.f32 1.442695, %v1138_v25 }
 0x113   : > { %v1681_v1 = vmul.f32 1.442695, %v1269_v46  ;;  %v1683_v2 = vmul.f32 1.442695, %v1270_v62  ;;  %8396 = vst [vmem:[#allocation28_spill] sm:$0xff] %v5561_v53  ;;  %v3862_v62 = vld [vmem:[%s8156_s2 + $0x38] sm:$0xff]  ;;  %v5571_v28 = vpop.eup %4034 }
 0x114   : > { %v3870_v46 = vld [vmem:[%s8156_s2 + $0x78] sm:$0xff]  ;;  %8397 = vst [vmem:[#allocation12_spill] sm:$0xff] %v5571_v28  ;;  %v5573_v16 = vpop.eup %4036  ;;  %2909 = vmatpush.bf16.msra.mxu0 %v3862_v62  ;;  %3871 = vmatpush.bf16.msra.mxu2 %v3862_v62  ;;  %v2112_v39 = vadd.f32 %v5571_v28, %v5561_v53 }
 0x115   : > { %4040 = vpow2.f32 %v1681_v1  ;;  %8398 = vst [vmem:[#allocation13_spill] sm:$0xff] %v5573_v16  ;;  %v1413_v1 = vmul.f32 1.442695, %v1135_v21  ;;  %v5575_v10 = vpop.eup %4038  ;;  %3238 = vmatpush.bf16.msra.mxu1 %v3870_v46  ;;  %3879 = vmatpush.bf16.msra.mxu3 %v3870_v46  ;;  %v8402_v21 = vld [vmem:[#allocation24_spill] sm:$0xff] }
 0x116   : > { %4042 = vpow2.f32 %v1683_v2  ;;  %976 = vmax.xlane.f32.xlu0 %v975_v33  ;;  %8399 = vst [vmem:[#allocation10_spill] sm:$0xff] %v5575_v10  ;;  %v1415_v33 = vmul.f32 1.442695, %v1136_v27  ;;  %v8400_v2 = vld [vmem:[#allocation23_spill] sm:$0xff]  ;;  %v2103_v27 = vadd.f32 %v5575_v10, %v5573_v16  ;;  %v259_v62 = vld [vmem:[%s4929_s14 + $0x158] sm:$0xff] }
 0x117   : > { %4044 = vpow2.f32 %v1417_v51  ;;  %v1265_v17 = vsub.f32 %v8400_v2, %v5519_v52  ;;  %v258_v51 = vld [vmem:[%s4929_s14 + $0x150] sm:$0xff]  ;;  %v974_v46 = vpop.xlane.xlu1 %973 }
 0x118   : > { %1909 = vadd.xlane.f32.xlu2 %v1908_v8  ;;  %4046 = vpow2.f32 %v1419_v38  ;;  %v1266_v8 = vsub.f32 %v8402_v21, %v5519_v52  ;;  %v3861_v38 = vld [vmem:[%s8156_s2 + $0x30] sm:$0xff]  ;;  %v5600_v21 = vmul.f32 %v4945_v6, %v258_v51 }
 0x119   : > { %4048 = vpow2.f32 %v1413_v1  ;;  %v1673_v28 = vmul.f32 1.442695, %v1265_v17  ;;  %v3869_v52 = vld [vmem:[%s8156_s2 + $0x70] sm:$0xff]  ;;  %2910 = vmatpush.bf16.msra.mxu0 %v3861_v38  ;;  %v3860_v17 = vld [vmem:[%s8156_s2 + $0x28] sm:$0xff]  ;;  %3872 = vmatpush.bf16.msra.mxu2 %v3861_v38 }
 0x11a   : > { %4050 = vpow2.f32 %v1415_v33  ;;  %v1675_v1 = vmul.f32 1.442695, %v1266_v8  ;;  %8404 = vst [vmem:[#allocation24_spill] sm:$0xff] %v5600_v21  ;;  %v5603_v33 = vmul.f32 %v4945_v6, %v259_v62  ;;  %v8408_v8 = vld [vmem:[#allocation29_spill] sm:$0xff]  ;;  %3239 = vmatpush.bf16.msra.mxu1 %v3869_v52  ;;  %v3868_v62 = vld [vmem:[%s8156_s2 + $0x68] sm:$0xff]  ;;  %3880 = vmatpush.bf16.msra.mxu3 %v3869_v52  ;;  %v386_v16 = vld [vmem:[%s4929_s14 + $0x550] sm:$0xff] }
 0x11b   : > { %v5581_v25 = vpop.eup %4040  ;;  %v1275_v51 = vsub.f32 %v8408_v8, %v974_v46  ;;  %4052 = vpow2.f32 %v1673_v28  ;;  %v387_v8 = vld [vmem:[%s4929_s14 + $0x558] sm:$0xff]  ;;  %v5632_v52 = vmul.f32 %v4945_v6, %v386_v16 }
 0x11c   : > { %8401 = vst [vmem:[#allocation11_spill] sm:$0xff] %v5581_v25  ;;  %v5585_v40 = vpop.eup %4042  ;;  %4054 = vpow2.f32 %v1675_v1  ;;  %v792_v10 = vmax.f32 %v5600_v21, %v5603_v33  ;;  %v5635_v1 = vmul.f32 %v4945_v6, %v387_v8 }
 0x11d   : > { %8403 = vst [vmem:[#allocation23_spill] sm:$0xff] %v5585_v40  ;;  %v2115_v2 = vadd.f32 %v5585_v40, %v5581_v25  ;;  %v5605_v40 = vpop.eup %4044  ;;  %2911 = vmatpush.bf16.msra.mxu0 %v3860_v17  ;;  %v1693_v22 = vmul.f32 1.442695, %v1275_v51  ;;  %3873 = vmatpush.bf16.msra.mxu2 %v3860_v17  ;;  %v3867_v17 = vld [vmem:[%s8156_s2 + $0x60] sm:$0xff]  ;;  %v5644_v51 = vmul.f32 %v4945_v6, %v388_v43 }
 0x11e   : > { %2113 = vadd.xlane.f32.xlu0 %v2112_v39  ;;  %8405 = vst [vmem:[#allocation47_spill] sm:$0xff] %v5603_v33  ;;  %v5610_v39 = vpop.eup %4046  ;;  %3240 = vmatpush.bf16.msra.mxu1 %v3868_v62  ;;  %v8417_v43 = vld [vmem:[#allocation18_spill] sm:$0xff] }
 0x11f   : > { %2116 = vadd.xlane.f32.xlu1 %v2115_v2  ;;  %8406 = vst [vmem:[#allocation48_spill] sm:$0xff] %v5605_v40  ;;  %v5616_v2 = vpop.eup %4048  ;;  %v1917_v38 = vadd.f32 %v5610_v39, %v5605_v40  ;;  %3881 = vmatpush.bf16.msra.mxu3 %v3868_v62  ;;  %v3858_v62 = vld [vmem:[%s8156_s2 + $0x18] sm:$0xff]  ;;  %4056 = vpow2.f32 %v1693_v22  ;;  %v8418_v40 = vld [vmem:[#allocation19_spill] sm:$0xff] }
 0x120   : > { %2104 = vadd.xlane.f32.xlu2 %v2103_v27  ;;  %8407 = vst [vmem:[#allocation49_spill] sm:$0xff] %v5610_v39  ;;  %v8410_v27 = vld [vmem:[#allocation30_spill] sm:$0xff]  ;;  %v5619_v53 = vpop.eup %4050  ;;  %v984_v39 = vmax.f32 %v5632_v52, %v5635_v1 }
 0x121   : > { %8409 = vst [vmem:[#allocation29_spill] sm:$0xff] %v5616_v2  ;;  %v1276_v25 = vsub.f32 %v8410_v27, %v974_v46  ;;  %v1914_v28 = vadd.f32 %v5619_v53, %v5616_v2  ;;  %v3859_v27 = vld [vmem:[%s8156_s2 + $0x20] sm:$0xff]  ;;  %v5649_v16 = vpop.eup %4052 }
 0x122   : > { %8411 = vst [vmem:[#allocation30_spill] sm:$0xff] %v5619_v53  ;;  %2912 = vmatpush.bf16.msra.mxu0 %v3859_v27  ;;  %v5654_v8 = vpop.eup %4054  ;;  %3874 = vmatpush.bf16.msra.mxu2 %v3859_v27  ;;  %v256_v27 = vld [vmem:[%s4929_s14 + $0x140] sm:$0xff]  ;;  %v257_v53 = vld [vmem:[%s4929_s14 + $0x148] sm:$0xff] }
 0x123   : > { %v1695_v46 = vmul.f32 1.442695, %v1276_v25  ;;  %8412 = vst [vmem:[#allocation50_spill] sm:$0xff] %v5635_v1  ;;  %v5647_v25 = vmul.f32 %v4945_v6, %v389_v19  ;;  %3241 = vmatpush.bf16.msra.mxu1 %v3867_v17  ;;  %v3866_v19 = vld [vmem:[%s8156_s2 + $0x58] sm:$0xff]  ;;  %3882 = vmatpush.bf16.msra.mxu3 %v3867_v17  ;;  %v2109_v21 = vadd.f32 %v5654_v8, %v5649_v16  ;;  %v971_v1 = vpop.xlane.xlu0 %970 }
 0x124   : > { %8414 = vst [vmem:[#allocation52_spill] sm:$0xff] %v5649_v16  ;;  %v8419_v2 = vld [vmem:[#allocation17_spill] sm:$0xff] }
 0x125   : > { %8413 = vst [vmem:[#allocation51_spill] sm:$0xff] %v5647_v25  ;;  %4058 = vpow2.f32 %v1695_v46  ;;  %v987_v22 = vmax.f32 %v5644_v51, %v5647_v25  ;;  %v1146_v33 = vsub.f32 %v8419_v2, %v5419_v24  ;;  %v3865_v2 = vld [vmem:[%s8156_s2 + $0x50] sm:$0xff]  ;;  %v384_v16 = vld [vmem:[%s4929_s14 + $0x540] sm:$0xff]  ;;  %v385_v25 = vld [vmem:[%s4929_s14 + $0x548] sm:$0xff] }
 0x126   : > { %1918 = vadd.xlane.f32.xlu0 %v1917_v38  ;;  %8415 = vst [vmem:[#allocation53_spill] sm:$0xff] %v5654_v8  ;;  %2913 = vmatpush.bf16.msra.mxu0 %v3858_v62  ;;  %v3856_v8 = vld [vmem:[%s8156_s2 + $0x8] sm:$0xff] }
 0x127   : > { %793 = vmax.xlane.f32.xlu1 %v792_v10  ;;  %v8416_v10 = vld [vmem:[#allocation16_spill] sm:$0xff]  ;;  %3875 = vmatpush.bf16.msra.mxu2 %v3858_v62 }
 0x128   : > { %1915 = vadd.xlane.f32.xlu2 %v1914_v28  ;;  %v1145_v38 = vsub.f32 %v8416_v10, %v5419_v24  ;;  %v1143_v28 = vsub.f32 %v8417_v43, %v5427_v23  ;;  %v1144_v10 = vsub.f32 %v8418_v40, %v5427_v23  ;;  %v254_v43 = vld [vmem:[%s4929_s14 + $0x130] sm:$0xff]  ;;  %3242 = vmatpush.bf16.msra.mxu1 %v3866_v19 }
 0x129   : > { %v5678_v23 = vmul.f32 %v4945_v6, %v256_v27  ;;  %v5681_v40 = vmul.f32 %v4945_v6, %v257_v53  ;;  %3883 = vmatpush.bf16.msra.mxu3 %v3866_v19  ;;  %v3857_v24 = vld [vmem:[%s8156_s2 + $0x10] sm:$0xff]  ;;  %v5694_v53 = vmul.f32 %v4945_v6, %v254_v43  ;;  %v5697_v19 = vmul.f32 %v4945_v6, %v255_v50  ;;  %v8425_v50 = vld [vmem:[#allocation25_spill] sm:$0xff] }
 0x12a   : > { %v1433_v46 = vmul.f32 1.442695, %v1145_v38  ;;  %v1429_v17 = vmul.f32 1.442695, %v1143_v28  ;;  %v5689_v38 = vpop.eup %4056  ;;  %v1431_v62 = vmul.f32 1.442695, %v1144_v10  ;;  %v1273_v27 = vsub.f32 %v5284_v45, %v971_v1  ;;  %2914 = vmatpush.bf16.msra.mxu0 %v3857_v24 }
 0x12b   : > { %8420 = vst [vmem:[#allocation16_spill] sm:$0xff] %v5689_v38  ;;  %v1435_v28 = vmul.f32 1.442695, %v1146_v33  ;;  %v8424_v10 = vld [vmem:[#allocation31_spill] sm:$0xff]  ;;  %3876 = vmatpush.bf16.msra.mxu2 %v3857_v24  ;;  %v1271_v45 = vsub.f32 %v8425_v50, %v5557_v58  ;;  %v789_v33 = vmax.f32 %v5678_v23, %v5681_v40  ;;  %v786_v24 = vmax.f32 %v5694_v53, %v5697_v19 }
 0x12c   : > { %8422 = vst [vmem:[#allocation19_spill] sm:$0xff] %v5694_v53  ;;  %4060 = vpow2.f32 %v1433_v46  ;;  %3243 = vmatpush.bf16.msra.mxu1 %v3865_v2  ;;  %v8426_v46 = vld [vmem:[#allocation26_spill] sm:$0xff] }
 0x12d   : > { %8423 = vst [vmem:[#allocation17_spill] sm:$0xff] %v5697_v19  ;;  %4062 = vpow2.f32 %v1429_v17  ;;  %3884 = vmatpush.bf16.msra.mxu3 %v3865_v2  ;;  %v1685_v2 = vmul.f32 1.442695, %v1271_v45 }
 0x12e   : > { %985 = vmax.xlane.f32.xlu0 %v984_v39  ;;  %v5691_v39 = vpop.eup %4058  ;;  %4064 = vpow2.f32 %v1431_v62  ;;  %2915 = vmatpush.bf16.msra.mxu0 %v3856_v8  ;;  %v3863_v62 = vld [vmem:[%s8156_s2 + $0x40] sm:$0xff] }
 0x12f   : > { %988 = vmax.xlane.f32.xlu1 %v987_v22  ;;  %8421 = vst [vmem:[#allocation18_spill] sm:$0xff] %v5691_v39  ;;  %v1274_v22 = vsub.f32 %v8424_v10, %v971_v1  ;;  %v1272_v1 = vsub.f32 %v8426_v46, %v5557_v58  ;;  %v2124_v43 = vadd.f32 %v5691_v39, %v5689_v38  ;;  %4066 = vpow2.f32 %v1435_v28  ;;  %v3855_v58 = vld [vmem:[%s8156_s2] sm:$0xff] }
 0x130   : > { %2110 = vadd.xlane.f32.xlu2 %v2109_v21  ;;  %v3864_v21 = vld [vmem:[%s8156_s2 + $0x48] sm:$0xff]  ;;  %v1689_v10 = vmul.f32 1.442695, %v1273_v27  ;;  %3877 = vmatpush.bf16.msra.mxu2 %v3856_v8  ;;  %v5734_v8 = vmul.f32 %v4945_v6, %v384_v16 }
 0x131   : > { %v1691_v50 = vmul.f32 1.442695, %v1274_v22  ;;  %3244 = vmatpush.bf16.msra.mxu1 %v3864_v21  ;;  %3885 = vmatpush.bf16.msra.mxu3 %v3864_v21  ;;  %v1687_v27 = vmul.f32 1.442695, %v1272_v1  ;;  %v5729_v22 = vpop.xlane.xlu2 %781  ;;  %v5737_v21 = vmul.f32 %v4945_v6, %v385_v25  ;;  %v8433_v1 = vld [vmem:[#allocation14_spill] sm:$0xff] }
 0x132   : > { %v5717_v17 = vpop.xlane.xlu1 %1882  ;;  %v5727_v28 = vpop.eup %4060  ;;  %4068 = vpow2.f32 %v1689_v10  ;;  %8429 = vst [vmem:[#allocation26_spill] sm:$0xff] %v5734_v8  ;;  %2916 = vmatpush.bf16.msra.mxu0 %v3855_v58  ;;  %v395_v10 = vld [vmem:[%s4929_s14 + $0x598] sm:$0xff] }
 0x133   : > { %8427 = vst [vmem:[#allocation31_spill] sm:$0xff] %v5727_v28  ;;  %v5731_v46 = vpop.eup %4062  ;;  %4070 = vpow2.f32 %v1691_v50  ;;  %v981_v25 = vmax.f32 %v5734_v8, %v5737_v21  ;;  %v8434_v50 = vld [vmem:[#allocation15_spill] sm:$0xff] }
 0x134   : > { %8428 = vst [vmem:[#allocation25_spill] sm:$0xff] %v5731_v46  ;;  %v5739_v45 = vpop.eup %4064  ;;  %3878 = vmatpush.bf16.msra.mxu2 %v3855_v58  ;;  %4072 = vpow2.f32 %v1685_v2  ;;  %v1142_v58 = vsub.f32 %v8434_v50, %v5400_v54  ;;  %v265_v8 = vld [vmem:[%s4929_s14 + $0x188] sm:$0xff] }
 0x135   : > { %8430 = vst [vmem:[#allocation54_spill] sm:$0xff] %v5737_v21  ;;  %3245 = vmatpush.bf16.msra.mxu1 %v3863_v62  ;;  %3886 = vmatpush.bf16.msra.mxu3 %v3863_v62  ;;  %4074 = vpow2.f32 %v1687_v27  ;;  %v1926_v16 = vadd.f32 %v5739_v45, %v5731_v46  ;;  %v262_v46 = vld [vmem:[%s4929_s14 + $0x170] sm:$0xff]  ;;  %v264_v21 = vld [vmem:[%s4929_s14 + $0x180] sm:$0xff] }
 0x136   : > { %790 = vmax.xlane.f32.xlu0 %v789_v33  ;;  %8431 = vst [vmem:[#allocation55_spill] sm:$0xff] %v5739_v45  ;;  %v5741_v33 = vpop.eup %4066 }
 0x137   : > { %2125 = vadd.xlane.f32.xlu1 %v2124_v43  ;;  %8432 = vst [vmem:[#allocation56_spill] sm:$0xff] %v5741_v33  ;;  %v1141_v43 = vsub.f32 %v8433_v1, %v5400_v54  ;;  %v1929_v2 = vadd.f32 %v5741_v33, %v5727_v28  ;;  %v5765_v54 = vmul.f32 %v4945_v6, %v395_v10  ;;  %v1427_v28 = vmul.f32 1.442695, %v1142_v58 }
 0x138   : > { %787 = vmax.xlane.f32.xlu2 %v786_v24  ;;  %v394_v24 = vld [vmem:[%s4929_s14 + $0x590] sm:$0xff]  ;;  %v5757_v62 = vpop.eup %4068 }
 0x139   : > { %8435 = vst [vmem:[#allocation14_spill] sm:$0xff] %v5757_v62  ;;  %v5759_v27 = vpop.eup %4070  ;;  %v5762_v1 = vmul.f32 %v4945_v6, %v394_v24  ;;  %v1425_v38 = vmul.f32 1.442695, %v1141_v43  ;;  %v263_v24 = vld [vmem:[%s4929_s14 + $0x178] sm:$0xff] }
 0x13a   : > { %v5753_v39 = vpop.xlane.xlu1 %1888  ;;  %8436 = vst [vmem:[#allocation15_spill] sm:$0xff] %v5759_v27  ;;  %v5767_v50 = vpop.eup %4072  ;;  %v5787_v58 = vmul.f32 %v4945_v6, %v263_v24 }
 0x13b   : > { %8437 = vst [vmem:[#allocation57_spill] sm:$0xff] %v5762_v1  ;;  %v5769_v33 = vpop.eup %4074  ;;  %4076 = vpow2.f32 %v1425_v38  ;;  %v5790_v38 = vmul.f32 %v4945_v6, %v264_v21 }
 0x13c   : > { %8438 = vst [vmem:[#allocation58_spill] sm:$0xff] %v5765_v54  ;;  %v2118_v10 = vadd.f32 %v5769_v33, %v5767_v50  ;;  %4078 = vpow2.f32 %v1427_v28 }
 0x13d   : > { %8439 = vst [vmem:[#allocation59_spill] sm:$0xff] %v5767_v50  ;;  %4080 = vrcp.f32 %v5717_v17  ;;  %v390_v17 = vld [vmem:[%s4929_s14 + $0x570] sm:$0xff] }
 0x13e   : > { %1927 = vadd.xlane.f32.xlu0 %v1926_v16  ;;  %8440 = vst [vmem:[#allocation60_spill] sm:$0xff] %v5769_v33  ;;  %v2121_v16 = vadd.f32 %v5759_v27, %v5757_v62  ;;  %v5793_v27 = vmul.f32 %v4945_v6, %v265_v8  ;;  %v393_v62 = vld [vmem:[%s4929_s14 + $0x588] sm:$0xff] }
 0x13f   : > { %1930 = vadd.xlane.f32.xlu1 %v1929_v2  ;;  %v996_v2 = vmax.f32 %v5762_v1, %v5765_v54  ;;  %8442 = vst [vmem:[#allocation62_spill] sm:$0xff] %v5787_v58 }
 0x140   : > { %982 = vmax.xlane.f32.xlu2 %v981_v25  ;;  %v5784_v25 = vmul.f32 %v4945_v6, %v262_v46  ;;  %8443 = vst [vmem:[#allocation63_spill] sm:$0xff] %v5790_v38  ;;  %v801_v21 = vmax.f32 %v5790_v38, %v5793_v27 }
 0x141   : > { %v2075_v45 = vpop.xlane.xlu2 %2074  ;;  %8444 = vst [vmem:[#allocation64_spill] sm:$0xff] %v5793_v27 }
 0x142   : > { %8441 = vst [vmem:[#allocation61_spill] sm:$0xff] %v5784_v25  ;;  %v798_v46 = vmax.f32 %v5784_v25, %v5787_v58  ;;  %v5816_v25 = vmul.f32 %v4945_v6, %v393_v62 }
 0x143   : > { %v5781_v43 = vpop.xlane.xlu1 %1894 }
 0x146   : > { %2122 = vadd.xlane.f32.xlu0 %v2121_v16  ;;  %v5796_v16 = vpop.eup %4076 }
 0x147   : > { %997 = vmax.xlane.f32.xlu1 %v996_v2  ;;  %8445 = vst [vmem:[#allocation65_spill] sm:$0xff] %v5796_v16  ;;  %v5800_v24 = vpop.eup %4078  ;;  %v392_v2 = vld [vmem:[%s4929_s14 + $0x580] sm:$0xff] }
 0x148   : > { %2119 = vadd.xlane.f32.xlu2 %v2118_v10  ;;  %8446 = vst [vmem:[#allocation66_spill] sm:$0xff] %v5800_v24  ;;  %v391_v10 = vld [vmem:[%s4929_s14 + $0x578] sm:$0xff]  ;;  %v4081_v50 = vpop.eup %4080  ;;  %v5813_v58 = vmul.f32 %v4945_v6, %v392_v2 }
 0x149   : > { %v1886_v28 = vpop.xlane.xlu2 %1885  ;;  %v5822_v38 = vmul.f32 %v4945_v6, %v391_v10  ;;  %v2394_v62 = vmul.f32 %v4081_v50, %v5312_v13  ;;  %v8448_v10 = vld [vmem:[#allocation33_spill] sm:$0xff] }
 0x14a   : > { %4082 = vrcp.f32 %v1886_v28  ;;  %v2078_v33 = vpop.xlane.xlu0 %2077  ;;  %v1923_v28 = vadd.f32 %v5800_v24, %v5796_v16  ;;  %v1148_v16 = vsub.f32 %v8448_v10, %v5729_v22  ;;  %v260_v13 = vld [vmem:[%s4929_s14 + $0x160] sm:$0xff] }
 0x14b   : > { %4084 = vrcp.f32 %v2075_v45  ;;  %v5806_v8 = vpop.xlane.xlu1 %1900  ;;  %v5819_v45 = vmul.f32 %v4945_v6, %v390_v17  ;;  %v8447_v17 = vld [vmem:[#allocation32_spill] sm:$0xff] }
 0x14c   : > { %4086 = vrcp.f32 %v2078_v33  ;;  %v1147_v24 = vsub.f32 %v8447_v17, %v5729_v22 }
 0x14d   : > { %4088 = vrcp.f32 %v5753_v39 }
 0x14e   : > { %799 = vmax.xlane.f32.xlu0 %v798_v46  ;;  %v2393_v46 = vmul.f32 %v4081_v50, %v5309_v29  ;;  %v990_v29 = vmax.f32 %v5819_v45, %v5822_v38 }
 0x14f   : > { %802 = vmax.xlane.f32.xlu1 %v801_v21  ;;  %v993_v21 = vmax.f32 %v5813_v58, %v5816_v25 }
 0x150   : > { %v4083_v27 = vpop.eup %4082  ;;  %1924 = vadd.xlane.f32.xlu2 %v1923_v28 }
 0x151   : > { %v2081_v54 = vpop.xlane.xlu2 %2080  ;;  %v2395_v2 = vmul.f32 %v4083_v27, %v5349_v12  ;;  %v2396_v33 = vmul.f32 %v4083_v27, %v5355_v9  ;;  %v4085_v28 = vpop.eup %4084  ;;  %v261_v9 = vld [vmem:[%s4929_s14 + $0x168] sm:$0xff] }
 0x152   : > { %v4087_v12 = vpop.eup %4086  ;;  %v2521_v27 = vmul.f32 %v4085_v28, %v5335_v18  ;;  %v2522_v17 = vmul.f32 %v4085_v28, %v5337_v41 }
 0x153   : > { %v2649_v1 = vpack.c.bf16 %v2395_v2, %v2393_v46  ;;  %v2650_v19 = vpack.c.bf16 %v2396_v33, %v2394_v62  ;;  %v5836_v53 = vpop.xlane.xlu1 %1906  ;;  %v2523_v50 = vmul.f32 %v4087_v12, %v5367_v20  ;;  %v2524_v22 = vmul.f32 %v4087_v12, %v5370_v57  ;;  %v4089_v20 = vpop.eup %4088 }
 0x154   : > { %v1437_v46 = vmul.f32 1.442695, %v1147_v24  ;;  %v1439_v2 = vmul.f32 1.442695, %v1148_v16  ;;  %v2398_v10 = vmul.f32 %v4089_v20, %v5325_v0 }
 0x155   : > { %2917 = vmatmul.bf16.vlgmr.msra.gmra.mxu0 %v2649_v1  ;;  %3246 = vmatmul.bf16.vlgmr.msra.gmra.mxu1 %v2650_v19  ;;  %v2713_v62 = vpack.c.bf16 %v2523_v50, %v2521_v27  ;;  %v2714_v33 = vpack.c.bf16 %v2524_v22, %v2522_v17  ;;  %v5846_v19 = vmul.f32 %v4945_v6, %v260_v13 }
 0x156   : > { %994 = vmax.xlane.f32.xlu0 %v993_v21  ;;  %v5849_v1 = vmul.f32 %v4945_v6, %v261_v9  ;;  %v2397_v21 = vmul.f32 %v4089_v20, %v5323_v34 }
 0x157   : > { %3077 = vmatmul.bf16.vlgmr.msra.gmra.mxu2 %v2713_v62  ;;  %3406 = vmatmul.bf16.vlgmr.msra.gmra.mxu3 %v2714_v33 }
 0x158   : > { %991 = vmax.xlane.f32.xlu2 %v990_v29  ;;  %v795_v41 = vmax.f32 %v5846_v19, %v5849_v1 }
 0x159   : > { %v1892_v18 = vpop.xlane.xlu2 %1891 }
 0x15a   : > { %4090 = vrcp.f32 %v1892_v18  ;;  %v2084_v39 = vpop.xlane.xlu0 %2083 }
 0x15b   : > { %4092 = vpow2.f32 %v1437_v46  ;;  %v5853_v57 = vpop.xlane.xlu1 %1912 }
 0x15c   : > { %4094 = vpow2.f32 %v1439_v2 }
 0x15d   : > { %4096 = vrcp.f32 %v2081_v54 }
 0x15e   : > { %4098 = vrcp.f32 %v2084_v39 }
 0x15f   : > { %4100 = vrcp.f32 %v5781_v43 }
 0x160   : > { %v4091_v16 = vpop.eup %4090  ;;  %796 = vmax.xlane.f32.xlu2 %v795_v41 }
 0x161   : > { %v5855_v24 = vpop.eup %4092  ;;  %v2399_v28 = vmul.f32 %v4091_v16, %v5395_v36  ;;  %v2400_v29 = vmul.f32 %v4091_v16, %v5402_v26 }
 0x162   : > { %v5861_v12 = vpop.eup %4094  ;;  %v2090_v0 = vpop.xlane.xlu0 %2089 }
 0x163   : > { %v4097_v13 = vpop.eup %4096  ;;  %v2087_v54 = vpop.xlane.xlu2 %2086  ;;  %v2651_v9 = vpack.c.bf16 %v2399_v28, %v2397_v21  ;;  %v2652_v27 = vpack.c.bf16 %v2400_v29, %v2398_v10  ;;  %v1932_v22 = vadd.f32 %v5861_v12, %v5855_v24 }
 0x164   : > { %v4099_v50 = vpop.eup %4098  ;;  %v980_v17 = vpop.xlane.xlu1 %979  ;;  %v2525_v26 = vmul.f32 %v4097_v13, %v5384_v55  ;;  %v2526_v2 = vmul.f32 %v4097_v13, %v5387_v47  ;;  %4102 = vrcp.f32 %v2087_v54 }
 0x165   : > { %2922 = vmatmul.bf16.gmra.mxu0 %v2651_v9  ;;  %3251 = vmatmul.bf16.gmra.mxu1 %v2652_v27  ;;  %v1279_v34 = vsub.f32 %v5434_v15, %v980_v17  ;;  %v1280_v36 = vsub.f32 %v5437_v63, %v980_v17  ;;  %v2527_v46 = vmul.f32 %v4099_v50, %v5415_v4  ;;  %4104 = vrcp.f32 %v2090_v0  ;;  %v4101_v4 = vpop.eup %4100 }
 0x166   : > { %v2528_v62 = vmul.f32 %v4099_v50, %v5417_v35  ;;  %v2401_v54 = vmul.f32 %v4101_v4, %v5340_v7  ;;  %v8449_v7 = vld [vmem:[#allocation40_spill] sm:$0xff] }
 0x167   : > { %v1701_v33 = vmul.f32 1.442695, %v1279_v34  ;;  %v1703_v18 = vmul.f32 1.442695, %v1280_v36  ;;  %v2715_v41 = vpack.c.bf16 %v2527_v46, %v2525_v26 }
 0x168   : > { %1933 = vadd.xlane.f32.xlu2 %v1932_v22  ;;  %v2716_v15 = vpack.c.bf16 %v2528_v62, %v2526_v2  ;;  %v399_v2 = vld [vmem:[%s4929_s14 + $0x5b8] sm:$0xff] }
 0x169   : > { %4106 = vpow2.f32 %v1701_v33  ;;  %3082 = vmatmul.bf16.gmra.mxu2 %v2715_v41 }
 0x16a   : > { %4108 = vpow2.f32 %v1703_v18  ;;  %3411 = vmatmul.bf16.gmra.mxu3 %v2716_v15  ;;  %v4103_v43 = vpop.eup %4102 }
 0x16b   : > { %v1898_v55 = vpop.xlane.xlu2 %1897  ;;  %v4105_v20 = vpop.eup %4104  ;;  %v2529_v50 = vmul.f32 %v4103_v43, %v5443_v59  ;;  %v2530_v36 = vmul.f32 %v4103_v43, %v5445_v61  ;;  %v398_v59 = vld [vmem:[%s4929_s14 + $0x5b0] sm:$0xff] }
 0x16c   : > { %4110 = vrcp.f32 %v1898_v55  ;;  %v785_v63 = vpop.xlane.xlu1 %784  ;;  %v2531_v17 = vmul.f32 %v4105_v20, %v5429_v14  ;;  %v2532_v0 = vmul.f32 %v4105_v20, %v8449_v7  ;;  %v5898_v62 = vmul.f32 %v4945_v6, %v398_v59 }
 0x16d   : > { %v1149_v47 = vsub.f32 %v5462_v5, %v785_v63  ;;  %v1150_v35 = vsub.f32 %v5467_v49, %v785_v63  ;;  %v2402_v49 = vmul.f32 %v4101_v4, %v5344_v56  ;;  %v268_v4 = vld [vmem:[%s4929_s14 + $0x1a0] sm:$0xff]  ;;  %v269_v63 = vld [vmem:[%s4929_s14 + $0x1a8] sm:$0xff] }
 0x16e   : > { %v2717_v56 = vpack.c.bf16 %v2531_v17, %v2529_v50 }
 0x16f   : > { %v5874_v39 = vpop.eup %4106  ;;  %v1441_v16 = vmul.f32 1.442695, %v1149_v47  ;;  %v1443_v21 = vmul.f32 1.442695, %v1150_v35  ;;  %v8450_v35 = vld [vmem:[#allocation34_spill] sm:$0xff] }
 0x170   : > { %v5876_v28 = vpop.eup %4108 }
 0x171   : > { %v2096_v10 = vpop.xlane.xlu0 %2095  ;;  %4112 = vpow2.f32 %v1441_v16  ;;  %v2130_v13 = vadd.f32 %v5876_v28, %v5874_v39 }
 0x172   : > { %v4111_v29 = vpop.eup %4110  ;;  %4114 = vpow2.f32 %v1443_v21  ;;  %v8451_v21 = vld [vmem:[#allocation35_spill] sm:$0xff] }
 0x173   : > { %v2093_v9 = vpop.xlane.xlu2 %2092  ;;  %v2403_v5 = vmul.f32 %v4111_v29, %v5464_v42  ;;  %v2404_v27 = vmul.f32 %v4111_v29, %v5469_v3  ;;  %2131 = vadd.xlane.f32.xlu0 %v2130_v13  ;;  %4116 = vrcp.f32 %v5806_v8  ;;  %v2718_v3 = vpack.c.bf16 %v2532_v0, %v2530_v36 }
 0x174   : > { %4118 = vrcp.f32 %v2093_v9  ;;  %v5901_v8 = vmul.f32 %v4945_v6, %v399_v2  ;;  %v5916_v9 = vmul.f32 %v4945_v6, %v268_v4  ;;  %v8452_v2 = vld [vmem:[#allocation36_spill] sm:$0xff] }
 0x175   : > { %v2653_v22 = vpack.c.bf16 %v2403_v5, %v2401_v54  ;;  %v2654_v34 = vpack.c.bf16 %v2404_v27, %v2402_v49  ;;  %4120 = vrcp.f32 %v2096_v10  ;;  %v5919_v5 = vmul.f32 %v4945_v6, %v269_v63  ;;  %v8456_v63 = vld [vmem:[#allocation45_spill] sm:$0xff] }
 0x176   : > { %v1002_v41 = vmax.f32 %v5898_v62, %v5901_v8 }
 0x177   : > { %2927 = vmatmul.bf16.gmra.mxu0 %v2653_v22  ;;  %3256 = vmatmul.bf16.gmra.mxu1 %v2654_v34  ;;  %v5888_v42 = vpop.eup %4112  ;;  %v5926_v22 = vpop.xlane.xlu1 %1921 }
 0x178   : > { %v5890_v26 = vpop.eup %4114 }
 0x179   : > { %v2102_v46 = vpop.xlane.xlu0 %2101  ;;  %3087 = vmatmul.bf16.gmra.mxu2 %v2717_v56  ;;  %v1935_v14 = vadd.f32 %v5890_v26, %v5888_v42  ;;  %v4117_v33 = vpop.eup %4116 }
 0x17a   : > { %3416 = vmatmul.bf16.gmra.mxu3 %v2718_v3  ;;  %v4119_v18 = vpop.eup %4118  ;;  %v2405_v20 = vmul.f32 %v4117_v33, %v8450_v35  ;;  %v2406_v10 = vmul.f32 %v4117_v33, %v8451_v21 }
 0x17b   : > { %v1904_v61 = vpop.xlane.xlu2 %1903  ;;  %1936 = vadd.xlane.f32.xlu0 %v1935_v14  ;;  %v4121_v15 = vpop.eup %4120  ;;  %v2533_v13 = vmul.f32 %v4119_v18, %v5489_v48  ;;  %v2534_v50 = vmul.f32 %v4119_v18, %v5493_v30  ;;  %v807_v48 = vmax.f32 %v5916_v9, %v5919_v5  ;;  %v8454_v18 = vld [vmem:[#allocation37_spill] sm:$0xff] }
 0x17c   : > { %4122 = vrcp.f32 %v1904_v61  ;;  %v2535_v54 = vmul.f32 %v4121_v15, %v5483_v60  ;;  %v8453_v61 = vld [vmem:[#allocation21_spill] sm:$0xff] }
 0x17d   : > { %4124 = vrcp.f32 %v5836_v53 }
 0x181   : > { %v5905_v55 = vpop.xlane.xlu0 %2107 }
 0x182   : > { %v4123_v43 = vpop.eup %4122 }
 0x183   : > { %v2099_v47 = vpop.xlane.xlu2 %2098  ;;  %v2407_v16 = vmul.f32 %v4123_v43, %v5499_v44  ;;  %v2408_v29 = vmul.f32 %v4123_v43, %v5503_v37  ;;  %1003 = vmax.xlane.f32.xlu0 %v1002_v41  ;;  %v2536_v44 = vmul.f32 %v4121_v15, %v5486_v11  ;;  %v2719_v37 = vpack.c.bf16 %v2535_v54, %v2533_v13  ;;  %v4125_v0 = vpop.eup %4124  ;;  %v8458_v13 = vld [vmem:[#allocation43_spill] sm:$0xff] }
 0x184   : > { %4126 = vrcp.f32 %v2099_v47  ;;  %v2409_v14 = vmul.f32 %v4125_v0, %v8452_v2  ;;  %v2410_v41 = vmul.f32 %v4125_v0, %v8454_v18 }
 0x185   : > { %v2655_v49 = vpack.c.bf16 %v2407_v16, %v2405_v20  ;;  %v2656_v27 = vpack.c.bf16 %v2408_v29, %v2406_v10  ;;  %v2720_v17 = vpack.c.bf16 %v2536_v44, %v2534_v50  ;;  %v8457_v16 = vld [vmem:[#allocation46_spill] sm:$0xff]  ;;  %v266_v10 = vld [vmem:[%s4929_s14 + $0x190] sm:$0xff]  ;;  %v267_v29 = vld [vmem:[%s4929_s14 + $0x198] sm:$0xff] }
 0x187   : > { %2932 = vmatmul.bf16.gmra.mxu0 %v2655_v49  ;;  %3261 = vmatmul.bf16.gmra.mxu1 %v2656_v27  ;;  %v8459_v27 = vld [vmem:[#allocation44_spill] sm:$0xff] }
 0x189   : > { %v977_v60 = vpop.xlane.xlu0 %976  ;;  %3092 = vmatmul.bf16.gmra.mxu2 %v2719_v37  ;;  %v5952_v37 = vmul.f32 %v4945_v6, %v266_v10 }
 0x18a   : > { %v1277_v34 = vsub.f32 %v5538_v31, %v977_v60  ;;  %v1278_v36 = vsub.f32 %v5541_v32, %v977_v60  ;;  %3421 = vmatmul.bf16.gmra.mxu3 %v2720_v17  ;;  %v4127_v56 = vpop.eup %4126 }
 0x18b   : > { %v1910_v11 = vpop.xlane.xlu2 %1909  ;;  %808 = vmax.xlane.f32.xlu0 %v807_v48  ;;  %v2537_v43 = vmul.f32 %v4127_v56, %v8456_v63  ;;  %v2538_v21 = vmul.f32 %v4127_v56, %v8457_v16  ;;  %v5955_v48 = vmul.f32 %v4945_v6, %v267_v29  ;;  %v397_v56 = vld [vmem:[%s4929_s14 + $0x5a8] sm:$0xff] }
 0x18c   : > { %4128 = vrcp.f32 %v1910_v11  ;;  %v1697_v30 = vmul.f32 1.442695, %v1277_v34  ;;  %v1699_v7 = vmul.f32 1.442695, %v1278_v36  ;;  %v8460_v11 = vld [vmem:[#allocation24_spill] sm:$0xff] }
 0x18d   : > { %4130 = vrcp.f32 %v2102_v46  ;;  %v8455_v46 = vld [vmem:[#allocation27_spill] sm:$0xff] }
 0x18e   : > { %4132 = vpow2.f32 %v1697_v30 }
 0x18f   : > { %4134 = vpow2.f32 %v1699_v7  ;;  %v8461_v7 = vld [vmem:[#allocation47_spill] sm:$0xff] }
 0x190   : > { %4136 = vrcp.f32 %v5853_v57  ;;  %v396_v57 = vld [vmem:[%s4929_s14 + $0x5a0] sm:$0xff] }
 0x191   : > { %v5930_v53 = vpop.xlane.xlu0 %2113 }
 0x192   : > { %v4129_v3 = vpop.eup %4128  ;;  %v5932_v31 = vpop.xlane.xlu1 %2116 }
 0x193   : > { %v4131_v32 = vpop.eup %4130  ;;  %v2105_v59 = vpop.xlane.xlu2 %2104  ;;  %v2411_v33 = vmul.f32 %v4129_v3, %v8453_v61  ;;  %v2412_v15 = vmul.f32 %v4129_v3, %v8455_v46  ;;  %v804_v3 = vmax.f32 %v5952_v37, %v5955_v48  ;;  %v5965_v61 = vmul.f32 %v4945_v6, %v396_v57 }
 0x194   : > { %v5938_v4 = vpop.eup %4132  ;;  %v2539_v54 = vmul.f32 %v4131_v32, %v8458_v13  ;;  %v2540_v50 = vmul.f32 %v4131_v32, %v8459_v27  ;;  %4138 = vrcp.f32 %v2105_v59  ;;  %v5968_v59 = vmul.f32 %v4945_v6, %v397_v56  ;;  %v8466_v27 = vld [vmem:[#allocation29_spill] sm:$0xff] }
 0x195   : > { %v5941_v47 = vpop.eup %4134  ;;  %v2657_v35 = vpack.c.bf16 %v2411_v33, %v2409_v14  ;;  %v2658_v20 = vpack.c.bf16 %v2412_v15, %v2410_v41  ;;  %v8462_v41 = vld [vmem:[#allocation38_spill] sm:$0xff]  ;;  %v8463_v15 = vld [vmem:[#allocation39_spill] sm:$0xff] }
 0x196   : > { %v2127_v49 = vadd.f32 %v5941_v47, %v5938_v4  ;;  %v2721_v44 = vpack.c.bf16 %v2539_v54, %v2537_v43  ;;  %v2722_v17 = vpack.c.bf16 %v2540_v50, %v2538_v21  ;;  %v4137_v14 = vpop.eup %4136  ;;  %v999_v21 = vmax.f32 %v5965_v61, %v5968_v59  ;;  %v8465_v54 = vld [vmem:[#allocation51_spill] sm:$0xff] }
 0x197   : > { %2937 = vmatmul.bf16.gmra.mxu0 %v2657_v35  ;;  %3266 = vmatmul.bf16.gmra.mxu1 %v2658_v20  ;;  %v2413_v46 = vmul.f32 %v4137_v14, %v8462_v41  ;;  %v2414_v63 = vmul.f32 %v4137_v14, %v8463_v15  ;;  %v8464_v20 = vld [vmem:[#allocation50_spill] sm:$0xff]  ;;  %v8473_v14 = vld [vmem:[#allocation20_spill] sm:$0xff] }
 0x198   : > { %2128 = vadd.xlane.f32.xlu2 %v2127_v49 }
 0x199   : > { %v1919_v60 = vpop.xlane.xlu0 %1918  ;;  %3097 = vmatmul.bf16.gmra.mxu2 %v2721_v44  ;;  %v8467_v44 = vld [vmem:[#allocation30_spill] sm:$0xff] }
 0x19a   : > { %v794_v34 = vpop.xlane.xlu1 %793  ;;  %3426 = vmatmul.bf16.gmra.mxu3 %v2722_v17  ;;  %v4139_v33 = vpop.eup %4138 }
 0x19b   : > { %v1916_v36 = vpop.xlane.xlu2 %1915  ;;  %v1155_v30 = vsub.f32 %v8460_v11, %v794_v34  ;;  %v1156_v0 = vsub.f32 %v8461_v7, %v794_v34 }
 0x19c   : > { %4140 = vrcp.f32 %v1916_v36  ;;  %v8468_v36 = vld [vmem:[#allocation13_spill] sm:$0xff] }
 0x19d   : > { %4142 = vrcp.f32 %v5905_v55  ;;  %v1453_v32 = vmul.f32 1.442695, %v1155_v30  ;;  %v1455_v2 = vmul.f32 1.442695, %v1156_v0  ;;  %v2541_v11 = vmul.f32 %v4139_v33, %v8468_v36 }
 0x19f   : > { %4144 = vpow2.f32 %v1453_v32 }
 0x1a0   : > { %4146 = vpow2.f32 %v1455_v2  ;;  %805 = vmax.xlane.f32.xlu2 %v804_v3 }
 0x1a1   : > { %v986_v18 = vpop.xlane.xlu0 %985  ;;  %4148 = vrcp.f32 %v1919_v60 }
 0x1a2   : > { %v4141_v43 = vpop.eup %4140  ;;  %v989_v55 = vpop.xlane.xlu1 %988  ;;  %v1283_v35 = vsub.f32 %v5632_v52, %v986_v18  ;;  %v1284_v16 = vsub.f32 %v8464_v20, %v986_v18  ;;  %v8469_v52 = vld [vmem:[#allocation10_spill] sm:$0xff] }
 0x1a3   : > { %v4143_v10 = vpop.eup %4142  ;;  %v2111_v29 = vpop.xlane.xlu2 %2110  ;;  %v1285_v13 = vsub.f32 %v5644_v51, %v989_v55  ;;  %v1286_v49 = vsub.f32 %v8465_v54, %v989_v55  ;;  %v2415_v50 = vmul.f32 %v4141_v43, %v8466_v27  ;;  %v2416_v17 = vmul.f32 %v4141_v43, %v8467_v44  ;;  %v8472_v51 = vld [vmem:[#allocation22_spill] sm:$0xff] }
 0x1a4   : > { %v1709_v34 = vmul.f32 1.442695, %v1283_v35  ;;  %v1711_v60 = vmul.f32 1.442695, %v1284_v16  ;;  %v2542_v30 = vmul.f32 %v4139_v33, %v8469_v52  ;;  %v2543_v2 = vmul.f32 %v4143_v10, %v8472_v51 }
 0x1a5   : > { %v5982_v7 = vpop.eup %4144  ;;  %v1713_v0 = vmul.f32 1.442695, %v1285_v13  ;;  %v1715_v57 = vmul.f32 1.442695, %v1286_v49  ;;  %v2659_v56 = vpack.c.bf16 %v2415_v50, %v2413_v46  ;;  %v2660_v3 = vpack.c.bf16 %v2416_v17, %v2414_v63  ;;  %v8475_v13 = vld [vmem:[#allocation17_spill] sm:$0xff]  ;;  %v274_v50 = vld [vmem:[%s4929_s14 + $0x1d0] sm:$0xff] }
 0x1a6   : > { %8470 = vst [vmem:[#allocation32_spill] sm:$0xff] %v5982_v7  ;;  %v5984_v32 = vpop.eup %4146  ;;  %4150 = vpow2.f32 %v1709_v34  ;;  %v2544_v18 = vmul.f32 %v4143_v10, %v8473_v14  ;;  %v2723_v15 = vpack.c.bf16 %v2543_v2, %v2541_v11 }
 0x1a7   : > { %8471 = vst [vmem:[#allocation33_spill] sm:$0xff] %v5984_v32  ;;  %4152 = vpow2.f32 %v1713_v0  ;;  %2942 = vmatmul.bf16.gmra.mxu0 %v2659_v56  ;;  %3271 = vmatmul.bf16.gmra.mxu1 %v2660_v3  ;;  %v1944_v41 = vadd.f32 %v5984_v32, %v5982_v7  ;;  %v4149_v33 = vpop.eup %4148  ;;  %v8498_v32 = vld [vmem:[#allocation60_spill] sm:$0xff] }
 0x1a8   : > { %4154 = vpow2.f32 %v1715_v57  ;;  %1000 = vmax.xlane.f32.xlu2 %v999_v21  ;;  %v2724_v46 = vpack.c.bf16 %v2544_v18, %v2542_v30  ;;  %v8474_v21 = vld [vmem:[#allocation19_spill] sm:$0xff]  ;;  %v8478_v30 = vld [vmem:[#allocation48_spill] sm:$0xff]  ;;  %v8479_v57 = vld [vmem:[#allocation49_spill] sm:$0xff] }
 0x1a9   : > { %4156 = vpow2.f32 %v1711_v60  ;;  %1945 = vadd.xlane.f32.xlu0 %v1944_v41  ;;  %v791_v63 = vpop.xlane.xlu0 %790  ;;  %3102 = vmatmul.bf16.gmra.mxu2 %v2723_v15  ;;  %v2417_v0 = vmul.f32 %v4149_v33, %v8478_v30  ;;  %v2418_v56 = vmul.f32 %v4149_v33, %v8479_v57  ;;  %v8480_v18 = vld [vmem:[#allocation41_spill] sm:$0xff]  ;;  %v8481_v15 = vld [vmem:[#allocation42_spill] sm:$0xff] }
 0x1aa   : > { %4158 = vrcp.f32 %v5926_v22  ;;  %v5991_v43 = vpop.xlane.xlu1 %2125  ;;  %v1153_v55 = vsub.f32 %v5678_v23, %v791_v63  ;;  %v1154_v35 = vsub.f32 %v5681_v40, %v791_v63  ;;  %3431 = vmatmul.bf16.gmra.mxu3 %v2724_v46  ;;  %v404_v30 = vld [vmem:[%s4929_s14 + $0x5e0] sm:$0xff]  ;;  %v405_v57 = vld [vmem:[%s4929_s14 + $0x5e8] sm:$0xff] }
 0x1ab   : > { %4160 = vrcp.f32 %v2111_v29  ;;  %v788_v20 = vpop.xlane.xlu2 %787  ;;  %v275_v29 = vld [vmem:[%s4929_s14 + $0x1d8] sm:$0xff] }
 0x1ac   : > { %v5995_v16 = vpop.eup %4150  ;;  %v1151_v10 = vsub.f32 %v8474_v21, %v788_v20  ;;  %v1152_v54 = vsub.f32 %v8475_v13, %v788_v20  ;;  %v1449_v49 = vmul.f32 1.442695, %v1153_v55  ;;  %v1451_v27 = vmul.f32 1.442695, %v1154_v35  ;;  %v8483_v55 = vld [vmem:[#allocation26_spill] sm:$0xff]  ;;  %v8485_v21 = vld [vmem:[#allocation52_spill] sm:$0xff] }
 0x1ad   : > { %v5999_v22 = vpop.eup %4152  ;;  %4162 = vrcp.f32 %v5930_v53  ;;  %v6013_v53 = vmul.f32 %v4945_v6, %v274_v50  ;;  %v6020_v3 = vmul.f32 %v4945_v6, %v275_v29  ;;  %v8484_v20 = vld [vmem:[#allocation54_spill] sm:$0xff] }
 0x1ae   : > { %8476 = vst [vmem:[#allocation40_spill] sm:$0xff] %v5999_v22  ;;  %v6003_v23 = vpop.eup %4154  ;;  %v1445_v40 = vmul.f32 1.442695, %v1151_v10  ;;  %v1447_v44 = vmul.f32 1.442695, %v1152_v54  ;;  %4164 = vpow2.f32 %v1449_v49 }
 0x1af   : > { %8477 = vst [vmem:[#allocation34_spill] sm:$0xff] %v6003_v23  ;;  %v6006_v17 = vpop.eup %4156  ;;  %4166 = vpow2.f32 %v1451_v27  ;;  %v2139_v34 = vadd.f32 %v6003_v23, %v5999_v22  ;;  %v8487_v27 = vld [vmem:[#allocation53_spill] sm:$0xff]  ;;  %v8496_v23 = vld [vmem:[#allocation64_spill] sm:$0xff]  ;;  %v8497_v22 = vld [vmem:[#allocation59_spill] sm:$0xff] }
 0x1b0   : > { %v4159_v60 = vpop.eup %4158  ;;  %4168 = vpow2.f32 %v1445_v40  ;;  %v2136_v36 = vadd.f32 %v6006_v17, %v5995_v16  ;;  %v816_v40 = vmax.f32 %v6013_v53, %v6020_v3 }
 0x1b1   : > { %v4161_v11 = vpop.eup %4160  ;;  %4170 = vpow2.f32 %v1447_v44  ;;  %2140 = vadd.xlane.f32.xlu0 %v2139_v34  ;;  %v6015_v52 = vpop.xlane.xlu0 %1927  ;;  %v2419_v41 = vmul.f32 %v4159_v60, %v8480_v18  ;;  %v2420_v46 = vmul.f32 %v4159_v60, %v8481_v15  ;;  %v8488_v60 = vld [vmem:[#allocation28_spill] sm:$0xff] }
 0x1b2   : > { %2137 = vadd.xlane.f32.xlu2 %v2136_v36  ;;  %v6022_v51 = vpop.xlane.xlu1 %1930  ;;  %v2545_v10 = vmul.f32 %v4161_v11, %v8485_v21  ;;  %v2546_v50 = vmul.f32 %v4161_v11, %v8487_v27  ;;  %v402_v18 = vld [vmem:[%s4929_s14 + $0x5d0] sm:$0xff]  ;;  %v8491_v27 = vld [vmem:[#allocation58_spill] sm:$0xff] }
 0x1b3   : > { %v4163_v2 = vpop.eup %4162  ;;  %v983_v14 = vpop.xlane.xlu2 %982  ;;  %v2661_v54 = vpack.c.bf16 %v2419_v41, %v2417_v0  ;;  %v2662_v49 = vpack.c.bf16 %v2420_v46, %v2418_v56  ;;  %v8489_v0 = vld [vmem:[#allocation12_spill] sm:$0xff]  ;;  %v6059_v21 = vmul.f32 %v4945_v6, %v402_v18 }
 0x1b4   : > { %v6026_v63 = vpop.eup %4164  ;;  %v1281_v35 = vsub.f32 %v8483_v55, %v983_v14  ;;  %v1282_v33 = vsub.f32 %v8484_v20, %v983_v14  ;;  %v2547_v36 = vmul.f32 %v4163_v2, %v8488_v60  ;;  %v2548_v56 = vmul.f32 %v4163_v2, %v8489_v0  ;;  %v403_v46 = vld [vmem:[%s4929_s14 + $0x5d8] sm:$0xff] }
 0x1b5   : > { %8482 = vst [vmem:[#allocation35_spill] sm:$0xff] %v6026_v63  ;;  %v6031_v13 = vpop.eup %4166  ;;  %v6053_v20 = vmul.f32 %v4945_v6, %v404_v30  ;;  %v6056_v2 = vmul.f32 %v4945_v6, %v405_v57  ;;  %v271_v30 = vld [vmem:[%s4929_s14 + $0x1b8] sm:$0xff] }
 0x1b6   : > { %8486 = vst [vmem:[#allocation36_spill] sm:$0xff] %v6031_v13  ;;  %v6036_v44 = vpop.eup %4168  ;;  %v1705_v29 = vmul.f32 1.442695, %v1281_v35  ;;  %v1707_v34 = vmul.f32 1.442695, %v1282_v33  ;;  %v1941_v11 = vadd.f32 %v6031_v13, %v6026_v63  ;;  %v2725_v41 = vpack.c.bf16 %v2547_v36, %v2545_v10  ;;  %v8501_v63 = vld [vmem:[#allocation23_spill] sm:$0xff] }
 0x1b7   : > { %v6041_v14 = vpop.eup %4170  ;;  %2947 = vmatmul.bf16.gmra.mxu0 %v2661_v54  ;;  %3276 = vmatmul.bf16.gmra.mxu1 %v2662_v49  ;;  %v2726_v55 = vpack.c.bf16 %v2548_v56, %v2546_v50  ;;  %v8490_v54 = vld [vmem:[#allocation57_spill] sm:$0xff]  ;;  %v1011_v60 = vmax.f32 %v6053_v20, %v6056_v2 }
 0x1b8   : > { %4172 = vpow2.f32 %v1705_v29  ;;  %v1938_v15 = vadd.f32 %v6041_v14, %v6036_v44  ;;  %v272_v56 = vld [vmem:[%s4929_s14 + $0x1c0] sm:$0xff] }
 0x1b9   : > { %4174 = vpow2.f32 %v1707_v34  ;;  %817 = vmax.xlane.f32.xlu0 %v816_v40  ;;  %v6050_v35 = vpop.xlane.xlu0 %2122  ;;  %3107 = vmatmul.bf16.gmra.mxu2 %v2725_v41  ;;  %v6065_v40 = vmul.f32 %v4945_v6, %v403_v46 }
 0x1ba   : > { %1939 = vadd.xlane.f32.xlu1 %v1938_v15  ;;  %v998_v33 = vpop.xlane.xlu1 %997  ;;  %4176 = vrcp.f32 %v5932_v31  ;;  %3436 = vmatmul.bf16.gmra.mxu3 %v2726_v55  ;;  %v270_v31 = vld [vmem:[%s4929_s14 + $0x1b0] sm:$0xff]  ;;  %v6086_v55 = vmul.f32 %v4945_v6, %v271_v30 }
 0x1bb   : > { %1942 = vadd.xlane.f32.xlu2 %v1941_v11  ;;  %v2120_v10 = vpop.xlane.xlu2 %2119  ;;  %v1291_v49 = vsub.f32 %v8490_v54, %v998_v33  ;;  %v1292_v50 = vsub.f32 %v8491_v27, %v998_v33  ;;  %v1008_v0 = vmax.f32 %v6059_v21, %v6065_v40  ;;  %v273_v11 = vld [vmem:[%s4929_s14 + $0x1c8] sm:$0xff]  ;;  %v6083_v46 = vmul.f32 %v4945_v6, %v270_v31  ;;  %v8493_v54 = vld [vmem:[#allocation61_spill] sm:$0xff] }
 0x1bc   : > { %4178 = vrcp.f32 %v2120_v10  ;;  %v8494_v27 = vld [vmem:[#allocation62_spill] sm:$0xff] }
 0x1bd   : > { %v1725_v29 = vmul.f32 1.442695, %v1291_v49  ;;  %v1727_v34 = vmul.f32 1.442695, %v1292_v50 }
 0x1be   : > { %v6069_v36 = vpop.eup %4172 }
 0x1bf   : > { %v6073_v57 = vpop.eup %4174  ;;  %4180 = vpow2.f32 %v1725_v29  ;;  %v6091_v29 = vmul.f32 %v4945_v6, %v272_v56  ;;  %v8499_v56 = vld [vmem:[#allocation11_spill] sm:$0xff] }
 0x1c0   : > { %8492 = vst [vmem:[#allocation21_spill] sm:$0xff] %v6073_v57  ;;  %4182 = vpow2.f32 %v1727_v34  ;;  %v2133_v18 = vadd.f32 %v6073_v57, %v6069_v36  ;;  %v4177_v41 = vpop.eup %4176 }
 0x1c1   : > { %4184 = vrcp.f32 %v6015_v52  ;;  %1012 = vmax.xlane.f32.xlu0 %v1011_v60  ;;  %v800_v15 = vpop.xlane.xlu0 %799  ;;  %v6094_v52 = vmul.f32 %v4945_v6, %v273_v11  ;;  %v8495_v60 = vld [vmem:[#allocation63_spill] sm:$0xff] }
 0x1c2   : > { %v4179_v33 = vpop.eup %4178  ;;  %2134 = vadd.xlane.f32.xlu1 %v2133_v18  ;;  %v803_v10 = vpop.xlane.xlu1 %802  ;;  %v1159_v49 = vsub.f32 %v8493_v54, %v800_v15  ;;  %v1160_v50 = vsub.f32 %v8494_v27, %v800_v15  ;;  %v2549_v27 = vmul.f32 %v4177_v41, %v8499_v56 }
 0x1c3   : > { %1009 = vmax.xlane.f32.xlu2 %v1008_v0  ;;  %v1925_v34 = vpop.xlane.xlu2 %1924  ;;  %v1161_v31 = vsub.f32 %v8495_v60, %v803_v10  ;;  %v1162_v30 = vsub.f32 %v8496_v23, %v803_v10  ;;  %v2551_v18 = vmul.f32 %v4179_v33, %v8497_v22  ;;  %v2552_v54 = vmul.f32 %v4179_v33, %v8498_v32  ;;  %v400_v10 = vld [vmem:[%s4929_s14 + $0x5c0] sm:$0xff]  ;;  %v401_v32 = vld [vmem:[%s4929_s14 + $0x5c8] sm:$0xff] }
 0x1c4   : > { %4186 = vrcp.f32 %v1925_v34  ;;  %v1461_v15 = vmul.f32 1.442695, %v1159_v49  ;;  %v1463_v13 = vmul.f32 1.442695, %v1160_v50  ;;  %v2550_v60 = vmul.f32 %v4177_v41, %v8501_v63 }
 0x1c5   : > { %v6101_v7 = vpop.eup %4180  ;;  %v1465_v11 = vmul.f32 1.442695, %v1161_v31  ;;  %v1467_v0 = vmul.f32 1.442695, %v1162_v30  ;;  %v2727_v23 = vpack.c.bf16 %v2551_v18, %v2549_v27  ;;  %v810_v22 = vmax.f32 %v6083_v46, %v6086_v55  ;;  %v8504_v27 = vld [vmem:[#allocation65_spill] sm:$0xff] }
 0x1c6   : > { %8500 = vst [vmem:[#allocation37_spill] sm:$0xff] %v6101_v7  ;;  %v6104_v57 = vpop.eup %4182  ;;  %4188 = vpow2.f32 %v1461_v15  ;;  %v2728_v49 = vpack.c.bf16 %v2552_v54, %v2550_v60  ;;  %v813_v63 = vmax.f32 %v6091_v29, %v6094_v52  ;;  %v6119_v34 = vmul.f32 %v4945_v6, %v400_v10  ;;  %v8503_v15 = vld [vmem:[#allocation25_spill] sm:$0xff]  ;;  %v8506_v10 = vld [vmem:[#allocation55_spill] sm:$0xff] }
 0x1c7   : > { %8502 = vst [vmem:[#allocation27_spill] sm:$0xff] %v6104_v57  ;;  %v4185_v33 = vpop.eup %4184  ;;  %4190 = vpow2.f32 %v1465_v11  ;;  %v2148_v50 = vadd.f32 %v6104_v57, %v6101_v7  ;;  %v6122_v31 = vmul.f32 %v4945_v6, %v401_v32 }
 0x1c8   : > { %4192 = vpow2.f32 %v1467_v0  ;;  %v2423_v56 = vmul.f32 %v4185_v33, %v8503_v15  ;;  %v8505_v0 = vld [vmem:[#allocation66_spill] sm:$0xff]  ;;  %v6154_v15 = vld [vmem:[#allocation6] ss:$0 sm:$0xff] }
 0x1c9   : > { %4194 = vpow2.f32 %v1463_v13  ;;  %2149 = vadd.xlane.f32.xlu0 %v2148_v50  ;;  %v995_v41 = vpop.xlane.xlu0 %994  ;;  %3112 = vmatmul.bf16.gmra.mxu2 %v2727_v23  ;;  %v2424_v23 = vmul.f32 %v4185_v33, %v8506_v10 }
 0x1ca   : > { %v4187_v30 = vpop.eup %4186  ;;  %811 = vmax.xlane.f32.xlu1 %v810_v22  ;;  %v1289_v18 = vsub.f32 %v5813_v58, %v995_v41  ;;  %v1290_v54 = vsub.f32 %v5816_v25, %v995_v41  ;;  %4196 = vrcp.f32 %v6050_v35  ;;  %3441 = vmatmul.bf16.gmra.mxu3 %v2728_v49 }
 0x1cb   : > { %814 = vmax.xlane.f32.xlu2 %v813_v63  ;;  %v992_v13 = vpop.xlane.xlu2 %991  ;;  %v2421_v11 = vmul.f32 %v4187_v30, %v8504_v27  ;;  %v2422_v60 = vmul.f32 %v4187_v30, %v8505_v0  ;;  %4198 = vrcp.f32 %v5991_v43 }
 0x1cc   : > { %v6132_v22 = vpop.eup %4188  ;;  %v1287_v25 = vsub.f32 %v5819_v45, %v992_v13  ;;  %v1288_v58 = vsub.f32 %v5822_v38, %v992_v13  ;;  %v1721_v35 = vmul.f32 1.442695, %v1289_v18  ;;  %v1723_v32 = vmul.f32 1.442695, %v1290_v54  ;;  %v410_v45 = vld [vmem:[%s4929_s14 + $0x610] sm:$0xff]  ;;  %v411_v18 = vld [vmem:[%s4929_s14 + $0x618] sm:$0xff] }
 0x1cd   : > { %8507 = vst [vmem:[#allocation45_spill] sm:$0xff] %v6132_v22  ;;  %v6136_v50 = vpop.eup %4190  ;;  %v2663_v49 = vpack.c.bf16 %v2423_v56, %v2421_v11  ;;  %v2664_v63 = vpack.c.bf16 %v2424_v23, %v2422_v60  ;;  %v1005_v38 = vmax.f32 %v6119_v34, %v6122_v31  ;;  %v6160_v27 = vmul.f32 %v4945_v6, %v410_v45 }
 0x1ce   : > { %8508 = vst [vmem:[#allocation46_spill] sm:$0xff] %v6136_v50  ;;  %v6144_v33 = vpop.eup %4192  ;;  %v1717_v41 = vmul.f32 1.442695, %v1287_v25  ;;  %v1719_v30 = vmul.f32 1.442695, %v1288_v58  ;;  %4200 = vpow2.f32 %v1721_v35  ;;  %v6163_v11 = vmul.f32 %v4945_v6, %v411_v18 }
 0x1cf   : > { %8509 = vst [vmem:[#allocation43_spill] sm:$0xff] %v6144_v33  ;;  %v6150_v54 = vpop.eup %4194  ;;  %4202 = vpow2.f32 %v1723_v32  ;;  %2952 = vmatmul.bf16.gmra.mxu0 %v2663_v49  ;;  %3281 = vmatmul.bf16.gmra.mxu1 %v2664_v63  ;;  %v1953_v43 = vadd.f32 %v6144_v33, %v6136_v50  ;;  %v8512_v49 = vld [vmem:[#allocation14_spill] sm:$0xff] }
 0x1d0   : > { %8510 = vst [vmem:[#allocation44_spill] sm:$0xff] %v6150_v54  ;;  %4204 = vpow2.f32 %v1717_v41  ;;  %v1950_v56 = vadd.f32 %v6150_v54, %v6132_v22  ;;  %v4197_v13 = vpop.eup %4196  ;;  %v281_v33 = vld [vmem:[%s4929_s14 + $0x208] sm:$0xff] }
 0x1d1   : > { %4206 = vpow2.f32 %v1719_v30  ;;  %1954 = vadd.xlane.f32.xlu0 %v1953_v43  ;;  %v4199_v10 = vpop.eup %4198  ;;  %v2553_v63 = vmul.f32 %v4197_v13, %v8512_v49 }
 0x1d2   : > { %1006 = vmax.xlane.f32.xlu1 %v1005_v38  ;;  %v2918_v0 = vpop.f32.mrf.mxu0  ;;  %v3247_v60 = vpop.f32.mrf.mxu1  ;;  %v8514_v38 = vld [vmem:[#allocation15_spill] sm:$0xff]  ;;  %4208 = vrcp.f32 %v6022_v51  ;;  %v6202_v51 = vmul.f32 %v4945_v6, %v281_v33 }
 0x1d3   : > { %1951 = vadd.xlane.f32.xlu2 %v1950_v56  ;;  %v797_v23 = vpop.xlane.xlu2 %796  ;;  %v2919_v25 = vadd.f32 %v6154_v15, %v2918_v0  ;;  %v2554_v45 = vmul.f32 %v4197_v13, %v8514_v38  ;;  %v8515_v56 = vld [vmem:[#allocation16_spill] sm:$0xff]  ;;  %v8516_v13 = vld [vmem:[#allocation18_spill] sm:$0xff] }
 0x1d4   : > { %v6166_v58 = vpop.eup %4200  ;;  %v1157_v35 = vsub.f32 %v5846_v19, %v797_v23  ;;  %v1158_v32 = vsub.f32 %v5849_v1, %v797_v23  ;;  %v1020_v19 = vmax.f32 %v6160_v27, %v6163_v11  ;;  %v2555_v0 = vmul.f32 %v4199_v10, %v8515_v56  ;;  %v280_v23 = vld [vmem:[%s4929_s14 + $0x200] sm:$0xff]  ;;  %v279_v38 = vld [vmem:[%s4929_s14 + $0x1f8] sm:$0xff] }
 0x1d5   : > { %8511 = vst [vmem:[#allocation24_spill] sm:$0xff] %v6166_v58  ;;  %v6176_v41 = vpop.eup %4202  ;;  %v3248_v30 = vadd.f32 %v3247_v60, %v2919_v25  ;;  %v2556_v60 = vmul.f32 %v4199_v10, %v8516_v13  ;;  %v6199_v57 = vmul.f32 %v4945_v6, %v280_v23 }
 0x1d6   : > { %8513 = vst [vmem:[#allocation47_spill] sm:$0xff] %v6176_v41  ;;  %v6181_v1 = vpop.eup %4204  ;;  %v1457_v18 = vmul.f32 1.442695, %v1157_v35  ;;  %v1459_v43 = vmul.f32 1.442695, %v1158_v32  ;;  %v2145_v25 = vadd.f32 %v6176_v41, %v6166_v58  ;;  %v2729_v49 = vpack.c.bf16 %v2555_v0, %v2553_v63  ;;  %v278_v32 = vld [vmem:[%s4929_s14 + $0x1f0] sm:$0xff] }
 0x1d7   : > { %v6186_v50 = vpop.eup %4206  ;;  %3568 = vst.msk [vmem:[%s6173_s11] sm:$0xff] %vm3567_vm0, %v3248_v30  ;;  %v2730_v56 = vpack.c.bf16 %v2556_v60, %v2554_v45  ;;  %v6206_v45 = vmul.f32 %v4945_v6, %v278_v32  ;;  %v825_v13 = vmax.f32 %v6199_v57, %v6202_v51  ;;  %v406_v32 = vld [vmem:[%s4929_s14 + $0x5f0] sm:$0xff] }
 0x1d8   : > { %4210 = vpow2.f32 %v1457_v18  ;;  %v2142_v35 = vadd.f32 %v6186_v50, %v6181_v1  ;;  %v4209_v33 = vpop.eup %4208  ;;  %v8519_v41 = vld [vmem:[#allocation56_spill] sm:$0xff]  ;;  %v6233_v22 = vmul.f32 %v4945_v6, %v406_v32 }
 0x1d9   : > { %4212 = vpow2.f32 %v1459_v43  ;;  %1021 = vmax.xlane.f32.xlu0 %v1020_v19  ;;  %3117 = vmatmul.bf16.gmra.mxu2 %v2729_v49  ;;  %v6209_v19 = vmul.f32 %v4945_v6, %v279_v38  ;;  %v407_v38 = vld [vmem:[%s4929_s14 + $0x5f8] sm:$0xff] }
 0x1da   : > { %2143 = vadd.xlane.f32.xlu1 %v2142_v35  ;;  %v2920_v10 = vpop.f32.mrf.mxu0  ;;  %v3249_v30 = vpop.f32.mrf.mxu1  ;;  %3446 = vmatmul.bf16.gmra.mxu3 %v2730_v56  ;;  %v408_v56 = vld [vmem:[%s4929_s14 + $0x600] sm:$0xff] }
 0x1db   : > { %2146 = vadd.xlane.f32.xlu2 %v2145_v25  ;;  %v1934_v63 = vpop.xlane.xlu2 %1933  ;;  %v2921_v18 = vadd.f32 %v6154_v15, %v2920_v10  ;;  %v3078_v43 = vpop.f32.mrf.mxu2  ;;  %v822_v35 = vmax.f32 %v6206_v45, %v6209_v19 }
 0x1dc   : > { %4214 = vrcp.f32 %v1934_v63  ;;  %v3407_v0 = vpop.f32.mrf.mxu3  ;;  %v3079_v25 = vadd.f32 %v6154_v15, %v3078_v43  ;;  %v409_v63 = vld [vmem:[%s4929_s14 + $0x608] sm:$0xff]  ;;  %v2426_v43 = vmul.f32 %v4209_v33, %v8519_v41 }
 0x1dd   : > { %v3250_v23 = vadd.f32 %v3249_v30, %v2921_v18  ;;  %v8518_v18 = vld [vmem:[#allocation31_spill] sm:$0xff] }
 0x1de   : > { %v6213_v60 = vpop.eup %4210  ;;  %v3408_v10 = vadd.f32 %v3407_v0, %v3079_v25  ;;  %v2425_v7 = vmul.f32 %v4209_v33, %v8518_v18  ;;  %v6236_v0 = vmul.f32 %v4945_v6, %v407_v38  ;;  %v6239_v25 = vmul.f32 %v4945_v6, %v408_v56 }
 0x1df   : > { %v6216_v49 = vpop.eup %4212  ;;  %3569 = vst.msk [vmem:[%s6173_s11 + $0x8] sm:$0xff] %vm3567_vm0, %v3250_v23 }
 0x1e0   : > { %8517 = vst [vmem:[#allocation38_spill] sm:$0xff] %v6216_v49  ;;  %v1947_v30 = vadd.f32 %v6216_v49, %v6213_v60 }
 0x1e1   : > { %826 = vmax.xlane.f32.xlu0 %v825_v13  ;;  %3632 = vst.msk [vmem:[%s6173_s11 + $0x200] sm:$0xff] %vm3567_vm0, %v3408_v10  ;;  %v6245_v10 = vmul.f32 %v4945_v6, %v409_v63  ;;  %v277_v63 = vld [vmem:[%s4929_s14 + $0x1e8] sm:$0xff] }
 0x1e2   : > { %v4215_v58 = vpop.eup %4214  ;;  %1948 = vadd.xlane.f32.xlu1 %v1947_v30  ;;  %v2923_v23 = vpop.f32.mrf.mxu0 }
 0x1e3   : > { %v3252_v54 = vpop.f32.mrf.mxu1  ;;  %823 = vmax.xlane.f32.xlu2 %v822_v35  ;;  %v2924_v13 = vadd.f32 %v6154_v15, %v2923_v23  ;;  %v2427_v41 = vmul.f32 %v4215_v58, %v5855_v24  ;;  %v2428_v33 = vmul.f32 %v4215_v58, %v5861_v12  ;;  %v3080_v32 = vpop.f32.mrf.mxu2  ;;  %v1014_v35 = vmax.f32 %v6233_v22, %v6236_v0  ;;  %v276_v58 = vld [vmem:[%s4929_s14 + $0x1e0] sm:$0xff] }
 0x1e4   : > { %v3409_v30 = vpop.f32.mrf.mxu3  ;;  %v3081_v56 = vadd.f32 %v6154_v15, %v3080_v32  ;;  %v1017_v12 = vmax.f32 %v6239_v25, %v6245_v10  ;;  %v6261_v23 = vmul.f32 %v4945_v6, %v276_v58 }
 0x1e5   : > { %v3253_v38 = vadd.f32 %v3252_v54, %v2924_v13  ;;  %v2665_v18 = vpack.c.bf16 %v2427_v41, %v2425_v7  ;;  %v2666_v49 = vpack.c.bf16 %v2428_v33, %v2426_v43  ;;  %v6264_v13 = vmul.f32 %v4945_v6, %v277_v63 }
 0x1e6   : > { %v6252_v24 = vpop.xlane.xlu0 %2131  ;;  %v3410_v54 = vadd.f32 %v3409_v30, %v3081_v56 }
 0x1e7   : > { %3570 = vst.msk [vmem:[%s6173_s11 + $0x10] sm:$0xff] %vm3567_vm0, %v3253_v38  ;;  %2957 = vmatmul.bf16.gmra.mxu0 %v2665_v18  ;;  %3286 = vmatmul.bf16.gmra.mxu1 %v2666_v49  ;;  %v819_v38 = vmax.f32 %v6261_v23, %v6264_v13 }
 0x1e8   : > { %3633 = vst.msk [vmem:[%s6173_s11 + $0x208] sm:$0xff] %vm3567_vm0, %v3410_v54 }
 0x1e9   : > { %8520 = vst [vmem:[#allocation39_spill] sm:$0xff] %v6264_v13 }
 0x1ea   : > { %1015 = vmax.xlane.f32.xlu1 %v1014_v35  ;;  %v2925_v7 = vpop.f32.mrf.mxu0 }
 0x1eb   : > { %v3254_v43 = vpop.f32.mrf.mxu1  ;;  %1018 = vmax.xlane.f32.xlu2 %v1017_v12  ;;  %v2926_v49 = vadd.f32 %v6154_v15, %v2925_v7 }
 0x1ec   : > { %v3083_v41 = vpop.f32.mrf.mxu2 }
 0x1ed   : > { %v3255_v33 = vadd.f32 %v3254_v43, %v2926_v49  ;;  %v3084_v32 = vadd.f32 %v6154_v15, %v3083_v41  ;;  %v3412_v30 = vpop.f32.mrf.mxu3 }
 0x1ee   : > { %v6272_v18 = vpop.xlane.xlu0 %1936 }
 0x1ef   : > { %3571 = vst.msk [vmem:[%s6173_s11 + $0x18] sm:$0xff] %vm3567_vm0, %v3255_v33  ;;  %v3413_v56 = vadd.f32 %v3412_v30, %v3084_v32 }
 0x1f1   : > { %3634 = vst.msk [vmem:[%s6173_s11 + $0x210] sm:$0xff] %vm3567_vm0, %v3413_v56 }
 0x1f2   : > { %820 = vmax.xlane.f32.xlu1 %v819_v38 }
 0x1f4   : > { %v2928_v35 = vpop.f32.mrf.mxu0  ;;  %v3257_v12 = vpop.f32.mrf.mxu1 }
 0x1f5   : > { %v3085_v58 = vpop.f32.mrf.mxu2  ;;  %v2929_v63 = vadd.f32 %v6154_v15, %v2928_v35  ;;  %v3414_v7 = vpop.f32.mrf.mxu3 }
 0x1f6   : > { %v3086_v54 = vadd.f32 %v6154_v15, %v3085_v58  ;;  %v1004_v49 = vpop.xlane.xlu0 %1003 }
 0x1f7   : > { %v3258_v43 = vadd.f32 %v3257_v12, %v2929_v63  ;;  %v1295_v33 = vsub.f32 %v5898_v62, %v1004_v49  ;;  %v1296_v13 = vsub.f32 %v5901_v8, %v1004_v49 }
 0x1f8   : > { %v3415_v41 = vadd.f32 %v3414_v7, %v3086_v54 }
 0x1f9   : > { %3572 = vst.msk [vmem:[%s6173_s11 + $0x20] sm:$0xff] %vm3567_vm0, %v3258_v43  ;;  %v1733_v32 = vmul.f32 1.442695, %v1295_v33  ;;  %v1735_v30 = vmul.f32 1.442695, %v1296_v13 }
 0x1fa   : > { %3635 = vst.msk [vmem:[%s6173_s11 + $0x218] sm:$0xff] %vm3567_vm0, %v3415_v41 }
 0x1fb   : > { %4216 = vpow2.f32 %v1733_v32 }
 0x1fc   : > { %v2930_v38 = vpop.f32.mrf.mxu0  ;;  %v3259_v56 = vpop.f32.mrf.mxu1  ;;  %4218 = vpow2.f32 %v1735_v30 }
 0x1fd   : > { %v3088_v35 = vpop.f32.mrf.mxu2  ;;  %v2931_v12 = vadd.f32 %v6154_v15, %v2930_v38  ;;  %v3417_v62 = vpop.f32.mrf.mxu3 }
 0x1fe   : > { %v3089_v58 = vadd.f32 %v6154_v15, %v3088_v35  ;;  %v809_v8 = vpop.xlane.xlu0 %808 }
 0x1ff   : > { %v3260_v63 = vadd.f32 %v3259_v56, %v2931_v12  ;;  %v1165_v7 = vsub.f32 %v5916_v9, %v809_v8  ;;  %v1166_v43 = vsub.f32 %v5919_v5, %v809_v8 }
 0x200   : > { %v3418_v54 = vadd.f32 %v3417_v62, %v3089_v58 }
 0x201   : > { %3573 = vst.msk [vmem:[%s6173_s11 + $0x28] sm:$0xff] %vm3567_vm0, %v3260_v63  ;;  %v6290_v13 = vpop.eup %4216  ;;  %v1473_v49 = vmul.f32 1.442695, %v1165_v7  ;;  %v1475_v41 = vmul.f32 1.442695, %v1166_v43  ;;  %v415_v7 = vld [vmem:[%s4929_s14 + $0x638] sm:$0xff] }
 0x202   : > { %3636 = vst.msk [vmem:[%s6173_s11 + $0x220] sm:$0xff] %vm3567_vm0, %v3418_v54  ;;  %v6294_v33 = vpop.eup %4218  ;;  %v414_v54 = vld [vmem:[%s4929_s14 + $0x630] sm:$0xff] }
 0x203   : > { %8521 = vst [vmem:[#allocation50_spill] sm:$0xff] %v6294_v33  ;;  %4220 = vpow2.f32 %v1473_v49  ;;  %v2154_v32 = vadd.f32 %v6294_v33, %v6290_v13 }
 0x204   : > { %v2933_v30 = vpop.f32.mrf.mxu0  ;;  %v3262_v9 = vpop.f32.mrf.mxu1  ;;  %4222 = vpow2.f32 %v1475_v41 }
 0x205   : > { %v3090_v5 = vpop.f32.mrf.mxu2  ;;  %v2934_v38 = vadd.f32 %v6154_v15, %v2933_v30  ;;  %v3419_v35 = vpop.f32.mrf.mxu3  ;;  %2155 = vadd.xlane.f32.xlu2 %v2154_v32  ;;  %4224 = vrcp.f32 %v6252_v24 }
 0x206   : > { %v3091_v56 = vadd.f32 %v6154_v15, %v3090_v5  ;;  %v6316_v5 = vmul.f32 %v4945_v6, %v414_v54 }
 0x207   : > { %v3263_v12 = vadd.f32 %v3262_v9, %v2934_v38  ;;  %v6319_v38 = vmul.f32 %v4945_v6, %v415_v7 }
 0x208   : > { %v3420_v58 = vadd.f32 %v3419_v35, %v3091_v56 }
 0x209   : > { %3574 = vst.msk [vmem:[%s6173_s11 + $0x30] sm:$0xff] %vm3567_vm0, %v3263_v12  ;;  %v6302_v62 = vpop.eup %4220 }
 0x20a   : > { %8522 = vst [vmem:[#allocation51_spill] sm:$0xff] %v6302_v62  ;;  %v6307_v63 = vpop.eup %4222 }
 0x20b   : > { %3637 = vst.msk [vmem:[%s6173_s11 + $0x228] sm:$0xff] %vm3567_vm0, %v3420_v58  ;;  %v2129_v8 = vpop.xlane.xlu2 %2128  ;;  %v1959_v43 = vadd.f32 %v6307_v63, %v6302_v62  ;;  %v4225_v35 = vpop.eup %4224 }
 0x20c   : > { %8523 = vst [vmem:[#allocation29_spill] sm:$0xff] %v6307_v63  ;;  %v2935_v49 = vpop.f32.mrf.mxu0  ;;  %v3264_v41 = vpop.f32.mrf.mxu1  ;;  %4226 = vrcp.f32 %v2129_v8  ;;  %v1026_v8 = vmax.f32 %v6316_v5, %v6319_v38  ;;  %v2559_v54 = vmul.f32 %v4225_v35, %v5874_v39 }
 0x20d   : > { %v3093_v32 = vpop.f32.mrf.mxu2  ;;  %v2936_v30 = vadd.f32 %v6154_v15, %v2935_v49  ;;  %v3422_v9 = vpop.f32.mrf.mxu3  ;;  %1960 = vadd.xlane.f32.xlu2 %v1959_v43  ;;  %v284_v49 = vld [vmem:[%s4929_s14 + $0x220] sm:$0xff] }
 0x20e   : > { %v3094_v24 = vadd.f32 %v6154_v15, %v3093_v32  ;;  %v6337_v39 = vmul.f32 %v4945_v6, %v284_v49 }
 0x20f   : > { %v3265_v56 = vadd.f32 %v3264_v41, %v2936_v30  ;;  %v2560_v41 = vmul.f32 %v4225_v35, %v5876_v28  ;;  %v285_v30 = vld [vmem:[%s4929_s14 + $0x228] sm:$0xff] }
 0x210   : > { %v3423_v12 = vadd.f32 %v3422_v9, %v3094_v24 }
 0x211   : > { %3575 = vst.msk [vmem:[%s6173_s11 + $0x38] sm:$0xff] %vm3567_vm0, %v3265_v56 }
 0x212   : > { %v4227_v58 = vpop.eup %4226  ;;  %3638 = vst.msk [vmem:[%s6173_s11 + $0x230] sm:$0xff] %vm3567_vm0, %v3423_v12 }
 0x213   : > { %v806_v43 = vpop.xlane.xlu2 %805  ;;  %v2557_v32 = vmul.f32 %v4227_v58, %v5938_v4  ;;  %v2558_v7 = vmul.f32 %v4227_v58, %v5941_v47 }
 0x214   : > { %v2938_v24 = vpop.f32.mrf.mxu0  ;;  %v3267_v9 = vpop.f32.mrf.mxu1  ;;  %v1163_v56 = vsub.f32 %v5952_v37, %v806_v43  ;;  %v1164_v12 = vsub.f32 %v5955_v48, %v806_v43  ;;  %v6341_v37 = vmul.f32 %v4945_v6, %v285_v30 }
 0x215   : > { %v3095_v63 = vpop.f32.mrf.mxu2  ;;  %v2939_v62 = vadd.f32 %v6154_v15, %v2938_v24  ;;  %v2731_v33 = vpack.c.bf16 %v2559_v54, %v2557_v32  ;;  %v2732_v4 = vpack.c.bf16 %v2560_v41, %v2558_v7  ;;  %v3424_v28 = vpop.f32.mrf.mxu3  ;;  %1027 = vmax.xlane.f32.xlu2 %v1026_v8 }
 0x216   : > { %v3096_v47 = vadd.f32 %v6154_v15, %v3095_v63  ;;  %v1469_v35 = vmul.f32 1.442695, %v1163_v56  ;;  %v1471_v58 = vmul.f32 1.442695, %v1164_v12  ;;  %v831_v63 = vmax.f32 %v6337_v39, %v6341_v37 }
 0x217   : > { %v3268_v48 = vadd.f32 %v3267_v9, %v2939_v62  ;;  %3122 = vmatmul.bf16.gmra.mxu2 %v2731_v33  ;;  %3451 = vmatmul.bf16.gmra.mxu3 %v2732_v4 }
 0x218   : > { %v3425_v43 = vadd.f32 %v3424_v28, %v3096_v47  ;;  %4228 = vpow2.f32 %v1469_v35 }
 0x219   : > { %3576 = vst.msk [vmem:[%s6173_s11 + $0x40] sm:$0xff] %vm3567_vm0, %v3268_v48  ;;  %4230 = vpow2.f32 %v1471_v58 }
 0x21a   : > { %3639 = vst.msk [vmem:[%s6173_s11 + $0x238] sm:$0xff] %vm3567_vm0, %v3425_v43 }
 0x21b   : > { %v1001_v49 = vpop.xlane.xlu2 %1000 }
 0x21c   : > { %v2940_v8 = vpop.f32.mrf.mxu0  ;;  %v3269_v32 = vpop.f32.mrf.mxu1  ;;  %v1293_v54 = vsub.f32 %v5965_v61, %v1001_v49  ;;  %v1294_v62 = vsub.f32 %v5968_v59, %v1001_v49 }
 0x21d   : > { %v3098_v33 = vpop.f32.mrf.mxu2  ;;  %v2941_v7 = vadd.f32 %v6154_v15, %v2940_v8  ;;  %v6352_v41 = vpop.xlane.xlu0 %1945  ;;  %832 = vmax.xlane.f32.xlu2 %v831_v63 }
 0x21e   : > { %v6354_v30 = vpop.eup %4228  ;;  %v3099_v24 = vadd.f32 %v6154_v15, %v3098_v33  ;;  %v3427_v9 = vpop.f32.mrf.mxu3  ;;  %v1729_v56 = vmul.f32 1.442695, %v1293_v54  ;;  %v1731_v12 = vmul.f32 1.442695, %v1294_v62  ;;  %v282_v33 = vld [vmem:[%s4929_s14 + $0x210] sm:$0xff] }
 0x21f   : > { %v6357_v4 = vpop.eup %4230  ;;  %v3270_v61 = vadd.f32 %v3269_v32, %v2941_v7  ;;  %v283_v7 = vld [vmem:[%s4929_s14 + $0x218] sm:$0xff] }
 0x220   : > { %v3428_v47 = vadd.f32 %v3427_v9, %v3099_v24  ;;  %4232 = vpow2.f32 %v1729_v56  ;;  %v1956_v59 = vadd.f32 %v6357_v4, %v6354_v30  ;;  %v6382_v56 = vmul.f32 %v4945_v6, %v282_v33 }
 0x221   : > { %3577 = vst.msk [vmem:[%s6173_s11 + $0x48] sm:$0xff] %vm3567_vm0, %v3270_v61  ;;  %4234 = vpow2.f32 %v1731_v12  ;;  %v6385_v12 = vmul.f32 %v4945_v6, %v283_v7  ;;  %v412_v7 = vld [vmem:[%s4929_s14 + $0x620] sm:$0xff] }
 0x222   : > { %3640 = vst.msk [vmem:[%s6173_s11 + $0x240] sm:$0xff] %vm3567_vm0, %v3428_v47  ;;  %1957 = vadd.xlane.f32.xlu1 %v1956_v59  ;;  %4236 = vrcp.f32 %v6272_v18  ;;  %v413_v18 = vld [vmem:[%s4929_s14 + $0x628] sm:$0xff] }
 0x223   : > { %8526 = vst [vmem:[#allocation10_spill] sm:$0xff] %v6385_v12 }
 0x224   : > { %v2943_v28 = vpop.f32.mrf.mxu0  ;;  %v3272_v35 = vpop.f32.mrf.mxu1 }
 0x225   : > { %v3100_v58 = vpop.f32.mrf.mxu2  ;;  %v2944_v48 = vadd.f32 %v6154_v15, %v2943_v28  ;;  %v2138_v43 = vpop.xlane.xlu2 %2137 }
 0x226   : > { %v6366_v63 = vpop.eup %4232  ;;  %v3101_v49 = vadd.f32 %v6154_v15, %v3100_v58  ;;  %v3429_v8 = vpop.f32.mrf.mxu3 }
 0x227   : > { %8524 = vst [vmem:[#allocation30_spill] sm:$0xff] %v6366_v63  ;;  %v6369_v32 = vpop.xlane.xlu0 %2140  ;;  %v6371_v54 = vpop.eup %4234  ;;  %v3273_v62 = vadd.f32 %v3272_v35, %v2944_v48 }
 0x228   : > { %8525 = vst [vmem:[#allocation13_spill] sm:$0xff] %v6371_v54  ;;  %v3430_v24 = vadd.f32 %v3429_v8, %v3101_v49  ;;  %v2151_v9 = vadd.f32 %v6371_v54, %v6366_v63  ;;  %v828_v8 = vmax.f32 %v6382_v56, %v6385_v12  ;;  %v6401_v63 = vmul.f32 %v4945_v6, %v412_v7 }
 0x229   : > { %3578 = vst.msk [vmem:[%s6173_s11 + $0x50] sm:$0xff] %vm3567_vm0, %v3273_v62 }
 0x22a   : > { %3641 = vst.msk [vmem:[%s6173_s11 + $0x248] sm:$0xff] %vm3567_vm0, %v3430_v24  ;;  %2152 = vadd.xlane.f32.xlu1 %v2151_v9 }
 0x22c   : > { %v2945_v61 = vpop.f32.mrf.mxu0  ;;  %v3274_v47 = vpop.f32.mrf.mxu1 }
 0x22d   : > { %v3103_v59 = vpop.f32.mrf.mxu2  ;;  %v2946_v28 = vadd.f32 %v6154_v15, %v2945_v61  ;;  %v1940_v35 = vpop.xlane.xlu1 %1939 }
 0x22e   : > { %v3104_v58 = vadd.f32 %v6154_v15, %v3103_v59  ;;  %v3432_v48 = vpop.f32.mrf.mxu3  ;;  %4238 = vrcp.f32 %v1940_v35  ;;  %v1943_v49 = vpop.xlane.xlu2 %1942 }
 0x22f   : > { %v3275_v62 = vadd.f32 %v3274_v47, %v2946_v28  ;;  %v818_v33 = vpop.xlane.xlu0 %817  ;;  %v4237_v61 = vpop.eup %4236  ;;  %v6404_v47 = vmul.f32 %v4945_v6, %v413_v18  ;;  %4240 = vrcp.f32 %v2138_v43 }
 0x230   : > { %v3433_v24 = vadd.f32 %v3432_v48, %v3104_v58  ;;  %v1171_v9 = vsub.f32 %v6013_v53, %v818_v33  ;;  %v1172_v54 = vsub.f32 %v6020_v3, %v818_v33  ;;  %v2429_v3 = vmul.f32 %v4237_v61, %v5888_v42 }
 0x231   : > { %3579 = vst.msk [vmem:[%s6173_s11 + $0x58] sm:$0xff] %vm3567_vm0, %v3275_v62  ;;  %v1023_v42 = vmax.f32 %v6401_v63, %v6404_v47 }
 0x232   : > { %3642 = vst.msk [vmem:[%s6173_s11 + $0x250] sm:$0xff] %vm3567_vm0, %v3433_v24  ;;  %v1485_v59 = vmul.f32 1.442695, %v1171_v9  ;;  %v1487_v35 = vmul.f32 1.442695, %v1172_v54  ;;  %829 = vmax.xlane.f32.xlu1 %v828_v8  ;;  %v2430_v24 = vmul.f32 %v4237_v61, %v5890_v26 }
 0x234   : > { %v4239_v28 = vpop.eup %4238  ;;  %4242 = vpow2.f32 %v1485_v59  ;;  %v2948_v53 = vpop.f32.mrf.mxu0 }
 0x235   : > { %v3277_v58 = vpop.f32.mrf.mxu1  ;;  %4244 = vpow2.f32 %v1487_v35  ;;  %v3105_v48 = vpop.f32.mrf.mxu2  ;;  %v2949_v33 = vadd.f32 %v6154_v15, %v2948_v53  ;;  %v2431_v54 = vmul.f32 %v4239_v28, %v6036_v44  ;;  %v2432_v8 = vmul.f32 %v4239_v28, %v6041_v14 }
 0x236   : > { %v2135_v62 = vpop.xlane.xlu1 %2134  ;;  %v3106_v7 = vadd.f32 %v6154_v15, %v3105_v48  ;;  %v3434_v18 = vpop.f32.mrf.mxu3 }
 0x237   : > { %4246 = vrcp.f32 %v2135_v62  ;;  %v1010_v43 = vpop.xlane.xlu2 %1009  ;;  %v3278_v9 = vadd.f32 %v3277_v58, %v2949_v33  ;;  %v1013_v44 = vpop.xlane.xlu0 %1012  ;;  %v2667_v53 = vpack.c.bf16 %v2431_v54, %v2429_v3  ;;  %v2668_v62 = vpack.c.bf16 %v2432_v8, %v2430_v24  ;;  %v8529_v24 = vld [vmem:[#allocation21_spill] sm:$0xff] }
 0x238   : > { %v1299_v59 = vsub.f32 %v6059_v21, %v1010_v43  ;;  %v1300_v35 = vsub.f32 %v6065_v40, %v1010_v43  ;;  %v3435_v14 = vadd.f32 %v3434_v18, %v3106_v7  ;;  %v1301_v28 = vsub.f32 %v6053_v20, %v1013_v44  ;;  %v4241_v12 = vpop.eup %4240 }
 0x239   : > { %v1302_v48 = vsub.f32 %v6056_v2, %v1013_v44  ;;  %4248 = vrcp.f32 %v6352_v41  ;;  %3580 = vst.msk [vmem:[%s6173_s11 + $0x60] sm:$0xff] %vm3567_vm0, %v3278_v9  ;;  %2962 = vmatmul.bf16.gmra.mxu0 %v2667_v53  ;;  %3291 = vmatmul.bf16.gmra.mxu1 %v2668_v62  ;;  %v2563_v54 = vmul.f32 %v4241_v12, %v5995_v16 }
 0x23a   : > { %v1741_v26 = vmul.f32 1.442695, %v1299_v59  ;;  %v1743_v61 = vmul.f32 1.442695, %v1300_v35  ;;  %v6421_v21 = vpop.eup %4242  ;;  %4250 = vrcp.f32 %v1943_v49  ;;  %3643 = vst.msk [vmem:[%s6173_s11 + $0x258] sm:$0xff] %vm3567_vm0, %v3435_v14  ;;  %1024 = vmax.xlane.f32.xlu1 %v1023_v42  ;;  %v2564_v49 = vmul.f32 %v4241_v12, %v6006_v17 }
 0x23b   : > { %8527 = vst [vmem:[#allocation22_spill] sm:$0xff] %v6421_v21  ;;  %v1745_v40 = vmul.f32 1.442695, %v1301_v28  ;;  %v1747_v58 = vmul.f32 1.442695, %v1302_v48  ;;  %v6425_v20 = vpop.eup %4244 }
 0x23c   : > { %8528 = vst [vmem:[#allocation20_spill] sm:$0xff] %v6425_v20  ;;  %4252 = vpow2.f32 %v1741_v26  ;;  %v1968_v41 = vadd.f32 %v6425_v20, %v6421_v21  ;;  %v2950_v3 = vpop.f32.mrf.mxu0 }
 0x23d   : > { %v4247_v2 = vpop.eup %4246  ;;  %4254 = vpow2.f32 %v1743_v61  ;;  %v3279_v33 = vpop.f32.mrf.mxu1  ;;  %v2951_v18 = vadd.f32 %v6154_v15, %v2950_v3 }
 0x23e   : > { %4256 = vpow2.f32 %v1745_v40  ;;  %v3108_v8 = vpop.f32.mrf.mxu2  ;;  %v812_v7 = vpop.xlane.xlu1 %811  ;;  %v2561_v43 = vmul.f32 %v4247_v2, %v6069_v36  ;;  %v2562_v42 = vmul.f32 %v4247_v2, %v8529_v24  ;;  %1969 = vadd.xlane.f32.xlu2 %v1968_v41  ;;  %v8531_v41 = vld [vmem:[#allocation35_spill] sm:$0xff] }
 0x23f   : > { %4258 = vpow2.f32 %v1747_v58  ;;  %v3109_v9 = vadd.f32 %v6154_v15, %v3108_v8  ;;  %v3437_v59 = vpop.f32.mrf.mxu3  ;;  %v1167_v35 = vsub.f32 %v6083_v46, %v812_v7  ;;  %v1168_v16 = vsub.f32 %v6086_v55, %v812_v7  ;;  %v815_v17 = vpop.xlane.xlu2 %814  ;;  %v291_v7 = vld [vmem:[%s4929_s14 + $0x258] sm:$0xff] }
 0x240   : > { %v4249_v12 = vpop.eup %4248  ;;  %v3280_v44 = vadd.f32 %v3279_v33, %v2951_v18  ;;  %v1169_v53 = vsub.f32 %v6091_v29, %v815_v17  ;;  %v1170_v36 = vsub.f32 %v6094_v52, %v815_v17  ;;  %v6439_v14 = vpop.xlane.xlu0 %2149  ;;  %v2733_v28 = vpack.c.bf16 %v2563_v54, %v2561_v43  ;;  %v8533_v54 = vld [vmem:[#allocation36_spill] sm:$0xff] }
 0x241   : > { %v4251_v48 = vpop.eup %4250  ;;  %v3438_v62 = vadd.f32 %v3437_v59, %v3109_v9  ;;  %v1477_v26 = vmul.f32 1.442695, %v1167_v35  ;;  %v1479_v61 = vmul.f32 1.442695, %v1168_v16  ;;  %v2734_v58 = vpack.c.bf16 %v2564_v49, %v2562_v42  ;;  %v290_v49 = vld [vmem:[%s4929_s14 + $0x250] sm:$0xff] }
 0x242   : > { %v6441_v40 = vpop.eup %4252  ;;  %3581 = vst.msk [vmem:[%s6173_s11 + $0x68] sm:$0xff] %vm3567_vm0, %v3280_v44  ;;  %v1481_v46 = vmul.f32 1.442695, %v1169_v53  ;;  %v1483_v55 = vmul.f32 1.442695, %v1170_v36  ;;  %3127 = vmatmul.bf16.gmra.mxu2 %v2733_v28  ;;  %v2433_v3 = vmul.f32 %v4251_v48, %v8531_v41  ;;  %v2434_v8 = vmul.f32 %v4251_v48, %v8533_v54  ;;  %v8534_v42 = vld [vmem:[#allocation32_spill] sm:$0xff] }
 0x243   : > { %v6445_v29 = vpop.eup %4254  ;;  %3644 = vst.msk [vmem:[%s6173_s11 + $0x260] sm:$0xff] %vm3567_vm0, %v3438_v62  ;;  %4260 = vpow2.f32 %v1477_v26  ;;  %3456 = vmatmul.bf16.gmra.mxu3 %v2734_v58  ;;  %v2435_v9 = vmul.f32 %v4249_v12, %v8534_v42  ;;  %v8535_v53 = vld [vmem:[#allocation33_spill] sm:$0xff]  ;;  %v6471_v62 = vmul.f32 %v4945_v6, %v290_v49  ;;  %v6474_v26 = vmul.f32 %v4945_v6, %v291_v7  ;;  %v418_v41 = vld [vmem:[%s4929_s14 + $0x650] sm:$0xff] }
 0x244   : > { %v6449_v52 = vpop.eup %4256  ;;  %4262 = vpow2.f32 %v1479_v61  ;;  %v2160_v2 = vadd.f32 %v6445_v29, %v6441_v40  ;;  %v2436_v36 = vmul.f32 %v4249_v12, %v8535_v53 }
 0x245   : > { %8530 = vst [vmem:[#allocation19_spill] sm:$0xff] %v6449_v52  ;;  %v6454_v33 = vpop.eup %4258  ;;  %4264 = vpow2.f32 %v1481_v46  ;;  %v2669_v48 = vpack.c.bf16 %v2435_v9, %v2433_v3  ;;  %v419_v3 = vld [vmem:[%s4929_s14 + $0x658] sm:$0xff] }
 0x246   : > { %8532 = vst [vmem:[#allocation17_spill] sm:$0xff] %v6454_v33  ;;  %4266 = vpow2.f32 %v1483_v55  ;;  %v3110_v18 = vpop.f32.mrf.mxu2  ;;  %2161 = vadd.xlane.f32.xlu1 %v2160_v2  ;;  %v2163_v43 = vadd.f32 %v6454_v33, %v6449_v52  ;;  %v1007_v24 = vpop.xlane.xlu1 %1006  ;;  %v2670_v55 = vpack.c.bf16 %v2436_v36, %v2434_v8  ;;  %v286_v36 = vld [vmem:[%s4929_s14 + $0x230] sm:$0xff] }
 0x247   : > { %v3111_v59 = vadd.f32 %v6154_v15, %v3110_v18  ;;  %v3439_v35 = vpop.f32.mrf.mxu3  ;;  %v1297_v16 = vsub.f32 %v6119_v34, %v1007_v24  ;;  %v1298_v17 = vsub.f32 %v6122_v31, %v1007_v24  ;;  %v6465_v44 = vpop.xlane.xlu2 %1951  ;;  %4268 = vrcp.f32 %v6369_v32  ;;  %v420_v18 = vld [vmem:[%s4929_s14 + $0x660] sm:$0xff] }
 0x248   : > { %2164 = vadd.xlane.f32.xlu2 %v2163_v43  ;;  %v6468_v28 = vpop.xlane.xlu0 %1954  ;;  %v840_v32 = vmax.f32 %v6471_v62, %v6474_v26  ;;  %v421_v43 = vld [vmem:[%s4929_s14 + $0x668] sm:$0xff] }
 0x249   : > { %v6476_v34 = vpop.eup %4260  ;;  %v3440_v31 = vadd.f32 %v3439_v35, %v3111_v59  ;;  %v1737_v61 = vmul.f32 1.442695, %v1297_v16  ;;  %v1739_v46 = vmul.f32 1.442695, %v1298_v17  ;;  %2967 = vmatmul.bf16.gmra.mxu0 %v2669_v48  ;;  %3296 = vmatmul.bf16.gmra.mxu1 %v2670_v55  ;;  %v6499_v59 = vmul.f32 %v4945_v6, %v418_v41 }
 0x24a   : > { %v6478_v58 = vpop.eup %4262  ;;  %v6502_v35 = vmul.f32 %v4945_v6, %v419_v3  ;;  %v6512_v55 = vmul.f32 %v4945_v6, %v421_v43 }
 0x24b   : > { %v6481_v12 = vpop.eup %4264  ;;  %3645 = vst.msk [vmem:[%s6173_s11 + $0x268] sm:$0xff] %vm3567_vm0, %v3440_v31  ;;  %4270 = vpow2.f32 %v1737_v61  ;;  %v1962_v2 = vadd.f32 %v6478_v58, %v6476_v34 }
 0x24c   : > { %v6489_v54 = vpop.eup %4266  ;;  %4272 = vpow2.f32 %v1739_v46  ;;  %v2953_v49 = vpop.f32.mrf.mxu0  ;;  %v6509_v46 = vmul.f32 %v4945_v6, %v420_v18  ;;  %v288_v18 = vld [vmem:[%s4929_s14 + $0x240] sm:$0xff] }
 0x24d   : > { %8536 = vst [vmem:[#allocation48_spill] sm:$0xff] %v6489_v54  ;;  %1963 = vadd.xlane.f32.xlu0 %v1962_v2  ;;  %v1965_v8 = vadd.f32 %v6489_v54, %v6481_v12  ;;  %v3282_v7 = vpop.f32.mrf.mxu1  ;;  %v2954_v9 = vadd.f32 %v6154_v15, %v2953_v49  ;;  %v4269_v48 = vpop.eup %4268  ;;  %v287_v2 = vld [vmem:[%s4929_s14 + $0x238] sm:$0xff]  ;;  %v6543_v33 = vmul.f32 %v4945_v6, %v288_v18 }
 0x24e   : > { %v3113_v24 = vpop.f32.mrf.mxu2  ;;  %v2144_v42 = vpop.xlane.xlu1 %2143 }
 0x24f   : > { %v3114_v16 = vadd.f32 %v6154_v15, %v3113_v24  ;;  %v3442_v17 = vpop.f32.mrf.mxu3  ;;  %1966 = vadd.xlane.f32.xlu1 %v1965_v8  ;;  %4274 = vrcp.f32 %v2144_v42  ;;  %v6505_v53 = vpop.xlane.xlu2 %2146  ;;  %v3283_v31 = vadd.f32 %v3282_v7, %v2954_v9  ;;  %v6526_v7 = vmul.f32 %v4945_v6, %v286_v36 }
 0x250   : > { %841 = vmax.xlane.f32.xlu2 %v840_v32  ;;  %v1022_v61 = vpop.xlane.xlu0 %1021  ;;  %v1032_v32 = vmax.f32 %v6499_v59, %v6502_v35  ;;  %4276 = vrcp.f32 %v6465_v44  ;;  %v1035_v9 = vmax.f32 %v6509_v46, %v6512_v55 }
 0x251   : > { %v6515_v41 = vpop.eup %4270  ;;  %v3443_v3 = vadd.f32 %v3442_v17, %v3114_v16  ;;  %v1307_v8 = vsub.f32 %v6160_v27, %v1022_v61  ;;  %v1308_v49 = vsub.f32 %v6163_v11, %v1022_v61  ;;  %3582 = vst.msk [vmem:[%s6173_s11 + $0x70] sm:$0xff] %vm3567_vm0, %v3283_v31  ;;  %v6534_v11 = vmul.f32 %v4945_v6, %v287_v2  ;;  %v289_v16 = vld [vmem:[%s4929_s14 + $0x248] sm:$0xff]  ;;  %v8537_v61 = vld [vmem:[#allocation40_spill] sm:$0xff] }
 0x252   : > { %v6519_v24 = vpop.eup %4272  ;;  %v6552_v18 = vmul.f32 %v4945_v6, %v289_v16 }
 0x253   : > { %3646 = vst.msk [vmem:[%s6173_s11 + $0x270] sm:$0xff] %vm3567_vm0, %v3443_v3  ;;  %v1757_v43 = vmul.f32 1.442695, %v1307_v8  ;;  %v1759_v42 = vmul.f32 1.442695, %v1308_v49  ;;  %v2157_v27 = vadd.f32 %v6519_v24, %v6515_v41  ;;  %v2565_v3 = vmul.f32 %v4269_v48, %v8537_v61  ;;  %v8538_v8 = vld [vmem:[#allocation34_spill] sm:$0xff] }
 0x254   : > { %v2955_v36 = vpop.f32.mrf.mxu0  ;;  %v2566_v49 = vmul.f32 %v4269_v48, %v8538_v8  ;;  %v834_v48 = vmax.f32 %v6526_v7, %v6534_v11 }
 0x255   : > { %v4275_v17 = vpop.eup %4274  ;;  %4278 = vpow2.f32 %v1757_v43  ;;  %2158 = vadd.xlane.f32.xlu0 %v2157_v27  ;;  %v3284_v31 = vpop.f32.mrf.mxu1  ;;  %v2956_v44 = vadd.f32 %v6154_v15, %v2955_v36 }
 0x256   : > { %4280 = vpow2.f32 %v1759_v42  ;;  %v3115_v2 = vpop.f32.mrf.mxu2  ;;  %v1949_v52 = vpop.xlane.xlu1 %1948  ;;  %v2567_v20 = vmul.f32 %v4275_v17, %v6181_v1  ;;  %v2568_v21 = vmul.f32 %v4275_v17, %v6186_v50 }
 0x257   : > { %v3116_v43 = vadd.f32 %v6154_v15, %v3115_v2  ;;  %v3444_v27 = vpop.f32.mrf.mxu3  ;;  %1033 = vmax.xlane.f32.xlu1 %v1032_v32  ;;  %4282 = vrcp.f32 %v1949_v52  ;;  %v824_v61 = vpop.xlane.xlu2 %823  ;;  %v3285_v42 = vadd.f32 %v3284_v31, %v2956_v44  ;;  %v416_v2 = vld [vmem:[%s4929_s14 + $0x640] sm:$0xff] }
 0x258   : > { %1036 = vmax.xlane.f32.xlu2 %v1035_v9  ;;  %v1175_v1 = vsub.f32 %v6206_v45, %v824_v61  ;;  %v1176_v50 = vsub.f32 %v6209_v19, %v824_v61  ;;  %v827_v15 = vpop.xlane.xlu0 %826  ;;  %v2735_v17 = vpack.c.bf16 %v2567_v20, %v2565_v3  ;;  %v2736_v8 = vpack.c.bf16 %v2568_v21, %v2566_v49  ;;  %v4277_v54 = vpop.eup %4276  ;;  %v417_v45 = vld [vmem:[%s4929_s14 + $0x648] sm:$0xff]  ;;  %v8541_v3 = vld [vmem:[#allocation45_spill] sm:$0xff] }
 0x259   : > { %v3445_v32 = vadd.f32 %v3444_v27, %v3116_v43  ;;  %v1177_v52 = vsub.f32 %v6199_v57, %v827_v15  ;;  %v1178_v36 = vsub.f32 %v6202_v51, %v827_v15  ;;  %4284 = vrcp.f32 %v6439_v14  ;;  %3583 = vst.msk [vmem:[%s6173_s11 + $0x78] sm:$0xff] %vm3567_vm0, %v3285_v42  ;;  %v8542_v42 = vld [vmem:[#allocation38_spill] sm:$0xff] }
 0x25a   : > { %v1493_v9 = vmul.f32 1.442695, %v1175_v1  ;;  %v1495_v16 = vmul.f32 1.442695, %v1176_v50  ;;  %3132 = vmatmul.bf16.gmra.mxu2 %v2735_v17  ;;  %4286 = vrcp.f32 %v6505_v53  ;;  %3461 = vmatmul.bf16.gmra.mxu3 %v2736_v8  ;;  %v837_v51 = vmax.f32 %v6543_v33, %v6552_v18  ;;  %v8543_v50 = vld [vmem:[#allocation44_spill] sm:$0xff] }
 0x25b   : > { %v6563_v19 = vpop.eup %4278  ;;  %3647 = vst.msk [vmem:[%s6173_s11 + $0x278] sm:$0xff] %vm3567_vm0, %v3445_v32  ;;  %v1497_v57 = vmul.f32 1.442695, %v1177_v52  ;;  %v1499_v20 = vmul.f32 1.442695, %v1178_v36  ;;  %v6573_v14 = vmul.f32 %v4945_v6, %v416_v2  ;;  %v2439_v49 = vmul.f32 %v4277_v54, %v8541_v3 }
 0x25c   : > { %8539 = vst [vmem:[#allocation49_spill] sm:$0xff] %v6563_v19  ;;  %v6570_v21 = vpop.eup %4280  ;;  %4288 = vpow2.f32 %v1493_v9  ;;  %v6579_v44 = vmul.f32 %v4945_v6, %v417_v45  ;;  %v2440_v15 = vmul.f32 %v4277_v54, %v8543_v50 }
 0x25d   : > { %8540 = vst [vmem:[#allocation41_spill] sm:$0xff] %v6570_v21  ;;  %v4283_v31 = vpop.eup %4282  ;;  %4290 = vpow2.f32 %v1495_v16  ;;  %835 = vmax.xlane.f32.xlu0 %v834_v48  ;;  %v2172_v53 = vadd.f32 %v6570_v21, %v6563_v19  ;;  %v6584_v48 = vld [vmem:[#allocation6] ss:$0 sm:$0xff] }
 0x25e   : > { %4292 = vpow2.f32 %v1497_v57  ;;  %v3118_v43 = vpop.f32.mrf.mxu2  ;;  %v1016_v27 = vpop.xlane.xlu1 %1015  ;;  %v2437_v61 = vmul.f32 %v4283_v31, %v6213_v60  ;;  %v2438_v1 = vmul.f32 %v4283_v31, %v8542_v42  ;;  %v1029_v31 = vmax.f32 %v6573_v14, %v6579_v44 }
 0x25f   : > { %4294 = vpow2.f32 %v1499_v20  ;;  %838 = vmax.xlane.f32.xlu1 %v837_v51  ;;  %v3119_v17 = vadd.f32 %v6584_v48, %v3118_v43  ;;  %v3447_v32 = vpop.f32.mrf.mxu3  ;;  %v1303_v52 = vsub.f32 %v6233_v22, %v1016_v27  ;;  %v1304_v36 = vsub.f32 %v6236_v0, %v1016_v27  ;;  %v1019_v8 = vpop.xlane.xlu2 %1018 }
 0x260   : > { %v4285_v2 = vpop.eup %4284  ;;  %2173 = vadd.xlane.f32.xlu2 %v2172_v53  ;;  %v1305_v60 = vsub.f32 %v6239_v25, %v1019_v8  ;;  %v1306_v9 = vsub.f32 %v6245_v10, %v1019_v8  ;;  %v2671_v54 = vpack.c.bf16 %v2439_v49, %v2437_v61  ;;  %v2672_v16 = vpack.c.bf16 %v2440_v15, %v2438_v1  ;;  %v8545_v49 = vld [vmem:[#allocation24_spill] sm:$0xff]  ;;  %v8547_v1 = vld [vmem:[#allocation47_spill] sm:$0xff] }
 0x261   : > { %v4287_v45 = vpop.eup %4286  ;;  %v3448_v57 = vadd.f32 %v3447_v32, %v3119_v17  ;;  %v1749_v20 = vmul.f32 1.442695, %v1303_v52  ;;  %v1751_v51 = vmul.f32 1.442695, %v1304_v36  ;;  %v426_v15 = vld [vmem:[%s4929_s14 + $0x690] sm:$0xff]  ;;  %v427_v17 = vld [vmem:[%s4929_s14 + $0x698] sm:$0xff] }
 0x262   : > { %v6593_v22 = vpop.eup %4288  ;;  %v1753_v0 = vmul.f32 1.442695, %v1305_v60  ;;  %v1755_v3 = vmul.f32 1.442695, %v1306_v9  ;;  %2972 = vmatmul.bf16.gmra.mxu0 %v2671_v54  ;;  %3301 = vmatmul.bf16.gmra.mxu1 %v2672_v16  ;;  %v2569_v43 = vmul.f32 %v4287_v45, %v8545_v49  ;;  %v2570_v50 = vmul.f32 %v4287_v45, %v8547_v1  ;;  %v8548_v60 = vld [vmem:[#allocation37_spill] sm:$0xff] }
 0x263   : > { %v6595_v25 = vpop.eup %4290  ;;  %3648 = vst.msk [vmem:[%s6173_s11 + $0x280] sm:$0xff] %vm3567_vm0, %v3448_v57  ;;  %4296 = vpow2.f32 %v1749_v20  ;;  %v2571_v9 = vmul.f32 %v4285_v2, %v8548_v60  ;;  %v8549_v57 = vld [vmem:[#allocation39_spill] sm:$0xff]  ;;  %v6618_v49 = vmul.f32 %v4945_v6, %v426_v15 }
 0x264   : > { %v6599_v10 = vpop.eup %4292  ;;  %4298 = vpow2.f32 %v1751_v51  ;;  %v1974_v53 = vadd.f32 %v6595_v25, %v6593_v22  ;;  %v2958_v61 = vpop.f32.mrf.mxu0  ;;  %v8550_v20 = vld [vmem:[#allocation27_spill] sm:$0xff] }
 0x265   : > { %8544 = vst [vmem:[#allocation42_spill] sm:$0xff] %v6599_v10  ;;  %v6604_v27 = vpop.eup %4294  ;;  %4300 = vpow2.f32 %v1753_v0  ;;  %1030 = vmax.xlane.f32.xlu0 %v1029_v31  ;;  %v3287_v42 = vpop.f32.mrf.mxu1  ;;  %v2959_v8 = vadd.f32 %v6584_v48, %v2958_v61  ;;  %v2572_v51 = vmul.f32 %v4285_v2, %v8550_v20  ;;  %v6621_v61 = vmul.f32 %v4945_v6, %v427_v17  ;;  %v294_v17 = vld [vmem:[%s4929_s14 + $0x270] sm:$0xff] }
 0x266   : > { %8546 = vst [vmem:[#allocation26_spill] sm:$0xff] %v6604_v27  ;;  %4302 = vpow2.f32 %v1755_v3  ;;  %v3120_v32 = vpop.f32.mrf.mxu2  ;;  %v1977_v52 = vadd.f32 %v6604_v27, %v6599_v10  ;;  %v821_v36 = vpop.xlane.xlu1 %820  ;;  %v2737_v3 = vpack.c.bf16 %v2571_v9, %v2569_v43  ;;  %v296_v9 = vld [vmem:[%s4929_s14 + $0x280] sm:$0xff] }
 0x267   : > { %v3121_v54 = vadd.f32 %v6584_v48, %v3120_v32  ;;  %1975 = vadd.xlane.f32.xlu1 %v1974_v53  ;;  %v1173_v16 = vsub.f32 %v6261_v23, %v821_v36  ;;  %v1174_v45 = vsub.f32 %v8549_v57, %v821_v36  ;;  %v3449_v31 = vpop.f32.mrf.mxu3  ;;  %v3288_v0 = vadd.f32 %v3287_v42, %v2959_v8 }
 0x268   : > { %1978 = vadd.xlane.f32.xlu2 %v1977_v52  ;;  %v2738_v36 = vpack.c.bf16 %v2572_v51, %v2570_v50  ;;  %v1044_v50 = vmax.f32 %v6618_v49, %v6621_v61  ;;  %v295_v52 = vld [vmem:[%s4929_s14 + $0x278] sm:$0xff] }
 0x269   : > { %v6623_v1 = vpop.eup %4296  ;;  %v3450_v53 = vadd.f32 %v3449_v31, %v3121_v54  ;;  %v1489_v23 = vmul.f32 1.442695, %v1173_v16  ;;  %v1491_v32 = vmul.f32 1.442695, %v1174_v45  ;;  %3584 = vst.msk [vmem:[%s6173_s11 + $0x80] sm:$0xff] %vm3567_vm0, %v3288_v0  ;;  %v297_v54 = vld [vmem:[%s4929_s14 + $0x288] sm:$0xff]  ;;  %v6647_v45 = vmul.f32 %v4945_v6, %v294_v17 }
 0x26a   : > { %v6625_v2 = vpop.eup %4298  ;;  %3137 = vmatmul.bf16.gmra.mxu2 %v2737_v3  ;;  %3466 = vmatmul.bf16.gmra.mxu3 %v2738_v36  ;;  %v6650_v20 = vmul.f32 %v4945_v6, %v295_v52  ;;  %v6653_v31 = vmul.f32 %v4945_v6, %v296_v9  ;;  %v6656_v0 = vmul.f32 %v4945_v6, %v297_v54  ;;  %v424_v17 = vld [vmem:[%s4929_s14 + $0x680] sm:$0xff]  ;;  %v425_v52 = vld [vmem:[%s4929_s14 + $0x688] sm:$0xff] }
 0x26b   : > { %v6629_v43 = vpop.eup %4300  ;;  %3649 = vst.msk [vmem:[%s6173_s11 + $0x288] sm:$0xff] %vm3567_vm0, %v3450_v53  ;;  %4304 = vpow2.f32 %v1489_v23  ;;  %v2166_v42 = vadd.f32 %v6625_v2, %v6623_v1  ;;  %v422_v23 = vld [vmem:[%s4929_s14 + $0x670] sm:$0xff]  ;;  %v6681_v9 = vmul.f32 %v4945_v6, %v424_v17  ;;  %v6684_v54 = vmul.f32 %v4945_v6, %v425_v52 }
 0x26c   : > { %8551 = vst [vmem:[#allocation54_spill] sm:$0xff] %v6629_v43  ;;  %v6635_v15 = vpop.eup %4302  ;;  %4306 = vpow2.f32 %v1491_v32  ;;  %v2960_v60 = vpop.f32.mrf.mxu0  ;;  %v423_v32 = vld [vmem:[%s4929_s14 + $0x678] sm:$0xff] }
 0x26d   : > { %8552 = vst [vmem:[#allocation52_spill] sm:$0xff] %v6635_v15  ;;  %2167 = vadd.xlane.f32.xlu0 %v2166_v42  ;;  %v2169_v8 = vadd.f32 %v6635_v15, %v6629_v43  ;;  %v2961_v16 = vadd.f32 %v6584_v48, %v2960_v60  ;;  %v3289_v57 = vpop.f32.mrf.mxu1  ;;  %v846_v42 = vmax.f32 %v6647_v45, %v6650_v20 }
 0x26e   : > { %v6678_v60 = vmul.f32 %v4945_v6, %v423_v32 }
 0x26f   : > { %2170 = vadd.xlane.f32.xlu1 %v2169_v8  ;;  %v3290_v51 = vadd.f32 %v3289_v57, %v2961_v16  ;;  %v6675_v8 = vmul.f32 %v4945_v6, %v422_v23  ;;  %v1041_v23 = vmax.f32 %v6681_v9, %v6684_v54 }
 0x270   : > { %1045 = vmax.xlane.f32.xlu2 %v1044_v50  ;;  %v849_v50 = vmax.f32 %v6653_v31, %v6656_v0 }
 0x271   : > { %v6658_v3 = vpop.eup %4304  ;;  %3585 = vst.msk [vmem:[%s6173_s11 + $0x88] sm:$0xff] %vm3567_vm0, %v3290_v51  ;;  %v1038_v16 = vmax.f32 %v6675_v8, %v6678_v60  ;;  %v292_v51 = vld [vmem:[%s4929_s14 + $0x260] sm:$0xff] }
 0x272   : > { %v6660_v53 = vpop.eup %4306  ;;  %v6693_v32 = vmul.f32 %v4945_v6, %v292_v51 }
 0x273   : > { %v1971_v36 = vadd.f32 %v6660_v53, %v6658_v3 }
 0x274   : > { %8553 = vst [vmem:[#allocation53_spill] sm:$0xff] %v6693_v32 }
 0x275   : > { %1972 = vadd.xlane.f32.xlu0 %v1971_v36  ;;  %v293_v36 = vld [vmem:[%s4929_s14 + $0x268] sm:$0xff] }
 0x277   : > { %847 = vmax.xlane.f32.xlu1 %v846_v42  ;;  %v6696_v42 = vmul.f32 %v4945_v6, %v293_v36 }
 0x278   : > { %850 = vmax.xlane.f32.xlu2 %v849_v50  ;;  %v2156_v57 = vpop.xlane.xlu2 %2155 }
 0x279   : > { %8554 = vst [vmem:[#allocation28_spill] sm:$0xff] %v6696_v42  ;;  %v843_v50 = vmax.f32 %v6693_v32, %v6696_v42 }
 0x27d   : > { %1039 = vmax.xlane.f32.xlu0 %v1038_v16 }
 0x27f   : > { %1042 = vmax.xlane.f32.xlu1 %v1041_v23 }
 0x280   : > { %v6700_v17 = vpop.xlane.xlu2 %1960 }
 0x285   : > { %844 = vmax.xlane.f32.xlu0 %v843_v50 }
 0x288   : > { %v1028_v52 = vpop.xlane.xlu2 %1027 }
 0x289   : > { %v1311_v27 = vsub.f32 %v6316_v5, %v1028_v52  ;;  %v1312_v10 = vsub.f32 %v6319_v38, %v1028_v52 }
 0x28b   : > { %v1765_v21 = vmul.f32 1.442695, %v1311_v27  ;;  %v1767_v16 = vmul.f32 1.442695, %v1312_v10 }
 0x28d   : > { %4308 = vpow2.f32 %v1765_v21 }
 0x28e   : > { %4310 = vpow2.f32 %v1767_v16  ;;  %v431_v16 = vld [vmem:[%s4929_s14 + $0x6b8] sm:$0xff] }
 0x28f   : > { %4312 = vrcp.f32 %v6468_v28 }
 0x290   : > { %v833_v51 = vpop.xlane.xlu2 %832 }
 0x291   : > { %v1181_v36 = vsub.f32 %v6337_v39, %v833_v51  ;;  %v1182_v23 = vsub.f32 %v6341_v37, %v833_v51 }
 0x293   : > { %v6706_v19 = vpop.eup %4308  ;;  %v1505_v42 = vmul.f32 1.442695, %v1181_v36  ;;  %v1507_v32 = vmul.f32 1.442695, %v1182_v23  ;;  %v8559_v36 = vld [vmem:[#allocation46_spill] sm:$0xff] }
 0x294   : > { %8555 = vst [vmem:[#allocation12_spill] sm:$0xff] %v6706_v19  ;;  %v6708_v15 = vpop.eup %4310 }
 0x295   : > { %8556 = vst [vmem:[#allocation57_spill] sm:$0xff] %v6708_v15  ;;  %v1958_v5 = vpop.xlane.xlu1 %1957  ;;  %4314 = vpow2.f32 %v1505_v42  ;;  %v2178_v38 = vadd.f32 %v6708_v15, %v6706_v19  ;;  %v4313_v21 = vpop.eup %4312  ;;  %v430_v42 = vld [vmem:[%s4929_s14 + $0x6b0] sm:$0xff] }
 0x296   : > { %4316 = vpow2.f32 %v1507_v32  ;;  %v2441_v23 = vmul.f32 %v4313_v21, %v8559_v36  ;;  %v8562_v36 = vld [vmem:[#allocation30_spill] sm:$0xff] }
 0x297   : > { %2179 = vadd.xlane.f32.xlu1 %v2178_v38  ;;  %4318 = vrcp.f32 %v1958_v5  ;;  %v8560_v5 = vld [vmem:[#allocation43_spill] sm:$0xff] }
 0x298   : > { %4320 = vrcp.f32 %v2156_v57  ;;  %v2442_v38 = vmul.f32 %v4313_v21, %v8560_v5 }
 0x29a   : > { %v3123_v39 = vpop.f32.mrf.mxu2  ;;  %v3452_v37 = vpop.f32.mrf.mxu3 }
 0x29b   : > { %v3124_v10 = vadd.f32 %v6584_v48, %v3123_v39  ;;  %v6714_v27 = vpop.eup %4314 }
 0x29c   : > { %8557 = vst [vmem:[#allocation58_spill] sm:$0xff] %v6714_v27  ;;  %v6716_v28 = vpop.eup %4316 }
 0x29d   : > { %8558 = vst [vmem:[#allocation61_spill] sm:$0xff] %v6716_v28  ;;  %v3453_v50 = vadd.f32 %v3452_v37, %v3124_v10  ;;  %v2153_v52 = vpop.xlane.xlu1 %2152  ;;  %v4319_v51 = vpop.eup %4318  ;;  %v1983_v32 = vadd.f32 %v6716_v28, %v6714_v27  ;;  %v6729_v37 = vmul.f32 %v4945_v6, %v430_v42  ;;  %v6732_v10 = vmul.f32 %v4945_v6, %v431_v16  ;;  %v301_v27 = vld [vmem:[%s4929_s14 + $0x2a8] sm:$0xff] }
 0x29e   : > { %4322 = vrcp.f32 %v2153_v52  ;;  %v2443_v57 = vmul.f32 %v4319_v51, %v6354_v30  ;;  %v2444_v39 = vmul.f32 %v4319_v51, %v6357_v4  ;;  %v4321_v15 = vpop.eup %4320 }
 0x29f   : > { %3650 = vst.msk [vmem:[%s6173_s11 + $0x290] sm:$0xff] %vm3567_vm0, %v3453_v50  ;;  %1984 = vadd.xlane.f32.xlu1 %v1983_v32  ;;  %v1050_v42 = vmax.f32 %v6729_v37, %v6732_v10  ;;  %v2575_v51 = vmul.f32 %v4321_v15, %v6290_v13 }
 0x2a0   : > { %8561 = vst [vmem:[#allocation62_spill] sm:$0xff] %v6732_v10  ;;  %v2673_v52 = vpack.c.bf16 %v2443_v57, %v2441_v23  ;;  %v2674_v50 = vpack.c.bf16 %v2444_v39, %v2442_v38  ;;  %v8563_v23 = vld [vmem:[#allocation13_spill] sm:$0xff]  ;;  %v8564_v38 = vld [vmem:[#allocation50_spill] sm:$0xff] }
 0x2a1   : > { %v2576_v39 = vmul.f32 %v4321_v15, %v8564_v38 }
 0x2a2   : > { %v3125_v28 = vpop.f32.mrf.mxu2  ;;  %2977 = vmatmul.bf16.gmra.mxu0 %v2673_v52  ;;  %3306 = vmatmul.bf16.gmra.mxu1 %v2674_v50  ;;  %v3454_v4 = vpop.f32.mrf.mxu3  ;;  %v300_v52 = vld [vmem:[%s4929_s14 + $0x2a0] sm:$0xff] }
 0x2a3   : > { %v3126_v30 = vadd.f32 %v6584_v48, %v3125_v28  ;;  %v8565_v28 = vld [vmem:[#allocation10_spill] sm:$0xff] }
 0x2a4   : > { %v4323_v21 = vpop.eup %4322 }
 0x2a5   : > { %v3455_v16 = vadd.f32 %v3454_v4, %v3126_v30  ;;  %v830_v32 = vpop.xlane.xlu1 %829  ;;  %v2573_v5 = vmul.f32 %v4323_v21, %v8562_v36  ;;  %v2574_v57 = vmul.f32 %v4323_v21, %v8563_v23  ;;  %v6748_v4 = vmul.f32 %v4945_v6, %v300_v52  ;;  %v299_v52 = vld [vmem:[%s4929_s14 + $0x298] sm:$0xff] }
 0x2a6   : > { %v1179_v50 = vsub.f32 %v6382_v56, %v830_v32  ;;  %v1180_v19 = vsub.f32 %v8565_v28, %v830_v32  ;;  %v6751_v21 = vmul.f32 %v4945_v6, %v301_v27 }
 0x2a7   : > { %3651 = vst.msk [vmem:[%s6173_s11 + $0x298] sm:$0xff] %vm3567_vm0, %v3455_v16  ;;  %v2739_v43 = vpack.c.bf16 %v2575_v51, %v2573_v5  ;;  %v2740_v10 = vpack.c.bf16 %v2576_v39, %v2574_v57  ;;  %1051 = vmax.xlane.f32.xlu1 %v1050_v42  ;;  %v298_v39 = vld [vmem:[%s4929_s14 + $0x290] sm:$0xff] }
 0x2a8   : > { %v1501_v13 = vmul.f32 1.442695, %v1179_v50  ;;  %v1503_v30 = vmul.f32 1.442695, %v1180_v19  ;;  %v855_v56 = vmax.f32 %v6748_v4, %v6751_v21 }
 0x2a9   : > { %3142 = vmatmul.bf16.gmra.mxu2 %v2739_v43  ;;  %3471 = vmatmul.bf16.gmra.mxu3 %v2740_v10 }
 0x2aa   : > { %4324 = vpow2.f32 %v1501_v13  ;;  %v6779_v13 = vmul.f32 %v4945_v6, %v298_v39 }
 0x2ab   : > { %4326 = vpow2.f32 %v1503_v30  ;;  %v6782_v30 = vmul.f32 %v4945_v6, %v299_v52 }
 0x2ac   : > { %8568 = vst [vmem:[#allocation59_spill] sm:$0xff] %v6779_v13 }
 0x2ad   : > { %v1025_v15 = vpop.xlane.xlu1 %1024  ;;  %8569 = vst [vmem:[#allocation60_spill] sm:$0xff] %v6782_v30 }
 0x2ae   : > { %v1309_v51 = vsub.f32 %v6401_v63, %v1025_v15  ;;  %v1310_v42 = vsub.f32 %v6404_v47, %v1025_v15 }
 0x2af   : > { %856 = vmax.xlane.f32.xlu1 %v855_v56 }
 0x2b0   : > { %v6757_v16 = vpop.eup %4324  ;;  %v1761_v19 = vmul.f32 1.442695, %v1309_v51  ;;  %v1763_v27 = vmul.f32 1.442695, %v1310_v42 }
 0x2b1   : > { %v6759_v32 = vpop.eup %4326  ;;  %v6761_v43 = vpop.xlane.xlu2 %1969 }
 0x2b2   : > { %4328 = vpow2.f32 %v1761_v19  ;;  %v1980_v10 = vadd.f32 %v6759_v32, %v6757_v16  ;;  %v852_v19 = vmax.f32 %v6779_v13, %v6782_v30 }
 0x2b3   : > { %4330 = vpow2.f32 %v1763_v27 }
 0x2b4   : > { %1981 = vadd.xlane.f32.xlu0 %v1980_v10  ;;  %4332 = vrcp.f32 %v6700_v17 }
 0x2b6   : > { %v2963_v63 = vpop.f32.mrf.mxu0  ;;  %v3292_v36 = vpop.f32.mrf.mxu1 }
 0x2b7   : > { %v2964_v47 = vadd.f32 %v6584_v48, %v2963_v63  ;;  %v428_v63 = vld [vmem:[%s4929_s14 + $0x6a0] sm:$0xff] }
 0x2b8   : > { %v6766_v5 = vpop.eup %4328 }
 0x2b9   : > { %8566 = vst [vmem:[#allocation63_spill] sm:$0xff] %v6766_v5  ;;  %v2162_v23 = vpop.xlane.xlu1 %2161  ;;  %v6768_v57 = vpop.eup %4330  ;;  %v3293_v38 = vadd.f32 %v3292_v36, %v2964_v47  ;;  %v429_v47 = vld [vmem:[%s4929_s14 + $0x6a8] sm:$0xff] }
 0x2ba   : > { %8567 = vst [vmem:[#allocation64_spill] sm:$0xff] %v6768_v57  ;;  %v2175_v28 = vadd.f32 %v6768_v57, %v6766_v5 }
 0x2bb   : > { %v6772_v50 = vpop.xlane.xlu2 %2164  ;;  %3586 = vst.msk [vmem:[%s6173_s11 + $0x90] sm:$0xff] %vm3567_vm0, %v3293_v38  ;;  %v4333_v38 = vpop.eup %4332 }
 0x2bc   : > { %2176 = vadd.xlane.f32.xlu0 %v2175_v28  ;;  %v6795_v28 = vmul.f32 %v4945_v6, %v428_v63 }
 0x2be   : > { %v2965_v56 = vpop.f32.mrf.mxu0  ;;  %v3294_v51 = vpop.f32.mrf.mxu1 }
 0x2bf   : > { %v2966_v15 = vadd.f32 %v6584_v48, %v2965_v56  ;;  %v6798_v56 = vmul.f32 %v4945_v6, %v429_v47 }
 0x2c0   : > { %v1964_v42 = vpop.xlane.xlu0 %1963 }
 0x2c1   : > { %4334 = vrcp.f32 %v1964_v42  ;;  %v3295_v10 = vadd.f32 %v3294_v51, %v2966_v15 }
 0x2c2   : > { %v1967_v27 = vpop.xlane.xlu1 %1966  ;;  %4336 = vrcp.f32 %v2162_v23  ;;  %v8571_v23 = vld [vmem:[#allocation29_spill] sm:$0xff] }
 0x2c3   : > { %v842_v36 = vpop.xlane.xlu2 %841  ;;  %3587 = vst.msk [vmem:[%s6173_s11 + $0x98] sm:$0xff] %vm3567_vm0, %v3295_v10 }
 0x2c4   : > { %v1187_v39 = vsub.f32 %v6471_v62, %v842_v36  ;;  %v1188_v17 = vsub.f32 %v6474_v26, %v842_v36  ;;  %853 = vmax.xlane.f32.xlu0 %v852_v19  ;;  %v8570_v62 = vld [vmem:[#allocation51_spill] sm:$0xff] }
 0x2c5   : > { %v3128_v52 = vpop.f32.mrf.mxu2  ;;  %v2445_v57 = vmul.f32 %v4333_v38, %v8570_v62 }
 0x2c6   : > { %v1517_v15 = vmul.f32 1.442695, %v1187_v39  ;;  %v1519_v51 = vmul.f32 1.442695, %v1188_v17  ;;  %v3129_v42 = vadd.f32 %v6584_v48, %v3128_v52  ;;  %v3457_v10 = vpop.f32.mrf.mxu3  ;;  %v2968_v13 = vpop.f32.mrf.mxu0  ;;  %v2446_v39 = vmul.f32 %v4333_v38, %v8571_v23 }
 0x2c7   : > { %v4335_v30 = vpop.eup %4334  ;;  %v2969_v19 = vadd.f32 %v6584_v48, %v2968_v13  ;;  %v3297_v63 = vpop.f32.mrf.mxu1  ;;  %v1047_v52 = vmax.f32 %v6795_v28, %v6798_v56 }
 0x2c8   : > { %4338 = vpow2.f32 %v1517_v15  ;;  %v3458_v26 = vadd.f32 %v3457_v10, %v3129_v42  ;;  %v2159_v36 = vpop.xlane.xlu0 %2158  ;;  %v2447_v47 = vmul.f32 %v4335_v30, %v6476_v34  ;;  %v2448_v17 = vmul.f32 %v4335_v30, %v6478_v58 }
 0x2c9   : > { %4340 = vpow2.f32 %v1519_v51  ;;  %v3298_v15 = vadd.f32 %v3297_v63, %v2969_v19  ;;  %v4337_v51 = vpop.eup %4336 }
 0x2ca   : > { %3652 = vst.msk [vmem:[%s6173_s11 + $0x2a0] sm:$0xff] %vm3567_vm0, %v3458_v26  ;;  %v1034_v62 = vpop.xlane.xlu1 %1033  ;;  %4342 = vrcp.f32 %v2159_v36  ;;  %v2675_v42 = vpack.c.bf16 %v2447_v47, %v2445_v57  ;;  %v2676_v34 = vpack.c.bf16 %v2448_v17, %v2446_v39 }
 0x2cb   : > { %v1315_v13 = vsub.f32 %v6499_v59, %v1034_v62  ;;  %v1316_v10 = vsub.f32 %v6502_v35, %v1034_v62  ;;  %v1037_v5 = vpop.xlane.xlu2 %1036  ;;  %3588 = vst.msk [vmem:[%s6173_s11 + $0xa0] sm:$0xff] %vm3567_vm0, %v3298_v15  ;;  %4344 = vrcp.f32 %v1967_v27 }
 0x2cc   : > { %v1317_v58 = vsub.f32 %v6509_v46, %v1037_v5  ;;  %v1318_v30 = vsub.f32 %v6512_v55, %v1037_v5  ;;  %2982 = vmatmul.bf16.gmra.mxu0 %v2675_v42  ;;  %3311 = vmatmul.bf16.gmra.mxu1 %v2676_v34  ;;  %4346 = vrcp.f32 %v6761_v43  ;;  %v2579_v5 = vmul.f32 %v4337_v51, %v6441_v40 }
 0x2cd   : > { %v1773_v38 = vmul.f32 1.442695, %v1315_v13  ;;  %v1775_v26 = vmul.f32 1.442695, %v1316_v10  ;;  %1048 = vmax.xlane.f32.xlu0 %v1047_v52  ;;  %v3130_v57 = vpop.f32.mrf.mxu2  ;;  %v2580_v10 = vmul.f32 %v4337_v51, %v6445_v29 }
 0x2ce   : > { %v6816_v19 = vpop.eup %4338  ;;  %v1777_v59 = vmul.f32 1.442695, %v1317_v58  ;;  %v1779_v35 = vmul.f32 1.442695, %v1318_v30  ;;  %v3131_v63 = vadd.f32 %v6584_v48, %v3130_v57  ;;  %v3459_v46 = vpop.f32.mrf.mxu3 }
 0x2cf   : > { %8572 = vst [vmem:[#allocation11_spill] sm:$0xff] %v6816_v19  ;;  %v6820_v36 = vpop.eup %4340  ;;  %4348 = vpow2.f32 %v1773_v38  ;;  %v2970_v55 = vpop.f32.mrf.mxu0 }
 0x2d0   : > { %8573 = vst [vmem:[#allocation23_spill] sm:$0xff] %v6820_v36  ;;  %v4343_v27 = vpop.eup %4342  ;;  %4350 = vpow2.f32 %v1775_v26  ;;  %v3460_v47 = vadd.f32 %v3459_v46, %v3131_v63  ;;  %v1992_v23 = vadd.f32 %v6820_v36, %v6816_v19  ;;  %v2971_v43 = vadd.f32 %v6584_v48, %v2970_v55  ;;  %v836_v39 = vpop.xlane.xlu0 %835  ;;  %v8575_v63 = vld [vmem:[#allocation48_spill] sm:$0xff]  ;;  %v432_v19 = vld [vmem:[%s4929_s14 + $0x6c0] sm:$0xff] }
 0x2d1   : > { %4352 = vpow2.f32 %v1777_v59  ;;  %v3299_v17 = vpop.f32.mrf.mxu1  ;;  %v1183_v52 = vsub.f32 %v6526_v7, %v836_v39  ;;  %v1184_v62 = vsub.f32 %v6534_v11, %v836_v39  ;;  %v2577_v15 = vmul.f32 %v4343_v27, %v6515_v41  ;;  %v4345_v34 = vpop.eup %4344  ;;  %v306_v55 = vld [vmem:[%s4929_s14 + $0x2d0] sm:$0xff] }
 0x2d2   : > { %4354 = vpow2.f32 %v1779_v35  ;;  %3653 = vst.msk [vmem:[%s6173_s11 + $0x2a8] sm:$0xff] %vm3567_vm0, %v3460_v47  ;;  %1993 = vadd.xlane.f32.xlu1 %v1992_v23  ;;  %v839_v40 = vpop.xlane.xlu1 %838  ;;  %v3300_v42 = vadd.f32 %v3299_v17, %v2971_v43  ;;  %v2578_v13 = vmul.f32 %v4343_v27, %v6519_v24  ;;  %v4347_v41 = vpop.eup %4346  ;;  %v2450_v46 = vmul.f32 %v4345_v34, %v8575_v63  ;;  %v8577_v47 = vld [vmem:[#allocation22_spill] sm:$0xff]  ;;  %v307_v43 = vld [vmem:[%s4929_s14 + $0x2d8] sm:$0xff] }
 0x2d3   : > { %v1185_v58 = vsub.f32 %v6543_v33, %v839_v40  ;;  %v1186_v7 = vsub.f32 %v6552_v18, %v839_v40  ;;  %v6835_v30 = vpop.xlane.xlu2 %2173  ;;  %v1509_v11 = vmul.f32 1.442695, %v1183_v52  ;;  %v1511_v38 = vmul.f32 1.442695, %v1184_v62  ;;  %v8578_v52 = vld [vmem:[#allocation20_spill] sm:$0xff] }
 0x2d4   : > { %3589 = vst.msk [vmem:[%s6173_s11 + $0xa8] sm:$0xff] %vm3567_vm0, %v3300_v42  ;;  %v2741_v26 = vpack.c.bf16 %v2579_v5, %v2577_v15  ;;  %v2742_v57 = vpack.c.bf16 %v2580_v10, %v2578_v13  ;;  %v2449_v33 = vmul.f32 %v4345_v34, %v6481_v12  ;;  %v2451_v23 = vmul.f32 %v4347_v41, %v8577_v47 }
 0x2d5   : > { %v6839_v59 = vpop.eup %4348  ;;  %v1513_v24 = vmul.f32 1.442695, %v1185_v58  ;;  %v1515_v35 = vmul.f32 1.442695, %v1186_v7  ;;  %4356 = vpow2.f32 %v1509_v11  ;;  %v2452_v62 = vmul.f32 %v4347_v41, %v8578_v52 }
 0x2d6   : > { %v6841_v29 = vpop.eup %4350  ;;  %4358 = vpow2.f32 %v1511_v38  ;;  %3147 = vmatmul.bf16.gmra.mxu2 %v2741_v26  ;;  %3476 = vmatmul.bf16.gmra.mxu3 %v2742_v57  ;;  %v2677_v40 = vpack.c.bf16 %v2451_v23, %v2449_v33  ;;  %v6862_v42 = vmul.f32 %v4945_v6, %v306_v55  ;;  %v435_v33 = vld [vmem:[%s4929_s14 + $0x6d8] sm:$0xff]  ;;  %v436_v23 = vld [vmem:[%s4929_s14 + $0x6e0] sm:$0xff] }
 0x2d7   : > { %v6844_v18 = vpop.eup %4352  ;;  %4360 = vpow2.f32 %v1513_v24  ;;  %v2184_v51 = vadd.f32 %v6841_v29, %v6839_v59 }
 0x2d8   : > { %8574 = vst [vmem:[#allocation25_spill] sm:$0xff] %v6844_v18  ;;  %v6850_v5 = vpop.eup %4354  ;;  %4362 = vpow2.f32 %v1515_v35  ;;  %v1031_v27 = vpop.xlane.xlu0 %1030  ;;  %v434_v35 = vld [vmem:[%s4929_s14 + $0x6d0] sm:$0xff] }
 0x2d9   : > { %8576 = vst [vmem:[#allocation65_spill] sm:$0xff] %v6850_v5  ;;  %2185 = vadd.xlane.f32.xlu0 %v2184_v51  ;;  %v2187_v12 = vadd.f32 %v6850_v5, %v6844_v18  ;;  %v1313_v39 = vsub.f32 %v6573_v14, %v1031_v27  ;;  %v1314_v17 = vsub.f32 %v6579_v44, %v1031_v27  ;;  %4364 = vrcp.f32 %v6772_v50 }
 0x2da   : > { %v6859_v15 = vpop.xlane.xlu1 %1975  ;;  %v2678_v14 = vpack.c.bf16 %v2452_v62, %v2450_v46  ;;  %v6869_v44 = vmul.f32 %v4945_v6, %v307_v43  ;;  %v437_v43 = vld [vmem:[%s4929_s14 + $0x6e8] sm:$0xff] }
 0x2db   : > { %v6864_v13 = vpop.eup %4356  ;;  %2188 = vadd.xlane.f32.xlu1 %v2187_v12  ;;  %v6866_v10 = vpop.xlane.xlu2 %1978  ;;  %v1769_v34 = vmul.f32 1.442695, %v1313_v39  ;;  %v1771_v58 = vmul.f32 1.442695, %v1314_v17  ;;  %v6891_v12 = vmul.f32 %v4945_v6, %v434_v35  ;;  %v6894_v39 = vmul.f32 %v4945_v6, %v435_v33 }
 0x2dc   : > { %v6871_v7 = vpop.eup %4358  ;;  %2987 = vmatmul.bf16.gmra.mxu0 %v2677_v40  ;;  %3316 = vmatmul.bf16.gmra.mxu1 %v2678_v14  ;;  %v864_v51 = vmax.f32 %v6862_v42, %v6869_v44  ;;  %v302_v40 = vld [vmem:[%s4929_s14 + $0x2b0] sm:$0xff]  ;;  %v6902_v14 = vmul.f32 %v4945_v6, %v436_v23  ;;  %v304_v23 = vld [vmem:[%s4929_s14 + $0x2c0] sm:$0xff] }
 0x2dd   : > { %v6874_v11 = vpop.eup %4360  ;;  %4366 = vpow2.f32 %v1769_v34  ;;  %v3133_v38 = vpop.f32.mrf.mxu2  ;;  %v1986_v41 = vadd.f32 %v6871_v7, %v6864_v13  ;;  %v1056_v33 = vmax.f32 %v6891_v12, %v6894_v39 }
 0x2de   : > { %v6878_v26 = vpop.eup %4362  ;;  %4368 = vpow2.f32 %v1771_v58  ;;  %v3134_v57 = vadd.f32 %v6584_v48, %v3133_v38  ;;  %v3462_v24 = vpop.f32.mrf.mxu3  ;;  %v6905_v38 = vmul.f32 %v4945_v6, %v437_v43 }
 0x2df   : > { %8579 = vst [vmem:[#allocation66_spill] sm:$0xff] %v6878_v26  ;;  %v1989_v50 = vadd.f32 %v6878_v26, %v6874_v11  ;;  %1987 = vadd.xlane.f32.xlu2 %v1986_v41  ;;  %v2973_v63 = vpop.f32.mrf.mxu0  ;;  %v3302_v46 = vpop.f32.mrf.mxu1  ;;  %v303_v41 = vld [vmem:[%s4929_s14 + $0x2b8] sm:$0xff]  ;;  %v6937_v26 = vmul.f32 %v4945_v6, %v304_v23 }
 0x2e0   : > { %v3463_v55 = vadd.f32 %v3462_v24, %v3134_v57  ;;  %v2974_v27 = vadd.f32 %v6584_v48, %v2973_v63  ;;  %v2168_v47 = vpop.xlane.xlu0 %2167  ;;  %v4365_v17 = vpop.eup %4364  ;;  %v6919_v63 = vmul.f32 %v4945_v6, %v302_v40 }
 0x2e1   : > { %1990 = vadd.xlane.f32.xlu0 %v1989_v50  ;;  %4370 = vrcp.f32 %v2168_v47 }
 0x2e2   : > { %3654 = vst.msk [vmem:[%s6173_s11 + $0x2b0] sm:$0xff] %vm3567_vm0, %v3463_v55  ;;  %v2171_v52 = vpop.xlane.xlu1 %2170  ;;  %v3303_v62 = vadd.f32 %v3302_v46, %v2974_v27  ;;  %4372 = vrcp.f32 %v6859_v15 }
 0x2e3   : > { %v6899_v34 = vpop.eup %4366  ;;  %865 = vmax.xlane.f32.xlu1 %v864_v51  ;;  %v1046_v58 = vpop.xlane.xlu2 %1045 }
 0x2e4   : > { %v6908_v57 = vpop.eup %4368  ;;  %3590 = vst.msk [vmem:[%s6173_s11 + $0xb0] sm:$0xff] %vm3567_vm0, %v3303_v62  ;;  %v1323_v24 = vsub.f32 %v6618_v49, %v1046_v58  ;;  %v1324_v35 = vsub.f32 %v6621_v61, %v1046_v58  ;;  %v305_v49 = vld [vmem:[%s4929_s14 + $0x2c8] sm:$0xff]  ;;  %v6925_v61 = vmul.f32 %v4945_v6, %v303_v41  ;;  %v1059_v62 = vmax.f32 %v6902_v14, %v6905_v38 }
 0x2e5   : > { %v3135_v50 = vpop.f32.mrf.mxu2  ;;  %v2181_v51 = vadd.f32 %v6908_v57, %v6899_v34  ;;  %v8580_v58 = vld [vmem:[#allocation19_spill] sm:$0xff] }
 0x2e6   : > { %v1789_v46 = vmul.f32 1.442695, %v1323_v24  ;;  %v1791_v55 = vmul.f32 1.442695, %v1324_v35  ;;  %v3136_v27 = vadd.f32 %v6584_v48, %v3135_v50  ;;  %v3464_v47 = vpop.f32.mrf.mxu3  ;;  %v2581_v24 = vmul.f32 %v4365_v17, %v8580_v58  ;;  %v8581_v35 = vld [vmem:[#allocation17_spill] sm:$0xff] }
 0x2e7   : > { %v4371_v43 = vpop.eup %4370  ;;  %2182 = vadd.xlane.f32.xlu2 %v2181_v51  ;;  %v2975_v40 = vpop.f32.mrf.mxu0  ;;  %v2582_v50 = vmul.f32 %v4365_v17, %v8581_v35  ;;  %v6940_v58 = vmul.f32 %v4945_v6, %v305_v49  ;;  %v433_v17 = vld [vmem:[%s4929_s14 + $0x6c8] sm:$0xff]  ;;  %v6950_v49 = vmul.f32 %v4945_v6, %v432_v19 }
 0x2e8   : > { %4374 = vpow2.f32 %v1789_v46  ;;  %v3465_v5 = vadd.f32 %v3464_v47, %v3136_v27  ;;  %v2976_v18 = vadd.f32 %v6584_v48, %v2975_v40  ;;  %v1973_v41 = vpop.xlane.xlu0 %1972  ;;  %v2583_v36 = vmul.f32 %v4371_v43, %v6623_v1  ;;  %v3304_v15 = vpop.f32.mrf.mxu1 }
 0x2e9   : > { %4376 = vpow2.f32 %v1791_v55  ;;  %1057 = vmax.xlane.f32.xlu0 %v1056_v33  ;;  %v2584_v51 = vmul.f32 %v4371_v43, %v6625_v2  ;;  %v858_v33 = vmax.f32 %v6919_v63, %v6925_v61  ;;  %v4373_v43 = vpop.eup %4372 }
 0x2ea   : > { %3655 = vst.msk [vmem:[%s6173_s11 + $0x2b8] sm:$0xff] %vm3567_vm0, %v3465_v5  ;;  %v848_v46 = vpop.xlane.xlu1 %847  ;;  %v3305_v27 = vadd.f32 %v3304_v15, %v2976_v18  ;;  %4378 = vrcp.f32 %v1973_v41  ;;  %v2743_v1 = vpack.c.bf16 %v2583_v36, %v2581_v24  ;;  %v6957_v36 = vmul.f32 %v4945_v6, %v433_v17 }
 0x2eb   : > { %1060 = vmax.xlane.f32.xlu1 %v1059_v62  ;;  %v1191_v2 = vsub.f32 %v6647_v45, %v848_v46  ;;  %v1192_v55 = vsub.f32 %v6650_v20, %v848_v46  ;;  %v851_v47 = vpop.xlane.xlu2 %850  ;;  %v2744_v23 = vpack.c.bf16 %v2584_v51, %v2582_v50  ;;  %4380 = vrcp.f32 %v2171_v52 }
 0x2ec   : > { %3591 = vst.msk [vmem:[%s6173_s11 + $0xb8] sm:$0xff] %vm3567_vm0, %v3305_v27  ;;  %v1193_v5 = vsub.f32 %v6653_v31, %v851_v47  ;;  %v1194_v18 = vsub.f32 %v6656_v0, %v851_v47  ;;  %3152 = vmatmul.bf16.gmra.mxu2 %v2743_v1  ;;  %v861_v20 = vmax.f32 %v6937_v26, %v6940_v58  ;;  %4382 = vrcp.f32 %v6835_v30 }
 0x2ed   : > { %v1525_v45 = vmul.f32 1.442695, %v1191_v2  ;;  %v1527_v62 = vmul.f32 1.442695, %v1192_v55  ;;  %3481 = vmatmul.bf16.gmra.mxu3 %v2744_v23  ;;  %v3138_v19 = vpop.f32.mrf.mxu2  ;;  %v1053_v30 = vmax.f32 %v6950_v49, %v6957_v36  ;;  %v2456_v55 = vmul.f32 %v4373_v43, %v6595_v25 }
 0x2ee   : > { %v6961_v40 = vpop.eup %4374  ;;  %v1529_v31 = vmul.f32 1.442695, %v1193_v5  ;;  %v1531_v24 = vmul.f32 1.442695, %v1194_v18  ;;  %v3139_v0 = vadd.f32 %v6584_v48, %v3138_v19  ;;  %v3467_v35 = vpop.f32.mrf.mxu3 }
 0x2ef   : > { %8582 = vst [vmem:[#allocation55_spill] sm:$0xff] %v6961_v40  ;;  %v6965_v50 = vpop.eup %4376  ;;  %4384 = vpow2.f32 %v1525_v45  ;;  %859 = vmax.xlane.f32.xlu2 %v858_v33  ;;  %v2455_v33 = vmul.f32 %v4373_v43, %v6593_v22 }
 0x2f0   : > { %8583 = vst [vmem:[#allocation14_spill] sm:$0xff] %v6965_v50  ;;  %v4379_v52 = vpop.eup %4378  ;;  %4386 = vpow2.f32 %v1527_v62  ;;  %v3468_v41 = vadd.f32 %v3467_v35, %v3139_v0  ;;  %v2196_v15 = vadd.f32 %v6965_v50, %v6961_v40  ;;  %v1040_v51 = vpop.xlane.xlu0 %1039  ;;  %v8586_v0 = vld [vmem:[#allocation52_spill] sm:$0xff]  ;;  %v317_v50 = vld [vmem:[%s4929_s14 + $0x328] sm:$0xff] }
 0x2f1   : > { %4388 = vpow2.f32 %v1529_v31  ;;  %862 = vmax.xlane.f32.xlu0 %v861_v20  ;;  %v1319_v17 = vsub.f32 %v6675_v8, %v1040_v51  ;;  %v1320_v46 = vsub.f32 %v6678_v60, %v1040_v51  ;;  %v2453_v27 = vmul.f32 %v4379_v52, %v6658_v3  ;;  %v4381_v47 = vpop.eup %4380 }
 0x2f2   : > { %4390 = vpow2.f32 %v1531_v24  ;;  %3656 = vst.msk [vmem:[%s6173_s11 + $0x2c0] sm:$0xff] %vm3567_vm0, %v3468_v41  ;;  %v1043_v1 = vpop.xlane.xlu1 %1042  ;;  %v2454_v2 = vmul.f32 %v4379_v52, %v6660_v53  ;;  %v4383_v18 = vpop.eup %4382  ;;  %v2586_v35 = vmul.f32 %v4381_v47, %v8586_v0  ;;  %v442_v52 = vld [vmem:[%s4929_s14 + $0x710] sm:$0xff]  ;;  %v312_v0 = vld [vmem:[%s4929_s14 + $0x300] sm:$0xff] }
 0x2f3   : > { %2197 = vadd.xlane.f32.xlu1 %v2196_v15  ;;  %v1321_v23 = vsub.f32 %v6681_v9, %v1043_v1  ;;  %v1322_v8 = vsub.f32 %v6684_v54, %v1043_v1  ;;  %v1781_v5 = vmul.f32 1.442695, %v1319_v17  ;;  %v1783_v60 = vmul.f32 1.442695, %v1320_v46  ;;  %v8584_v9 = vld [vmem:[#allocation54_spill] sm:$0xff]  ;;  %v443_v46 = vld [vmem:[%s4929_s14 + $0x718] sm:$0xff] }
 0x2f4   : > { %v2679_v3 = vpack.c.bf16 %v2455_v33, %v2453_v27  ;;  %v2680_v45 = vpack.c.bf16 %v2456_v55, %v2454_v2  ;;  %v2585_v54 = vmul.f32 %v4381_v47, %v8584_v9  ;;  %v8589_v1 = vld [vmem:[#allocation53_spill] sm:$0xff]  ;;  %v8590_v2 = vld [vmem:[#allocation28_spill] sm:$0xff] }
 0x2f5   : > { %v6981_v62 = vpop.eup %4384  ;;  %v1785_v20 = vmul.f32 1.442695, %v1321_v23  ;;  %v1787_v22 = vmul.f32 1.442695, %v1322_v8  ;;  %4392 = vpow2.f32 %v1781_v5  ;;  %v3140_v53 = vpop.f32.mrf.mxu2  ;;  %v7005_v8 = vmul.f32 %v4945_v6, %v442_v52  ;;  %v310_v9 = vld [vmem:[%s4929_s14 + $0x2f0] sm:$0xff] }
 0x2f6   : > { %v6983_v19 = vpop.eup %4386  ;;  %4394 = vpow2.f32 %v1783_v60  ;;  %2992 = vmatmul.bf16.gmra.mxu0 %v2679_v3  ;;  %3321 = vmatmul.bf16.gmra.mxu1 %v2680_v45  ;;  %v3141_v25 = vadd.f32 %v6584_v48, %v3140_v53  ;;  %v3469_v24 = vpop.f32.mrf.mxu3  ;;  %v8588_v48 = vld [vmem:[#allocation49_spill] sm:$0xff]  ;;  %v7029_v52 = vmul.f32 %v4945_v6, %v310_v9 }
 0x2f7   : > { %v6987_v43 = vpop.eup %4388  ;;  %4396 = vpow2.f32 %v1785_v20  ;;  %v1998_v31 = vadd.f32 %v6983_v19, %v6981_v62  ;;  %1054 = vmax.xlane.f32.xlu2 %v1053_v30  ;;  %v2587_v17 = vmul.f32 %v4383_v18, %v8588_v48  ;;  %v8591_v30 = vld [vmem:[#allocation41_spill] sm:$0xff]  ;;  %v7010_v20 = vmul.f32 %v4945_v6, %v443_v46 }
 0x2f8   : > { %8585 = vst [vmem:[#allocation15_spill] sm:$0xff] %v6987_v43  ;;  %v6993_v41 = vpop.eup %4390  ;;  %4398 = vpow2.f32 %v1787_v22  ;;  %v3470_v15 = vadd.f32 %v3469_v24, %v3141_v25  ;;  %v845_v51 = vpop.xlane.xlu0 %844  ;;  %v2588_v23 = vmul.f32 %v4383_v18, %v8591_v30  ;;  %v7037_v48 = vmul.f32 %v4945_v6, %v312_v0  ;;  %v441_v30 = vld [vmem:[%s4929_s14 + $0x708] sm:$0xff] }
 0x2f9   : > { %8587 = vst [vmem:[#allocation16_spill] sm:$0xff] %v6993_v41  ;;  %1999 = vadd.xlane.f32.xlu0 %v1998_v31  ;;  %v2001_v27 = vadd.f32 %v6993_v41, %v6987_v43  ;;  %v1189_v33 = vsub.f32 %v8589_v1, %v845_v51  ;;  %v1190_v55 = vsub.f32 %v8590_v2, %v845_v51  ;;  %v439_v1 = vld [vmem:[%s4929_s14 + $0x6f8] sm:$0xff] }
 0x2fa   : > { %3657 = vst.msk [vmem:[%s6173_s11 + $0x2c8] sm:$0xff] %vm3567_vm0, %v3470_v15  ;;  %v2745_v47 = vpack.c.bf16 %v2587_v17, %v2585_v54  ;;  %v2746_v45 = vpack.c.bf16 %v2588_v23, %v2586_v35  ;;  %v311_v54 = vld [vmem:[%s4929_s14 + $0x2f8] sm:$0xff]  ;;  %v1068_v24 = vmax.f32 %v7005_v8, %v7010_v20  ;;  %v313_v35 = vld [vmem:[%s4929_s14 + $0x308] sm:$0xff] }
 0x2fb   : > { %v7007_v5 = vpop.eup %4392  ;;  %2002 = vadd.xlane.f32.xlu1 %v2001_v27  ;;  %v1521_v60 = vmul.f32 1.442695, %v1189_v33  ;;  %v1523_v3 = vmul.f32 1.442695, %v1190_v55  ;;  %v7032_v15 = vmul.f32 %v4945_v6, %v311_v54  ;;  %v7040_v17 = vmul.f32 %v4945_v6, %v313_v35  ;;  %v438_v27 = vld [vmem:[%s4929_s14 + $0x6f0] sm:$0xff]  ;;  %v440_v55 = vld [vmem:[%s4929_s14 + $0x700] sm:$0xff] }
 0x2fc   : > { %v7012_v18 = vpop.eup %4394  ;;  %3157 = vmatmul.bf16.gmra.mxu2 %v2745_v47  ;;  %v7055_v47 = vmul.f32 %v4945_v6, %v438_v27  ;;  %v308_v54 = vld [vmem:[%s4929_s14 + $0x2e0] sm:$0xff] }
 0x2fd   : > { %v7014_v22 = vpop.eup %4396  ;;  %4400 = vpow2.f32 %v1521_v60  ;;  %3486 = vmatmul.bf16.gmra.mxu3 %v2746_v45  ;;  %v2190_v53 = vadd.f32 %v7012_v18, %v7007_v5  ;;  %v870_v33 = vmax.f32 %v7029_v52, %v7032_v15  ;;  %v873_v23 = vmax.f32 %v7037_v48, %v7040_v17 }
 0x2fe   : > { %v7018_v25 = vpop.eup %4398  ;;  %4402 = vpow2.f32 %v1523_v3  ;;  %v7058_v60 = vmul.f32 %v4945_v6, %v439_v1  ;;  %v7061_v3 = vmul.f32 %v4945_v6, %v440_v55  ;;  %v7064_v45 = vmul.f32 %v4945_v6, %v441_v30  ;;  %v8595_v55 = vld [vmem:[#allocation62_spill] sm:$0xff] }
 0x2ff   : > { %8592 = vst [vmem:[#allocation18_spill] sm:$0xff] %v7018_v25  ;;  %v2193_v31 = vadd.f32 %v7018_v25, %v7014_v22  ;;  %2191 = vadd.xlane.f32.xlu2 %v2190_v53  ;;  %v7073_v0 = vmul.f32 %v4945_v6, %v308_v54 }
 0x300   : > { %v1062_v53 = vmax.f32 %v7055_v47, %v7058_v60 }
 0x301   : > { %2194 = vadd.xlane.f32.xlu0 %v2193_v31  ;;  %v309_v31 = vld [vmem:[%s4929_s14 + $0x2e8] sm:$0xff]  ;;  %8593 = vst [vmem:[#allocation31_spill] sm:$0xff] %v7073_v0 }
 0x302   : > { %v7076_v35 = vmul.f32 %v4945_v6, %v309_v31  ;;  %v7084_v31 = vld [vmem:[#allocation6] ss:$0 sm:$0xff] }
 0x303   : > { %v7034_v51 = vpop.eup %4400  ;;  %1069 = vmax.xlane.f32.xlu1 %v1068_v24  ;;  %v1065_v24 = vmax.f32 %v7061_v3, %v7064_v45 }
 0x304   : > { %v7042_v46 = vpop.eup %4402  ;;  %8594 = vst [vmem:[#allocation56_spill] sm:$0xff] %v7076_v35  ;;  %v867_v27 = vmax.f32 %v7073_v0, %v7076_v35 }
 0x305   : > { %v1995_v2 = vadd.f32 %v7042_v46, %v7034_v51 }
 0x307   : > { %1996 = vadd.xlane.f32.xlu2 %v1995_v2 }
 0x309   : > { %871 = vmax.xlane.f32.xlu0 %v870_v33 }
 0x30a   : > { %v2180_v9 = vpop.xlane.xlu1 %2179 }
 0x30b   : > { %874 = vmax.xlane.f32.xlu1 %v873_v23 }
 0x30f   : > { %1063 = vmax.xlane.f32.xlu2 %v1062_v53 }
 0x311   : > { %1066 = vmax.xlane.f32.xlu0 %v1065_v24 }
 0x312   : > { %v7080_v1 = vpop.xlane.xlu1 %1984 }
 0x317   : > { %868 = vmax.xlane.f32.xlu2 %v867_v27 }
 0x31a   : > { %v1052_v33 = vpop.xlane.xlu1 %1051 }
 0x31b   : > { %v1327_v2 = vsub.f32 %v6729_v37, %v1052_v33  ;;  %v1328_v30 = vsub.f32 %v8595_v55, %v1052_v33 }
 0x31d   : > { %v1797_v23 = vmul.f32 1.442695, %v1327_v2  ;;  %v1799_v53 = vmul.f32 1.442695, %v1328_v30 }
 0x31f   : > { %4404 = vpow2.f32 %v1797_v23  ;;  %v2978_v54 = vpop.f32.mrf.mxu0  ;;  %v3307_v41 = vpop.f32.mrf.mxu1 }
 0x320   : > { %4406 = vpow2.f32 %v1799_v53  ;;  %v2979_v24 = vadd.f32 %v7084_v31, %v2978_v54 }
 0x321   : > { %4408 = vrcp.f32 %v6866_v10 }
 0x322   : > { %v857_v43 = vpop.xlane.xlu1 %856  ;;  %v3308_v35 = vadd.f32 %v3307_v41, %v2979_v24 }
 0x323   : > { %v1197_v27 = vsub.f32 %v6748_v4, %v857_v43  ;;  %v1198_v0 = vsub.f32 %v6751_v21, %v857_v43 }
 0x324   : > { %3592 = vst.msk [vmem:[%s6173_s11 + $0xc0] sm:$0xff] %vm3567_vm0, %v3308_v35 }
 0x325   : > { %v7091_v37 = vpop.eup %4404  ;;  %v1537_v33 = vmul.f32 1.442695, %v1197_v27  ;;  %v1539_v2 = vmul.f32 1.442695, %v1198_v0 }
 0x326   : > { %8596 = vst [vmem:[#allocation21_spill] sm:$0xff] %v7091_v37  ;;  %v7093_v55 = vpop.eup %4406 }
 0x327   : > { %8597 = vst [vmem:[#allocation35_spill] sm:$0xff] %v7093_v55  ;;  %v1982_v30 = vpop.xlane.xlu0 %1981  ;;  %4410 = vpow2.f32 %v1537_v33  ;;  %v2202_v41 = vadd.f32 %v7093_v55, %v7091_v37  ;;  %v2980_v23 = vpop.f32.mrf.mxu0 }
 0x328   : > { %4412 = vpow2.f32 %v1539_v2  ;;  %v2981_v4 = vadd.f32 %v7084_v31, %v2980_v23  ;;  %v3309_v21 = vpop.f32.mrf.mxu1  ;;  %v4409_v53 = vpop.eup %4408  ;;  %v446_v2 = vld [vmem:[%s4929_s14 + $0x730] sm:$0xff] }
 0x329   : > { %2203 = vadd.xlane.f32.xlu0 %v2202_v41  ;;  %4414 = vrcp.f32 %v1982_v30  ;;  %v447_v41 = vld [vmem:[%s4929_s14 + $0x738] sm:$0xff] }
 0x32a   : > { %v3310_v43 = vadd.f32 %v3309_v21, %v2981_v4  ;;  %4416 = vrcp.f32 %v2180_v9  ;;  %v8600_v9 = vld [vmem:[#allocation42_spill] sm:$0xff] }
 0x32b   : > { %v2457_v4 = vmul.f32 %v4409_v53, %v8600_v9 }
 0x32c   : > { %v3143_v0 = vpop.f32.mrf.mxu2  ;;  %v3472_v35 = vpop.f32.mrf.mxu3  ;;  %3593 = vst.msk [vmem:[%s6173_s11 + $0xc8] sm:$0xff] %vm3567_vm0, %v3310_v43  ;;  %v8601_v43 = vld [vmem:[#allocation26_spill] sm:$0xff] }
 0x32d   : > { %v3144_v10 = vadd.f32 %v7084_v31, %v3143_v0  ;;  %v7102_v54 = vpop.eup %4410  ;;  %v2458_v0 = vmul.f32 %v4409_v53, %v8601_v43  ;;  %v8605_v43 = vld [vmem:[#allocation63_spill] sm:$0xff] }
 0x32e   : > { %8598 = vst [vmem:[#allocation36_spill] sm:$0xff] %v7102_v54  ;;  %v7104_v24 = vpop.eup %4412 }
 0x32f   : > { %8599 = vst [vmem:[#allocation32_spill] sm:$0xff] %v7104_v24  ;;  %v3473_v27 = vadd.f32 %v3472_v35, %v3144_v10  ;;  %v2177_v33 = vpop.xlane.xlu0 %2176  ;;  %v4415_v23 = vpop.eup %4414  ;;  %v2007_v30 = vadd.f32 %v7104_v24, %v7102_v54  ;;  %v7117_v35 = vmul.f32 %v4945_v6, %v446_v2  ;;  %v7120_v10 = vmul.f32 %v4945_v6, %v447_v41 }
 0x330   : > { %4418 = vrcp.f32 %v2177_v33  ;;  %v2459_v21 = vmul.f32 %v4415_v23, %v6757_v16  ;;  %v2460_v55 = vmul.f32 %v4415_v23, %v6759_v32  ;;  %v4417_v37 = vpop.eup %4416  ;;  %v8604_v23 = vld [vmem:[#allocation12_spill] sm:$0xff] }
 0x331   : > { %3658 = vst.msk [vmem:[%s6173_s11 + $0x2d0] sm:$0xff] %vm3567_vm0, %v3473_v27  ;;  %2008 = vadd.xlane.f32.xlu0 %v2007_v30  ;;  %v1074_v32 = vmax.f32 %v7117_v35, %v7120_v10  ;;  %v2591_v30 = vmul.f32 %v4417_v37, %v8604_v23 }
 0x332   : > { %8602 = vst [vmem:[#allocation33_spill] sm:$0xff] %v7117_v35  ;;  %v2681_v33 = vpack.c.bf16 %v2459_v21, %v2457_v4  ;;  %v2682_v27 = vpack.c.bf16 %v2460_v55, %v2458_v0  ;;  %v8606_v4 = vld [vmem:[#allocation64_spill] sm:$0xff]  ;;  %v8607_v55 = vld [vmem:[#allocation57_spill] sm:$0xff] }
 0x333   : > { %8603 = vst [vmem:[#allocation40_spill] sm:$0xff] %v7120_v10  ;;  %v2592_v0 = vmul.f32 %v4417_v37, %v8607_v55 }
 0x334   : > { %v3145_v24 = vpop.f32.mrf.mxu2  ;;  %2997 = vmatmul.bf16.gmra.mxu0 %v2681_v33  ;;  %3326 = vmatmul.bf16.gmra.mxu1 %v2682_v27  ;;  %v3474_v2 = vpop.f32.mrf.mxu3  ;;  %v316_v33 = vld [vmem:[%s4929_s14 + $0x320] sm:$0xff]  ;;  %v8608_v27 = vld [vmem:[#allocation59_spill] sm:$0xff] }
 0x335   : > { %v3146_v16 = vadd.f32 %v7084_v31, %v3145_v24  ;;  %v8609_v24 = vld [vmem:[#allocation60_spill] sm:$0xff] }
 0x336   : > { %v4419_v53 = vpop.eup %4418 }
 0x337   : > { %v3475_v41 = vadd.f32 %v3474_v2, %v3146_v16  ;;  %v854_v9 = vpop.xlane.xlu0 %853  ;;  %v2589_v54 = vmul.f32 %v4419_v53, %v8605_v43  ;;  %v2590_v21 = vmul.f32 %v4419_v53, %v8606_v4  ;;  %v7136_v2 = vmul.f32 %v4945_v6, %v316_v33  ;;  %v315_v33 = vld [vmem:[%s4929_s14 + $0x318] sm:$0xff] }
 0x338   : > { %v1195_v40 = vsub.f32 %v8608_v27, %v854_v9  ;;  %v1196_v25 = vsub.f32 %v8609_v24, %v854_v9  ;;  %v7139_v53 = vmul.f32 %v4945_v6, %v317_v50 }
 0x339   : > { %3659 = vst.msk [vmem:[%s6173_s11 + $0x2d8] sm:$0xff] %vm3567_vm0, %v3475_v41  ;;  %v2747_v10 = vpack.c.bf16 %v2591_v30, %v2589_v54  ;;  %v2748_v35 = vpack.c.bf16 %v2592_v0, %v2590_v21  ;;  %1075 = vmax.xlane.f32.xlu0 %v1074_v32  ;;  %v314_v0 = vld [vmem:[%s4929_s14 + $0x310] sm:$0xff] }
 0x33a   : > { %v1533_v23 = vmul.f32 1.442695, %v1195_v40  ;;  %v1535_v16 = vmul.f32 1.442695, %v1196_v25  ;;  %v879_v37 = vmax.f32 %v7136_v2, %v7139_v53 }
 0x33b   : > { %3162 = vmatmul.bf16.gmra.mxu2 %v2747_v10  ;;  %3491 = vmatmul.bf16.gmra.mxu3 %v2748_v35 }
 0x33c   : > { %4420 = vpow2.f32 %v1533_v23  ;;  %v7168_v23 = vmul.f32 %v4945_v6, %v314_v0 }
 0x33d   : > { %4422 = vpow2.f32 %v1535_v16  ;;  %v7171_v16 = vmul.f32 %v4945_v6, %v315_v33 }
 0x33e   : > { %8613 = vst [vmem:[#allocation44_spill] sm:$0xff] %v7168_v23 }
 0x33f   : > { %8614 = vst [vmem:[#allocation24_spill] sm:$0xff] %v7171_v16 }
 0x340   : > { %v1049_v9 = vpop.xlane.xlu0 %1048 }
 0x341   : > { %v1325_v54 = vsub.f32 %v6795_v28, %v1049_v9  ;;  %v1326_v32 = vsub.f32 %v6798_v56, %v1049_v9  ;;  %880 = vmax.xlane.f32.xlu0 %v879_v37 }
 0x342   : > { %v7145_v40 = vpop.eup %4420 }
 0x343   : > { %v1793_v25 = vmul.f32 1.442695, %v1325_v54  ;;  %v1795_v50 = vmul.f32 1.442695, %v1326_v32  ;;  %v7147_v30 = vpop.eup %4422 }
 0x344   : > { %8610 = vst [vmem:[#allocation34_spill] sm:$0xff] %v7147_v30  ;;  %v2004_v10 = vadd.f32 %v7147_v30, %v7145_v40 }
 0x345   : > { %v7149_v35 = vpop.xlane.xlu1 %1993  ;;  %4424 = vpow2.f32 %v1793_v25 }
 0x346   : > { %4426 = vpow2.f32 %v1795_v50  ;;  %2005 = vadd.xlane.f32.xlu2 %v2004_v10  ;;  %v876_v10 = vmax.f32 %v7168_v23, %v7171_v16  ;;  %v8615_v23 = vld [vmem:[#allocation58_spill] sm:$0xff] }
 0x347   : > { %4428 = vrcp.f32 %v7080_v1  ;;  %v444_v1 = vld [vmem:[%s4929_s14 + $0x720] sm:$0xff] }
 0x348   : > { %v7183_v33 = vmul.f32 %v4945_v6, %v444_v1 }
 0x349   : > { %v2983_v28 = vpop.f32.mrf.mxu0  ;;  %v3312_v41 = vpop.f32.mrf.mxu1 }
 0x34a   : > { %v2984_v56 = vadd.f32 %v7084_v31, %v2983_v28  ;;  %v445_v28 = vld [vmem:[%s4929_s14 + $0x728] sm:$0xff] }
 0x34b   : > { %v7154_v43 = vpop.eup %4424 }
 0x34c   : > { %8611 = vst [vmem:[#allocation45_spill] sm:$0xff] %v7154_v43  ;;  %v3313_v4 = vadd.f32 %v3312_v41, %v2984_v56  ;;  %v2186_v21 = vpop.xlane.xlu0 %2185  ;;  %v7156_v55 = vpop.eup %4426 }
 0x34d   : > { %8612 = vst [vmem:[#allocation38_spill] sm:$0xff] %v7156_v55  ;;  %v2199_v24 = vadd.f32 %v7156_v55, %v7154_v43  ;;  %v4429_v56 = vpop.eup %4428  ;;  %v8616_v43 = vld [vmem:[#allocation61_spill] sm:$0xff] }
 0x34e   : > { %v7160_v27 = vpop.xlane.xlu1 %2188  ;;  %3594 = vst.msk [vmem:[%s6173_s11 + $0xd0] sm:$0xff] %vm3567_vm0, %v3313_v4  ;;  %v2461_v55 = vmul.f32 %v4429_v56, %v8615_v23 }
 0x34f   : > { %2200 = vadd.xlane.f32.xlu2 %v2199_v24  ;;  %v7186_v24 = vmul.f32 %v4945_v6, %v445_v28 }
 0x351   : > { %v2985_v37 = vpop.f32.mrf.mxu0  ;;  %v3314_v54 = vpop.f32.mrf.mxu1 }
 0x352   : > { %v2986_v9 = vadd.f32 %v7084_v31, %v2985_v37  ;;  %v1988_v32 = vpop.xlane.xlu2 %1987 }
 0x353   : > { %4430 = vrcp.f32 %v1988_v32 }
 0x354   : > { %v3315_v25 = vadd.f32 %v3314_v54, %v2986_v9  ;;  %v1991_v50 = vpop.xlane.xlu0 %1990  ;;  %4432 = vrcp.f32 %v2186_v21 }
 0x356   : > { %v866_v41 = vpop.xlane.xlu1 %865  ;;  %3595 = vst.msk [vmem:[%s6173_s11 + $0xd8] sm:$0xff] %vm3567_vm0, %v3315_v25  ;;  %v2462_v25 = vmul.f32 %v4429_v56, %v8616_v43 }
 0x357   : > { %v1203_v4 = vsub.f32 %v6862_v42, %v866_v41  ;;  %v1204_v0 = vsub.f32 %v6869_v44, %v866_v41  ;;  %877 = vmax.xlane.f32.xlu2 %v876_v10 }
 0x359   : > { %v4431_v37 = vpop.eup %4430  ;;  %v1549_v9 = vmul.f32 1.442695, %v1203_v4  ;;  %v1551_v54 = vmul.f32 1.442695, %v1204_v0  ;;  %v3148_v32 = vpop.f32.mrf.mxu2  ;;  %v1071_v0 = vmax.f32 %v7183_v33, %v7186_v24 }
 0x35a   : > { %v3477_v16 = vpop.f32.mrf.mxu3  ;;  %v3149_v42 = vadd.f32 %v7084_v31, %v3148_v32  ;;  %v2988_v44 = vpop.f32.mrf.mxu0  ;;  %v2463_v1 = vmul.f32 %v4431_v37, %v6864_v13  ;;  %v2464_v28 = vmul.f32 %v4431_v37, %v6871_v7 }
 0x35b   : > { %v3317_v41 = vpop.f32.mrf.mxu1  ;;  %4434 = vpow2.f32 %v1549_v9  ;;  %v2989_v10 = vadd.f32 %v7084_v31, %v2988_v44  ;;  %v2183_v4 = vpop.xlane.xlu2 %2182 }
 0x35c   : > { %4436 = vpow2.f32 %v1551_v54  ;;  %v3478_v43 = vadd.f32 %v3477_v16, %v3149_v42  ;;  %v1058_v21 = vpop.xlane.xlu0 %1057  ;;  %v2683_v23 = vpack.c.bf16 %v2463_v1, %v2461_v55  ;;  %v2684_v56 = vpack.c.bf16 %v2464_v28, %v2462_v25  ;;  %v4433_v54 = vpop.eup %4432 }
 0x35d   : > { %v3318_v32 = vadd.f32 %v3317_v41, %v2989_v10  ;;  %4438 = vrcp.f32 %v2183_v4  ;;  %v1331_v13 = vsub.f32 %v6891_v12, %v1058_v21  ;;  %v1332_v30 = vsub.f32 %v6894_v39, %v1058_v21 }
 0x35e   : > { %4440 = vrcp.f32 %v1991_v50  ;;  %3660 = vst.msk [vmem:[%s6173_s11 + $0x2e0] sm:$0xff] %vm3567_vm0, %v3478_v43  ;;  %v1061_v7 = vpop.xlane.xlu1 %1060  ;;  %3002 = vmatmul.bf16.gmra.mxu0 %v2683_v23  ;;  %3331 = vmatmul.bf16.gmra.mxu1 %v2684_v56  ;;  %v2595_v28 = vmul.f32 %v4433_v54, %v6839_v59 }
 0x35f   : > { %v1333_v37 = vsub.f32 %v6902_v14, %v1061_v7  ;;  %v1334_v9 = vsub.f32 %v6905_v38, %v1061_v7  ;;  %3596 = vst.msk [vmem:[%s6173_s11 + $0xe0] sm:$0xff] %vm3567_vm0, %v3318_v32  ;;  %v1805_v55 = vmul.f32 1.442695, %v1331_v13  ;;  %v1807_v16 = vmul.f32 1.442695, %v1332_v30  ;;  %1072 = vmax.xlane.f32.xlu2 %v1071_v0 }
 0x360   : > { %4442 = vrcp.f32 %v7149_v35 }
 0x361   : > { %v7205_v12 = vpop.eup %4434  ;;  %v1809_v39 = vmul.f32 1.442695, %v1333_v37  ;;  %v1811_v50 = vmul.f32 1.442695, %v1334_v9  ;;  %4444 = vpow2.f32 %v1805_v55  ;;  %v3150_v25 = vpop.f32.mrf.mxu2 }
 0x362   : > { %v7207_v42 = vpop.eup %4436  ;;  %4446 = vpow2.f32 %v1807_v16  ;;  %v3151_v14 = vadd.f32 %v7084_v31, %v3150_v25  ;;  %v2990_v38 = vpop.f32.mrf.mxu0 }
 0x363   : > { %8617 = vst [vmem:[#allocation47_spill] sm:$0xff] %v7207_v42  ;;  %v4439_v44 = vpop.eup %4438  ;;  %4448 = vpow2.f32 %v1809_v39  ;;  %v2016_v30 = vadd.f32 %v7207_v42, %v7205_v12  ;;  %v3479_v41 = vpop.f32.mrf.mxu3  ;;  %v2991_v35 = vadd.f32 %v7084_v31, %v2990_v38 }
 0x364   : > { %v860_v1 = vpop.xlane.xlu2 %859  ;;  %v4441_v10 = vpop.eup %4440  ;;  %4450 = vpow2.f32 %v1811_v50  ;;  %v3480_v4 = vadd.f32 %v3479_v41, %v3151_v14  ;;  %v2593_v7 = vmul.f32 %v4439_v44, %v6899_v34  ;;  %v8618_v14 = vld [vmem:[#allocation66_spill] sm:$0xff]  ;;  %v8622_v41 = vld [vmem:[#allocation23_spill] sm:$0xff] }
 0x365   : > { %v3319_v0 = vpop.f32.mrf.mxu1  ;;  %v1199_v43 = vsub.f32 %v6919_v63, %v860_v1  ;;  %v1200_v21 = vsub.f32 %v6925_v61, %v860_v1  ;;  %v863_v23 = vpop.xlane.xlu0 %862  ;;  %2017 = vadd.xlane.f32.xlu0 %v2016_v30  ;;  %v2594_v63 = vmul.f32 %v4439_v44, %v6908_v57  ;;  %v2596_v61 = vmul.f32 %v4433_v54, %v6841_v29  ;;  %v8621_v44 = vld [vmem:[#allocation11_spill] sm:$0xff] }
 0x366   : > { %v3320_v56 = vadd.f32 %v3319_v0, %v2991_v35  ;;  %v1201_v32 = vsub.f32 %v6937_v26, %v863_v23  ;;  %v1202_v13 = vsub.f32 %v6940_v58, %v863_v23  ;;  %v4443_v37 = vpop.eup %4442  ;;  %3661 = vst.msk [vmem:[%s6173_s11 + $0x2e8] sm:$0xff] %vm3567_vm0, %v3480_v4  ;;  %v7221_v59 = vpop.xlane.xlu1 %2197  ;;  %v2749_v58 = vpack.c.bf16 %v2595_v28, %v2593_v7  ;;  %v322_v1 = vld [vmem:[%s4929_s14 + $0x350] sm:$0xff]  ;;  %v323_v28 = vld [vmem:[%s4929_s14 + $0x358] sm:$0xff] }
 0x367   : > { %v1541_v9 = vmul.f32 1.442695, %v1199_v43  ;;  %v1543_v55 = vmul.f32 1.442695, %v1200_v21  ;;  %v7225_v16 = vpop.eup %4444  ;;  %v2750_v50 = vpack.c.bf16 %v2596_v61, %v2594_v63  ;;  %v2465_v25 = vmul.f32 %v4441_v10, %v6874_v11 }
 0x368   : > { %3597 = vst.msk [vmem:[%s6173_s11 + $0xe8] sm:$0xff] %vm3567_vm0, %v3320_v56  ;;  %v1545_v26 = vmul.f32 1.442695, %v1201_v32  ;;  %v1547_v39 = vmul.f32 1.442695, %v1202_v13  ;;  %v7229_v34 = vpop.eup %4446  ;;  %v2466_v38 = vmul.f32 %v4441_v10, %v8618_v14  ;;  %3167 = vmatmul.bf16.gmra.mxu2 %v2749_v58  ;;  %v2467_v30 = vmul.f32 %v4443_v37, %v8621_v44  ;;  %v453_v58 = vld [vmem:[%s4929_s14 + $0x768] sm:$0xff] }
 0x369   : > { %4452 = vpow2.f32 %v1541_v9  ;;  %v7233_v57 = vpop.eup %4448  ;;  %v2208_v29 = vadd.f32 %v7229_v34, %v7225_v16  ;;  %3496 = vmatmul.bf16.gmra.mxu3 %v2750_v50  ;;  %v2468_v35 = vmul.f32 %v4443_v37, %v8622_v41  ;;  %v7250_v56 = vmul.f32 %v4945_v6, %v322_v1  ;;  %v451_v14 = vld [vmem:[%s4929_s14 + $0x758] sm:$0xff] }
 0x36a   : > { %8619 = vst [vmem:[#allocation37_spill] sm:$0xff] %v7233_v57  ;;  %4454 = vpow2.f32 %v1543_v55  ;;  %v7237_v54 = vpop.eup %4450  ;;  %v2685_v21 = vpack.c.bf16 %v2467_v30, %v2465_v25  ;;  %v7253_v32 = vmul.f32 %v4945_v6, %v323_v28 }
 0x36b   : > { %8620 = vst [vmem:[#allocation39_spill] sm:$0xff] %v7237_v54  ;;  %4456 = vpow2.f32 %v1545_v26  ;;  %v2211_v11 = vadd.f32 %v7237_v54, %v7233_v57  ;;  %2209 = vadd.xlane.f32.xlu2 %v2208_v29  ;;  %v2686_v23 = vpack.c.bf16 %v2468_v35, %v2466_v38  ;;  %v7281_v35 = vmul.f32 %v4945_v6, %v453_v58  ;;  %v8624_v57 = vld [vmem:[#allocation65_spill] sm:$0xff] }
 0x36c   : > { %4458 = vpow2.f32 %v1547_v39  ;;  %v1055_v10 = vpop.xlane.xlu2 %1054  ;;  %v452_v39 = vld [vmem:[%s4929_s14 + $0x760] sm:$0xff]  ;;  %v888_v25 = vmax.f32 %v7250_v56, %v7253_v32 }
 0x36d   : > { %v1329_v4 = vsub.f32 %v6950_v49, %v1055_v10  ;;  %v1330_v0 = vsub.f32 %v6957_v36, %v1055_v10  ;;  %v7247_v43 = vpop.xlane.xlu0 %1999  ;;  %2212 = vadd.xlane.f32.xlu0 %v2211_v11  ;;  %4460 = vrcp.f32 %v7160_v27  ;;  %v450_v27 = vld [vmem:[%s4929_s14 + $0x750] sm:$0xff]  ;;  %v7278_v41 = vmul.f32 %v4945_v6, %v452_v39 }
 0x36e   : > { %v7257_v7 = vpop.xlane.xlu1 %2002  ;;  %3007 = vmatmul.bf16.gmra.mxu0 %v2685_v21  ;;  %3336 = vmatmul.bf16.gmra.mxu1 %v2686_v23  ;;  %v7289_v10 = vmul.f32 %v4945_v6, %v450_v27 }
 0x36f   : > { %v7255_v13 = vpop.eup %4452  ;;  %v1801_v49 = vmul.f32 1.442695, %v1329_v4  ;;  %v1803_v37 = vmul.f32 1.442695, %v1330_v0  ;;  %v3153_v9 = vpop.f32.mrf.mxu2  ;;  %v7292_v4 = vmul.f32 %v4945_v6, %v451_v14  ;;  %v1083_v58 = vmax.f32 %v7278_v41, %v7281_v35 }
 0x370   : > { %v7259_v36 = vpop.eup %4454  ;;  %v3154_v61 = vadd.f32 %v7084_v31, %v3153_v9  ;;  %v3482_v26 = vpop.f32.mrf.mxu3  ;;  %v319_v9 = vld [vmem:[%s4929_s14 + $0x338] sm:$0xff] }
 0x371   : > { %v7262_v55 = vpop.eup %4456  ;;  %4462 = vpow2.f32 %v1801_v49  ;;  %v2010_v63 = vadd.f32 %v7259_v36, %v7255_v13 }
 0x372   : > { %v7269_v50 = vpop.eup %4458  ;;  %4464 = vpow2.f32 %v1803_v37  ;;  %v3483_v38 = vadd.f32 %v3482_v26, %v3154_v61  ;;  %v318_v37 = vld [vmem:[%s4929_s14 + $0x330] sm:$0xff] }
 0x373   : > { %2011 = vadd.xlane.f32.xlu1 %v2010_v63  ;;  %v2013_v29 = vadd.f32 %v7269_v50, %v7262_v55  ;;  %v2993_v44 = vpop.f32.mrf.mxu0  ;;  %v3322_v30 = vpop.f32.mrf.mxu1 }
 0x374   : > { %3662 = vst.msk [vmem:[%s6173_s11 + $0x2f0] sm:$0xff] %vm3567_vm0, %v3483_v38  ;;  %v2994_v1 = vadd.f32 %v7084_v31, %v2993_v44  ;;  %v2192_v28 = vpop.xlane.xlu2 %2191  ;;  %v4461_v0 = vpop.eup %4460  ;;  %v1080_v38 = vmax.f32 %v7289_v10, %v7292_v4  ;;  %v321_v44 = vld [vmem:[%s4929_s14 + $0x348] sm:$0xff] }
 0x375   : > { %2014 = vadd.xlane.f32.xlu2 %v2013_v29  ;;  %v7286_v11 = vpop.xlane.xlu0 %2194  ;;  %889 = vmax.xlane.f32.xlu0 %v888_v25  ;;  %4466 = vrcp.f32 %v2192_v28  ;;  %v320_v29 = vld [vmem:[%s4929_s14 + $0x340] sm:$0xff]  ;;  %v2598_v42 = vmul.f32 %v4461_v0, %v8624_v57 }
 0x376   : > { %v1070_v23 = vpop.xlane.xlu1 %1069  ;;  %v3323_v49 = vadd.f32 %v3322_v30, %v2994_v1  ;;  %v7314_v30 = vmul.f32 %v4945_v6, %v318_v37  ;;  %v7317_v1 = vmul.f32 %v4945_v6, %v319_v9  ;;  %4468 = vrcp.f32 %v7247_v43 }
 0x377   : > { %v7294_v21 = vpop.eup %4462  ;;  %v1339_v61 = vsub.f32 %v7005_v8, %v1070_v23  ;;  %v1340_v26 = vsub.f32 %v7010_v20, %v1070_v23  ;;  %v3155_v39 = vpop.f32.mrf.mxu2  ;;  %v8623_v23 = vld [vmem:[#allocation25_spill] sm:$0xff]  ;;  %v7326_v37 = vmul.f32 %v4945_v6, %v321_v44 }
 0x378   : > { %v7298_v63 = vpop.eup %4464  ;;  %3598 = vst.msk [vmem:[%s6173_s11 + $0xf0] sm:$0xff] %vm3567_vm0, %v3323_v49  ;;  %v3156_v27 = vadd.f32 %v7084_v31, %v3155_v39  ;;  %v3484_v14 = vpop.f32.mrf.mxu3  ;;  %v2597_v49 = vmul.f32 %v4461_v0, %v8623_v23  ;;  %v449_v23 = vld [vmem:[%s4929_s14 + $0x748] sm:$0xff] }
 0x379   : > { %v2205_v25 = vadd.f32 %v7298_v63, %v7294_v21  ;;  %v1821_v8 = vmul.f32 1.442695, %v1339_v61  ;;  %v1823_v20 = vmul.f32 1.442695, %v1340_v26  ;;  %v7323_v61 = vmul.f32 %v4945_v6, %v320_v29 }
 0x37a   : > { %v3485_v28 = vadd.f32 %v3484_v14, %v3156_v27 }
 0x37b   : > { %2206 = vadd.xlane.f32.xlu1 %v2205_v25  ;;  %v4467_v39 = vpop.eup %4466  ;;  %4470 = vpow2.f32 %v1821_v8  ;;  %v2995_v54 = vpop.f32.mrf.mxu0 }
 0x37c   : > { %4472 = vpow2.f32 %v1823_v20  ;;  %3663 = vst.msk [vmem:[%s6173_s11 + $0x2f8] sm:$0xff] %vm3567_vm0, %v3485_v28  ;;  %v2996_v43 = vadd.f32 %v7084_v31, %v2995_v54  ;;  %v1997_v9 = vpop.xlane.xlu2 %1996  ;;  %v2599_v25 = vmul.f32 %v4467_v39, %v7007_v5  ;;  %v2600_v27 = vmul.f32 %v4467_v39, %v7012_v18  ;;  %v3324_v57 = vpop.f32.mrf.mxu1 }
 0x37d   : > { %1081 = vmax.xlane.f32.xlu2 %v1080_v38  ;;  %v872_v26 = vpop.xlane.xlu0 %871  ;;  %1084 = vmax.xlane.f32.xlu0 %v1083_v58  ;;  %4474 = vrcp.f32 %v1997_v9  ;;  %v882_v38 = vmax.f32 %v7314_v30, %v7317_v1 }
 0x37e   : > { %v1207_v0 = vsub.f32 %v7029_v52, %v872_v26  ;;  %v1208_v14 = vsub.f32 %v7032_v15, %v872_v26  ;;  %4476 = vrcp.f32 %v7221_v59  ;;  %v875_v54 = vpop.xlane.xlu1 %874  ;;  %v3325_v29 = vadd.f32 %v3324_v57, %v2996_v43  ;;  %v448_v52 = vld [vmem:[%s4929_s14 + $0x740] sm:$0xff]  ;;  %v4469_v15 = vpop.eup %4468 }
 0x37f   : > { %v2751_v5 = vpack.c.bf16 %v2599_v25, %v2597_v49  ;;  %v2752_v44 = vpack.c.bf16 %v2600_v27, %v2598_v42  ;;  %v1209_v18 = vsub.f32 %v7037_v48, %v875_v54  ;;  %v1210_v58 = vsub.f32 %v7040_v17, %v875_v54  ;;  %v3158_v28 = vpop.f32.mrf.mxu2 }
 0x380   : > { %v1557_v8 = vmul.f32 1.442695, %v1207_v0  ;;  %v1559_v20 = vmul.f32 1.442695, %v1208_v14  ;;  %4478 = vrcp.f32 %v7286_v11  ;;  %3599 = vst.msk [vmem:[%s6173_s11 + $0xf8] sm:$0xff] %vm3567_vm0, %v3325_v29  ;;  %v3159_v59 = vadd.f32 %v7084_v31, %v3158_v28  ;;  %v3487_v49 = vpop.f32.mrf.mxu3 }
 0x381   : > { %3172 = vmatmul.bf16.gmra.mxu2 %v2751_v5  ;;  %3501 = vmatmul.bf16.gmra.mxu3 %v2752_v44  ;;  %v885_v48 = vmax.f32 %v7323_v61, %v7326_v37  ;;  %v7348_v42 = vpop.eup %4470  ;;  %v1561_v17 = vmul.f32 1.442695, %v1209_v18  ;;  %v1563_v39 = vmul.f32 1.442695, %v1210_v58  ;;  %v7353_v9 = vmul.f32 %v4945_v6, %v448_v52 }
 0x382   : > { %8625 = vst [vmem:[#allocation27_spill] sm:$0xff] %v7348_v42  ;;  %4480 = vpow2.f32 %v1557_v8  ;;  %v7350_v43 = vpop.eup %4472  ;;  %v3488_v11 = vadd.f32 %v3487_v49, %v3159_v59  ;;  %v7356_v26 = vmul.f32 %v4945_v6, %v449_v23  ;;  %v2471_v57 = vmul.f32 %v4469_v15, %v6981_v62 }
 0x383   : > { %8626 = vst [vmem:[#allocation46_spill] sm:$0xff] %v7350_v43  ;;  %4482 = vpow2.f32 %v1559_v20  ;;  %883 = vmax.xlane.f32.xlu1 %v882_v38  ;;  %v4475_v25 = vpop.eup %4474  ;;  %v2220_v27 = vadd.f32 %v7350_v43, %v7348_v42  ;;  %v2472_v5 = vmul.f32 %v4469_v15, %v6983_v19 }
 0x384   : > { %4484 = vpow2.f32 %v1561_v17  ;;  %v4477_v0 = vpop.eup %4476  ;;  %3664 = vst.msk [vmem:[%s6173_s11 + $0x300] sm:$0xff] %vm3567_vm0, %v3488_v11  ;;  %v1064_v14 = vpop.xlane.xlu2 %1063  ;;  %v2469_v54 = vmul.f32 %v4475_v25, %v7034_v51  ;;  %v2470_v29 = vmul.f32 %v4475_v25, %v7042_v46  ;;  %v1077_v52 = vmax.f32 %v7353_v9, %v7356_v26  ;;  %v8629_v11 = vld [vmem:[#allocation18_spill] sm:$0xff] }
 0x385   : > { %4486 = vpow2.f32 %v1563_v39  ;;  %886 = vmax.xlane.f32.xlu2 %v885_v48  ;;  %v1067_v38 = vpop.xlane.xlu0 %1066  ;;  %2221 = vadd.xlane.f32.xlu0 %v2220_v27  ;;  %v1335_v44 = vsub.f32 %v7055_v47, %v1064_v14  ;;  %v1336_v18 = vsub.f32 %v7058_v60, %v1064_v14  ;;  %v458_v27 = vld [vmem:[%s4929_s14 + $0x790] sm:$0xff] }
 0x386   : > { %v1337_v62 = vsub.f32 %v7061_v3, %v1067_v38  ;;  %v1338_v58 = vsub.f32 %v7064_v45, %v1067_v38  ;;  %v4479_v8 = vpop.eup %4478  ;;  %v2687_v20 = vpack.c.bf16 %v2471_v57, %v2469_v54  ;;  %v2688_v28 = vpack.c.bf16 %v2472_v5, %v2470_v29  ;;  %v459_v57 = vld [vmem:[%s4929_s14 + $0x798] sm:$0xff]  ;;  %v8630_v54 = vld [vmem:[#allocation55_spill] sm:$0xff]  ;;  %v8631_v5 = vld [vmem:[#allocation14_spill] sm:$0xff] }
 0x387   : > { %v1813_v46 = vmul.f32 1.442695, %v1335_v44  ;;  %v1815_v23 = vmul.f32 1.442695, %v1336_v18  ;;  %v3160_v15 = vpop.f32.mrf.mxu2  ;;  %v2601_v39 = vmul.f32 %v4479_v8, %v7014_v22  ;;  %v2602_v25 = vmul.f32 %v4479_v8, %v8629_v11  ;;  %v8632_v18 = vld [vmem:[#allocation31_spill] sm:$0xff]  ;;  %v327_v11 = vld [vmem:[%s4929_s14 + $0x378] sm:$0xff] }
 0x388   : > { %v7372_v51 = vpop.eup %4480  ;;  %v1817_v19 = vmul.f32 1.442695, %v1337_v62  ;;  %v1819_v60 = vmul.f32 1.442695, %v1338_v58  ;;  %3012 = vmatmul.bf16.gmra.mxu0 %v2687_v20  ;;  %3341 = vmatmul.bf16.gmra.mxu1 %v2688_v28  ;;  %v3161_v3 = vadd.f32 %v7084_v31, %v3160_v15  ;;  %v3489_v59 = vpop.f32.mrf.mxu3  ;;  %v2603_v29 = vmul.f32 %v4477_v0, %v8630_v54  ;;  %v8633_v62 = vld [vmem:[#allocation56_spill] sm:$0xff] }
 0x389   : > { %v7374_v47 = vpop.eup %4482  ;;  %4488 = vpow2.f32 %v1813_v46  ;;  %v2604_v44 = vmul.f32 %v4477_v0, %v8631_v5  ;;  %v7396_v8 = vmul.f32 %v4945_v6, %v458_v27  ;;  %v7399_v20 = vmul.f32 %v4945_v6, %v459_v57  ;;  %v454_v5 = vld [vmem:[%s4929_s14 + $0x770] sm:$0xff] }
 0x38a   : > { %v7377_v45 = vpop.eup %4484  ;;  %v2022_v49 = vadd.f32 %v7374_v47, %v7372_v51  ;;  %4490 = vpow2.f32 %v1815_v23  ;;  %v3490_v17 = vadd.f32 %v3489_v59, %v3161_v3  ;;  %v2753_v28 = vpack.c.bf16 %v2603_v29, %v2601_v39  ;;  %v328_v59 = vld [vmem:[%s4929_s14 + $0x380] sm:$0xff]  ;;  %v326_v39 = vld [vmem:[%s4929_s14 + $0x370] sm:$0xff] }
 0x38b   : > { %8627 = vst [vmem:[#allocation43_spill] sm:$0xff] %v7377_v45  ;;  %v7381_v48 = vpop.eup %4486  ;;  %1078 = vmax.xlane.f32.xlu1 %v1077_v52  ;;  %4492 = vpow2.f32 %v1817_v19  ;;  %v2754_v52 = vpack.c.bf16 %v2604_v44, %v2602_v25  ;;  %v7420_v27 = vmul.f32 %v4945_v6, %v328_v59  ;;  %v455_v44 = vld [vmem:[%s4929_s14 + $0x778] sm:$0xff] }
 0x38c   : > { %8628 = vst [vmem:[#allocation30_spill] sm:$0xff] %v7381_v48  ;;  %v2025_v14 = vadd.f32 %v7381_v48, %v7377_v45  ;;  %4494 = vpow2.f32 %v1819_v60  ;;  %v869_v38 = vpop.xlane.xlu2 %868  ;;  %v1092_v60 = vmax.f32 %v7396_v8, %v7399_v20 }
 0x38d   : > { %3665 = vst.msk [vmem:[%s6173_s11 + $0x308] sm:$0xff] %vm3567_vm0, %v3490_v17  ;;  %2023 = vadd.xlane.f32.xlu2 %v2022_v49  ;;  %v1205_v22 = vsub.f32 %v8632_v18, %v869_v38  ;;  %v1206_v58 = vsub.f32 %v8633_v62, %v869_v38  ;;  %v329_v17 = vld [vmem:[%s4929_s14 + $0x388] sm:$0xff]  ;;  %v7429_v38 = vmul.f32 %v4945_v6, %v327_v11 }
 0x38e   : > { %2026 = vadd.xlane.f32.xlu0 %v2025_v14  ;;  %v7423_v57 = vmul.f32 %v4945_v6, %v329_v17  ;;  %v7426_v14 = vmul.f32 %v4945_v6, %v326_v39  ;;  %v324_v17 = vld [vmem:[%s4929_s14 + $0x360] sm:$0xff]  ;;  %v325_v39 = vld [vmem:[%s4929_s14 + $0x368] sm:$0xff] }
 0x38f   : > { %v7401_v46 = vpop.eup %4488  ;;  %v1553_v0 = vmul.f32 1.442695, %v1205_v22  ;;  %v1555_v23 = vmul.f32 1.442695, %v1206_v58  ;;  %v456_v58 = vld [vmem:[%s4929_s14 + $0x780] sm:$0xff] }
 0x390   : > { %v7403_v19 = vpop.eup %4490  ;;  %v897_v18 = vmax.f32 %v7420_v27, %v7423_v57  ;;  %v894_v62 = vmax.f32 %v7426_v14, %v7429_v38 }
 0x391   : > { %3177 = vmatmul.bf16.gmra.mxu2 %v2753_v28  ;;  %3506 = vmatmul.bf16.gmra.mxu3 %v2754_v52  ;;  %v7405_v15 = vpop.eup %4492  ;;  %4496 = vpow2.f32 %v1553_v0  ;;  %v2214_v3 = vadd.f32 %v7403_v19, %v7401_v46  ;;  %v457_v28 = vld [vmem:[%s4929_s14 + $0x788] sm:$0xff]  ;;  %v7446_v52 = vmul.f32 %v4945_v6, %v454_v5  ;;  %v7449_v0 = vmul.f32 %v4945_v6, %v455_v44 }
 0x392   : > { %8634 = vst [vmem:[#allocation13_spill] sm:$0xff] %v7405_v15  ;;  %v7412_v49 = vpop.eup %4494  ;;  %4498 = vpow2.f32 %v1555_v23  ;;  %v7452_v23 = vmul.f32 %v4945_v6, %v456_v58  ;;  %v7467_v5 = vmul.f32 %v4945_v6, %v325_v39 }
 0x393   : > { %8635 = vst [vmem:[#allocation50_spill] sm:$0xff] %v7412_v49  ;;  %2215 = vadd.xlane.f32.xlu1 %v2214_v3  ;;  %v2217_v25 = vadd.f32 %v7412_v49, %v7405_v15  ;;  %v1086_v59 = vmax.f32 %v7446_v52, %v7449_v0  ;;  %v8654_v15 = vld [vmem:[#allocation24_spill] sm:$0xff] }
 0x394   : > { %8638 = vst [vmem:[#allocation29_spill] sm:$0xff] %v7467_v5 }
 0x395   : > { %2218 = vadd.xlane.f32.xlu2 %v2217_v25  ;;  %v7464_v25 = vmul.f32 %v4945_v6, %v324_v17 }
 0x396   : > { %1093 = vmax.xlane.f32.xlu0 %v1092_v60  ;;  %v7455_v60 = vmul.f32 %v4945_v6, %v457_v28  ;;  %v8640_v28 = vld [vmem:[#allocation40_spill] sm:$0xff] }
 0x397   : > { %v7431_v54 = vpop.eup %4496  ;;  %8637 = vst [vmem:[#allocation51_spill] sm:$0xff] %v7464_v25 }
 0x398   : > { %v7433_v29 = vpop.eup %4498  ;;  %8636 = vst [vmem:[#allocation10_spill] sm:$0xff] %v7455_v60  ;;  %v1089_v11 = vmax.f32 %v7452_v23, %v7455_v60 }
 0x399   : > { %v2019_v22 = vadd.f32 %v7433_v29, %v7431_v54 }
 0x39b   : > { %2020 = vadd.xlane.f32.xlu1 %v2019_v22 }
 0x39c   : > { %v2204_v3 = vpop.xlane.xlu0 %2203 }
 0x39d   : > { %895 = vmax.xlane.f32.xlu2 %v894_v62  ;;  %v8639_v62 = vld [vmem:[#allocation33_spill] sm:$0xff] }
 0x39e   : > { %898 = vmax.xlane.f32.xlu0 %v897_v18  ;;  %v891_v18 = vmax.f32 %v7464_v25, %v7467_v5 }
 0x3a3   : > { %1087 = vmax.xlane.f32.xlu1 %v1086_v59 }
 0x3a4   : > { %v7469_v44 = vpop.xlane.xlu0 %2008 }
 0x3a5   : > { %1090 = vmax.xlane.f32.xlu2 %v1089_v11 }
 0x3ab   : > { %892 = vmax.xlane.f32.xlu1 %v891_v18 }
 0x3ac   : > { %v1076_v22 = vpop.xlane.xlu0 %1075 }
 0x3ad   : > { %v1343_v58 = vsub.f32 %v8639_v62, %v1076_v22  ;;  %v1344_v48 = vsub.f32 %v8640_v28, %v1076_v22 }
 0x3af   : > { %v1829_v59 = vmul.f32 1.442695, %v1343_v58  ;;  %v1831_v45 = vmul.f32 1.442695, %v1344_v48 }
 0x3b1   : > { %4500 = vpow2.f32 %v1829_v59  ;;  %v2998_v17 = vpop.f32.mrf.mxu0  ;;  %v3327_v43 = vpop.f32.mrf.mxu1 }
 0x3b2   : > { %4502 = vpow2.f32 %v1831_v45  ;;  %v2999_v39 = vadd.f32 %v7084_v31, %v2998_v17 }
 0x3b3   : > { %4504 = vrcp.f32 %v7257_v7 }
 0x3b4   : > { %v3328_v11 = vadd.f32 %v3327_v43, %v2999_v39  ;;  %v881_v49 = vpop.xlane.xlu0 %880 }
 0x3b5   : > { %v1213_v42 = vsub.f32 %v7136_v2, %v881_v49  ;;  %v1214_v5 = vsub.f32 %v7139_v53, %v881_v49 }
 0x3b6   : > { %3600 = vst.msk [vmem:[%s6173_s11 + $0x100] sm:$0xff] %vm3567_vm0, %v3328_v11  ;;  %v462_v11 = vld [vmem:[%s4929_s14 + $0x7b0] sm:$0xff] }
 0x3b7   : > { %v7480_v18 = vpop.eup %4500  ;;  %v1569_v62 = vmul.f32 1.442695, %v1213_v42  ;;  %v1571_v22 = vmul.f32 1.442695, %v1214_v5 }
 0x3b8   : > { %8641 = vst [vmem:[#allocation48_spill] sm:$0xff] %v7480_v18  ;;  %v7482_v48 = vpop.eup %4502 }
 0x3b9   : > { %8642 = vst [vmem:[#allocation22_spill] sm:$0xff] %v7482_v48  ;;  %v2006_v45 = vpop.xlane.xlu2 %2005  ;;  %4506 = vpow2.f32 %v1569_v62  ;;  %v2226_v43 = vadd.f32 %v7482_v48, %v7480_v18  ;;  %v3000_v58 = vpop.f32.mrf.mxu0  ;;  %v463_v62 = vld [vmem:[%s4929_s14 + $0x7b8] sm:$0xff]  ;;  %v333_v18 = vld [vmem:[%s4929_s14 + $0x3a8] sm:$0xff] }
 0x3ba   : > { %4508 = vpow2.f32 %v1571_v22  ;;  %v3001_v2 = vadd.f32 %v7084_v31, %v3000_v58  ;;  %v3329_v53 = vpop.f32.mrf.mxu1  ;;  %v4505_v28 = vpop.eup %4504  ;;  %v8645_v58 = vld [vmem:[#allocation15_spill] sm:$0xff] }
 0x3bb   : > { %2227 = vadd.xlane.f32.xlu2 %v2226_v43  ;;  %4510 = vrcp.f32 %v2006_v45 }
 0x3bc   : > { %v3330_v42 = vadd.f32 %v3329_v53, %v3001_v2  ;;  %4512 = vrcp.f32 %v2204_v3  ;;  %v2473_v2 = vmul.f32 %v4505_v28, %v8645_v58  ;;  %v8646_v53 = vld [vmem:[#allocation16_spill] sm:$0xff]  ;;  %v7506_v3 = vmul.f32 %v4945_v6, %v462_v11 }
 0x3be   : > { %v3163_v49 = vpop.f32.mrf.mxu2  ;;  %v3492_v5 = vpop.f32.mrf.mxu3  ;;  %3601 = vst.msk [vmem:[%s6173_s11 + $0x108] sm:$0xff] %vm3567_vm0, %v3330_v42  ;;  %v2474_v42 = vmul.f32 %v4505_v28, %v8646_v53 }
 0x3bf   : > { %v3164_v7 = vadd.f32 %v7084_v31, %v3163_v49  ;;  %v7491_v59 = vpop.eup %4506  ;;  %v8647_v49 = vld [vmem:[#allocation34_spill] sm:$0xff] }
 0x3c0   : > { %8643 = vst [vmem:[#allocation20_spill] sm:$0xff] %v7491_v59  ;;  %v7493_v17 = vpop.eup %4508 }
 0x3c1   : > { %8644 = vst [vmem:[#allocation19_spill] sm:$0xff] %v7493_v17  ;;  %v3493_v39 = vadd.f32 %v3492_v5, %v3164_v7  ;;  %v4511_v22 = vpop.eup %4510  ;;  %v2031_v45 = vadd.f32 %v7493_v17, %v7491_v59  ;;  %v7509_v5 = vmul.f32 %v4945_v6, %v463_v62  ;;  %v332_v62 = vld [vmem:[%s4929_s14 + $0x3a0] sm:$0xff] }
 0x3c2   : > { %v2201_v43 = vpop.xlane.xlu2 %2200  ;;  %v2475_v31 = vmul.f32 %v4511_v22, %v7145_v40  ;;  %v2476_v48 = vmul.f32 %v4511_v22, %v8647_v49  ;;  %v7511_v40 = vld [vmem:[#allocation6] ss:$0 sm:$0xff]  ;;  %v8651_v49 = vld [vmem:[#allocation38_spill] sm:$0xff] }
 0x3c3   : > { %3666 = vst.msk [vmem:[%s6173_s11 + $0x310] sm:$0xff] %vm3567_vm0, %v3493_v39  ;;  %4514 = vrcp.f32 %v2201_v43  ;;  %2032 = vadd.xlane.f32.xlu2 %v2031_v45  ;;  %v4513_v39 = vpop.eup %4512  ;;  %v1098_v11 = vmax.f32 %v7506_v3, %v7509_v5 }
 0x3c4   : > { %8648 = vst [vmem:[#allocation17_spill] sm:$0xff] %v7509_v5  ;;  %v2689_v7 = vpack.c.bf16 %v2475_v31, %v2473_v2  ;;  %v2690_v17 = vpack.c.bf16 %v2476_v48, %v2474_v42  ;;  %v8649_v2 = vld [vmem:[#allocation45_spill] sm:$0xff] }
 0x3c5   : > { %v8650_v31 = vld [vmem:[#allocation21_spill] sm:$0xff] }
 0x3c6   : > { %v3165_v58 = vpop.f32.mrf.mxu2  ;;  %3017 = vmatmul.bf16.gmra.mxu0 %v2689_v7  ;;  %3346 = vmatmul.bf16.gmra.mxu1 %v2690_v17  ;;  %v3494_v22 = vpop.f32.mrf.mxu3  ;;  %v2607_v42 = vmul.f32 %v4513_v39, %v8650_v31  ;;  %v8652_v7 = vld [vmem:[#allocation35_spill] sm:$0xff] }
 0x3c7   : > { %v3166_v28 = vadd.f32 %v7511_v40, %v3165_v58  ;;  %v2608_v17 = vmul.f32 %v4513_v39, %v8652_v7  ;;  %v8653_v58 = vld [vmem:[#allocation44_spill] sm:$0xff] }
 0x3c9   : > { %v4515_v45 = vpop.eup %4514  ;;  %v3495_v43 = vadd.f32 %v3494_v22, %v3166_v28  ;;  %v7527_v22 = vmul.f32 %v4945_v6, %v332_v62 }
 0x3ca   : > { %v878_v53 = vpop.xlane.xlu2 %877  ;;  %v2605_v48 = vmul.f32 %v4515_v45, %v8649_v2  ;;  %v2606_v59 = vmul.f32 %v4515_v45, %v8651_v49  ;;  %v7530_v2 = vmul.f32 %v4945_v6, %v333_v18 }
 0x3cb   : > { %3667 = vst.msk [vmem:[%s6173_s11 + $0x318] sm:$0xff] %vm3567_vm0, %v3495_v43  ;;  %v1211_v25 = vsub.f32 %v8653_v58, %v878_v53  ;;  %v1212_v60 = vsub.f32 %v8654_v15, %v878_v53  ;;  %1099 = vmax.xlane.f32.xlu2 %v1098_v11  ;;  %v331_v58 = vld [vmem:[%s4929_s14 + $0x398] sm:$0xff] }
 0x3cc   : > { %v2755_v5 = vpack.c.bf16 %v2607_v42, %v2605_v48  ;;  %v2756_v28 = vpack.c.bf16 %v2608_v17, %v2606_v59  ;;  %8655 = vst [vmem:[#allocation54_spill] sm:$0xff] %v7527_v22  ;;  %v903_v39 = vmax.f32 %v7527_v22, %v7530_v2  ;;  %v330_v17 = vld [vmem:[%s4929_s14 + $0x390] sm:$0xff] }
 0x3cd   : > { %8656 = vst [vmem:[#allocation52_spill] sm:$0xff] %v7530_v2  ;;  %v1565_v31 = vmul.f32 1.442695, %v1211_v25  ;;  %v1567_v45 = vmul.f32 1.442695, %v1212_v60 }
 0x3ce   : > { %3182 = vmatmul.bf16.gmra.mxu2 %v2755_v5  ;;  %3511 = vmatmul.bf16.gmra.mxu3 %v2756_v28 }
 0x3cf   : > { %4516 = vpow2.f32 %v1565_v31 }
 0x3d0   : > { %4518 = vpow2.f32 %v1567_v45  ;;  %v7558_v45 = vmul.f32 %v4945_v6, %v330_v17 }
 0x3d2   : > { %v1073_v43 = vpop.xlane.xlu2 %1072  ;;  %8659 = vst [vmem:[#allocation28_spill] sm:$0xff] %v7558_v45 }
 0x3d3   : > { %v1341_v15 = vsub.f32 %v7183_v33, %v1073_v43  ;;  %v1342_v59 = vsub.f32 %v7186_v24, %v1073_v43  ;;  %904 = vmax.xlane.f32.xlu2 %v903_v39  ;;  %v7561_v39 = vmul.f32 %v4945_v6, %v331_v58 }
 0x3d5   : > { %v7536_v11 = vpop.eup %4516  ;;  %v1825_v18 = vmul.f32 1.442695, %v1341_v15  ;;  %v1827_v25 = vmul.f32 1.442695, %v1342_v59  ;;  %8660 = vst [vmem:[#allocation41_spill] sm:$0xff] %v7561_v39 }
 0x3d6   : > { %v7538_v60 = vpop.eup %4518 }
 0x3d7   : > { %4520 = vpow2.f32 %v1825_v18  ;;  %v2028_v62 = vadd.f32 %v7538_v60, %v7536_v11 }
 0x3d8   : > { %v7540_v5 = vpop.xlane.xlu0 %2017  ;;  %4522 = vpow2.f32 %v1827_v25 }
 0x3d9   : > { %2029 = vadd.xlane.f32.xlu1 %v2028_v62  ;;  %4524 = vrcp.f32 %v7469_v44  ;;  %v900_v62 = vmax.f32 %v7558_v45, %v7561_v39  ;;  %v8661_v45 = vld [vmem:[#allocation36_spill] sm:$0xff] }
 0x3db   : > { %v3003_v33 = vpop.f32.mrf.mxu0  ;;  %v3332_v24 = vpop.f32.mrf.mxu1 }
 0x3dc   : > { %v3004_v53 = vadd.f32 %v7511_v40, %v3003_v33 }
 0x3dd   : > { %v7545_v48 = vpop.eup %4520 }
 0x3de   : > { %8657 = vst [vmem:[#allocation49_spill] sm:$0xff] %v7545_v48  ;;  %v3333_v42 = vadd.f32 %v3332_v24, %v3004_v53  ;;  %v2210_v49 = vpop.xlane.xlu2 %2209  ;;  %v7547_v7 = vpop.eup %4522  ;;  %v460_v24 = vld [vmem:[%s4929_s14 + $0x7a0] sm:$0xff]  ;;  %v461_v53 = vld [vmem:[%s4929_s14 + $0x7a8] sm:$0xff] }
 0x3df   : > { %8658 = vst [vmem:[#allocation53_spill] sm:$0xff] %v7547_v7  ;;  %v2223_v31 = vadd.f32 %v7547_v7, %v7545_v48  ;;  %v4525_v17 = vpop.eup %4524  ;;  %v8662_v7 = vld [vmem:[#allocation32_spill] sm:$0xff] }
 0x3e0   : > { %3602 = vst.msk [vmem:[%s6173_s11 + $0x110] sm:$0xff] %vm3567_vm0, %v3333_v42  ;;  %v7553_v28 = vpop.xlane.xlu0 %2212 }
 0x3e1   : > { %2224 = vadd.xlane.f32.xlu1 %v2223_v31  ;;  %v7574_v31 = vmul.f32 %v4945_v6, %v460_v24 }
 0x3e3   : > { %v3005_v43 = vpop.f32.mrf.mxu0  ;;  %v3334_v15 = vpop.f32.mrf.mxu1 }
 0x3e4   : > { %v3006_v59 = vadd.f32 %v7511_v40, %v3005_v43  ;;  %v7577_v43 = vmul.f32 %v4945_v6, %v461_v53 }
 0x3e6   : > { %v2012_v18 = vpop.xlane.xlu1 %2011  ;;  %v3335_v25 = vadd.f32 %v3334_v15, %v3006_v59 }
 0x3e7   : > { %4526 = vrcp.f32 %v2012_v18 }
 0x3e8   : > { %v2015_v33 = vpop.xlane.xlu2 %2014  ;;  %3603 = vst.msk [vmem:[%s6173_s11 + $0x118] sm:$0xff] %vm3567_vm0, %v3335_v25  ;;  %v890_v42 = vpop.xlane.xlu0 %889  ;;  %4528 = vrcp.f32 %v2210_v49 }
 0x3e9   : > { %v1219_v58 = vsub.f32 %v7250_v56, %v890_v42  ;;  %v1220_v44 = vsub.f32 %v7253_v32, %v890_v42  ;;  %901 = vmax.xlane.f32.xlu1 %v900_v62  ;;  %v2477_v56 = vmul.f32 %v4525_v17, %v8661_v45  ;;  %v2478_v32 = vmul.f32 %v4525_v17, %v8662_v7 }
 0x3eb   : > { %v1581_v15 = vmul.f32 1.442695, %v1219_v58  ;;  %v1583_v59 = vmul.f32 1.442695, %v1220_v44  ;;  %v3008_v18 = vpop.f32.mrf.mxu0  ;;  %v3337_v2 = vpop.f32.mrf.mxu1  ;;  %v1095_v44 = vmax.f32 %v7574_v31, %v7577_v43 }
 0x3ec   : > { %v3168_v25 = vpop.f32.mrf.mxu2  ;;  %v3009_v39 = vadd.f32 %v7511_v40, %v3008_v18  ;;  %v3497_v24 = vpop.f32.mrf.mxu3 }
 0x3ed   : > { %v4527_v22 = vpop.eup %4526  ;;  %4530 = vpow2.f32 %v1581_v15  ;;  %v3169_v62 = vadd.f32 %v7511_v40, %v3168_v25 }
 0x3ee   : > { %v2207_v53 = vpop.xlane.xlu1 %2206  ;;  %v2479_v49 = vmul.f32 %v4527_v22, %v7255_v13  ;;  %v2480_v42 = vmul.f32 %v4527_v22, %v7259_v36  ;;  %4532 = vpow2.f32 %v1583_v59  ;;  %v3338_v58 = vadd.f32 %v3337_v2, %v3009_v39  ;;  %v4529_v13 = vpop.eup %4528 }
 0x3ef   : > { %v3498_v18 = vadd.f32 %v3497_v24, %v3169_v62  ;;  %4534 = vrcp.f32 %v2207_v53 }
 0x3f0   : > { %v1082_v45 = vpop.xlane.xlu2 %1081  ;;  %v2691_v48 = vpack.c.bf16 %v2479_v49, %v2477_v56  ;;  %v2692_v7 = vpack.c.bf16 %v2480_v42, %v2478_v32  ;;  %3604 = vst.msk [vmem:[%s6173_s11 + $0x120] sm:$0xff] %vm3567_vm0, %v3338_v58  ;;  %v1085_v25 = vpop.xlane.xlu0 %1084  ;;  %4536 = vrcp.f32 %v2015_v33  ;;  %v2612_v49 = vmul.f32 %v4529_v13, %v7229_v34 }
 0x3f1   : > { %v1347_v17 = vsub.f32 %v7289_v10, %v1082_v45  ;;  %v1348_v15 = vsub.f32 %v7292_v4, %v1082_v45  ;;  %3668 = vst.msk [vmem:[%s6173_s11 + $0x320] sm:$0xff] %vm3567_vm0, %v3498_v18  ;;  %v1349_v36 = vsub.f32 %v7278_v41, %v1085_v25  ;;  %v1350_v22 = vsub.f32 %v7281_v35, %v1085_v25 }
 0x3f2   : > { %3022 = vmatmul.bf16.gmra.mxu0 %v2691_v48  ;;  %3351 = vmatmul.bf16.gmra.mxu1 %v2692_v7  ;;  %4538 = vrcp.f32 %v7540_v5  ;;  %v2611_v35 = vmul.f32 %v4529_v13, %v7225_v16 }
 0x3f3   : > { %v1837_v2 = vmul.f32 1.442695, %v1347_v17  ;;  %v1839_v39 = vmul.f32 1.442695, %v1348_v15  ;;  %1096 = vmax.xlane.f32.xlu1 %v1095_v44  ;;  %v7595_v59 = vpop.eup %4530  ;;  %v1841_v10 = vmul.f32 1.442695, %v1349_v36  ;;  %v3010_v56 = vpop.f32.mrf.mxu0 }
 0x3f4   : > { %v1843_v4 = vmul.f32 1.442695, %v1350_v22  ;;  %v7598_v32 = vpop.eup %4532  ;;  %v3170_v62 = vpop.f32.mrf.mxu2  ;;  %v3011_v41 = vadd.f32 %v7511_v40, %v3010_v56 }
 0x3f5   : > { %4540 = vpow2.f32 %v1837_v2  ;;  %v4535_v48 = vpop.eup %4534  ;;  %v3171_v33 = vadd.f32 %v7511_v40, %v3170_v62  ;;  %v2040_v24 = vadd.f32 %v7598_v32, %v7595_v59  ;;  %v3339_v5 = vpop.f32.mrf.mxu1 }
 0x3f6   : > { %4542 = vpow2.f32 %v1839_v39  ;;  %v884_v53 = vpop.xlane.xlu1 %883  ;;  %v3499_v42 = vpop.f32.mrf.mxu3  ;;  %v3340_v16 = vadd.f32 %v3339_v5, %v3011_v41  ;;  %v2609_v7 = vmul.f32 %v4535_v48, %v7294_v21  ;;  %v2610_v17 = vmul.f32 %v4535_v48, %v7298_v63  ;;  %v8663_v48 = vld [vmem:[#allocation47_spill] sm:$0xff] }
 0x3f7   : > { %4544 = vpow2.f32 %v1841_v10  ;;  %v1215_v58 = vsub.f32 %v7314_v30, %v884_v53  ;;  %v1216_v44 = vsub.f32 %v7317_v1, %v884_v53  ;;  %v3500_v18 = vadd.f32 %v3499_v42, %v3171_v33  ;;  %2041 = vadd.xlane.f32.xlu2 %v2040_v24  ;;  %v4537_v15 = vpop.eup %4536  ;;  %v338_v24 = vld [vmem:[%s4929_s14 + $0x3d0] sm:$0xff]  ;;  %v339_v53 = vld [vmem:[%s4929_s14 + $0x3d8] sm:$0xff] }
 0x3f8   : > { %4546 = vpow2.f32 %v1843_v4  ;;  %v887_v45 = vpop.xlane.xlu2 %886  ;;  %3605 = vst.msk [vmem:[%s6173_s11 + $0x128] sm:$0xff] %vm3567_vm0, %v3340_v16  ;;  %v7614_v1 = vpop.xlane.xlu0 %2221  ;;  %v2757_v22 = vpack.c.bf16 %v2611_v35, %v2609_v7  ;;  %v2758_v2 = vpack.c.bf16 %v2612_v49, %v2610_v17  ;;  %v7646_v7 = vmul.f32 %v4945_v6, %v339_v53 }
 0x3f9   : > { %v1573_v25 = vmul.f32 1.442695, %v1215_v58  ;;  %v1575_v36 = vmul.f32 1.442695, %v1216_v44  ;;  %v1217_v34 = vsub.f32 %v7323_v61, %v887_v45  ;;  %v1218_v30 = vsub.f32 %v7326_v37, %v887_v45  ;;  %v4539_v13 = vpop.eup %4538  ;;  %3669 = vst.msk [vmem:[%s6173_s11 + $0x328] sm:$0xff] %vm3567_vm0, %v3500_v18 }
 0x3fa   : > { %3187 = vmatmul.bf16.gmra.mxu2 %v2757_v22  ;;  %3516 = vmatmul.bf16.gmra.mxu3 %v2758_v2  ;;  %v2481_v61 = vmul.f32 %v4537_v15, %v7262_v55  ;;  %v2482_v37 = vmul.f32 %v4537_v15, %v7269_v50  ;;  %v2483_v35 = vmul.f32 %v4539_v13, %v7205_v12 }
 0x3fb   : > { %v7618_v39 = vpop.eup %4540  ;;  %4548 = vpow2.f32 %v1573_v25  ;;  %v1577_v21 = vmul.f32 1.442695, %v1217_v34  ;;  %v1579_v63 = vmul.f32 1.442695, %v1218_v30  ;;  %v2484_v33 = vmul.f32 %v4539_v13, %v8663_v48  ;;  %v466_v34 = vld [vmem:[%s4929_s14 + $0x7d0] sm:$0xff]  ;;  %v467_v30 = vld [vmem:[%s4929_s14 + $0x7d8] sm:$0xff] }
 0x3fc   : > { %v7620_v10 = vpop.eup %4542  ;;  %4550 = vpow2.f32 %v1575_v36  ;;  %v2693_v42 = vpack.c.bf16 %v2483_v35, %v2481_v61  ;;  %v7643_v45 = vmul.f32 %v4945_v6, %v338_v24  ;;  %v7668_v35 = vmul.f32 %v4945_v6, %v466_v34 }
 0x3fd   : > { %v7624_v4 = vpop.eup %4544  ;;  %4552 = vpow2.f32 %v1577_v21  ;;  %v2232_v56 = vadd.f32 %v7620_v10, %v7618_v39  ;;  %v2694_v58 = vpack.c.bf16 %v2484_v33, %v2482_v37  ;;  %v468_v21 = vld [vmem:[%s4929_s14 + $0x7e0] sm:$0xff]  ;;  %v7671_v48 = vmul.f32 %v4945_v6, %v467_v30 }
 0x3fe   : > { %v7628_v62 = vpop.eup %4546  ;;  %4554 = vpow2.f32 %v1579_v63  ;;  %v1079_v41 = vpop.xlane.xlu1 %1078  ;;  %v912_v2 = vmax.f32 %v7643_v45, %v7646_v7  ;;  %v469_v63 = vld [vmem:[%s4929_s14 + $0x7e8] sm:$0xff]  ;;  %v7674_v33 = vmul.f32 %v4945_v6, %v468_v21  ;;  %v336_v30 = vld [vmem:[%s4929_s14 + $0x3c0] sm:$0xff] }
 0x3ff   : > { %2233 = vadd.xlane.f32.xlu1 %v2232_v56  ;;  %v2235_v55 = vadd.f32 %v7628_v62, %v7624_v4  ;;  %v1345_v50 = vsub.f32 %v7353_v9, %v1079_v41  ;;  %v1346_v5 = vsub.f32 %v7356_v26, %v1079_v41  ;;  %v7677_v24 = vmul.f32 %v4945_v6, %v469_v63 }
 0x400   : > { %v2024_v49 = vpop.xlane.xlu2 %2023  ;;  %v1104_v34 = vmax.f32 %v7668_v35, %v7671_v48 }
 0x401   : > { %v7638_v44 = vpop.eup %4548  ;;  %2236 = vadd.xlane.f32.xlu2 %v2235_v55  ;;  %v1833_v12 = vmul.f32 1.442695, %v1345_v50  ;;  %v1835_v16 = vmul.f32 1.442695, %v1346_v5  ;;  %v7640_v18 = vpop.xlane.xlu0 %2026 }
 0x402   : > { %v7648_v9 = vpop.eup %4550  ;;  %3027 = vmatmul.bf16.gmra.mxu0 %v2693_v42  ;;  %3356 = vmatmul.bf16.gmra.mxu1 %v2694_v58 }
 0x403   : > { %v7650_v26 = vpop.eup %4552  ;;  %4556 = vpow2.f32 %v1833_v12  ;;  %v2034_v17 = vadd.f32 %v7648_v9, %v7638_v44 }
 0x404   : > { %v7654_v15 = vpop.eup %4554  ;;  %4558 = vpow2.f32 %v1835_v16  ;;  %v3173_v25 = vpop.f32.mrf.mxu2  ;;  %v334_v16 = vld [vmem:[%s4929_s14 + $0x3b0] sm:$0xff] }
 0x405   : > { %v3502_v36 = vpop.f32.mrf.mxu3  ;;  %4560 = vrcp.f32 %v7553_v28  ;;  %2035 = vadd.xlane.f32.xlu0 %v2034_v17  ;;  %v3174_v13 = vadd.f32 %v7511_v40, %v3173_v25  ;;  %v2037_v22 = vadd.f32 %v7654_v15, %v7650_v26  ;;  %v3013_v61 = vpop.f32.mrf.mxu0  ;;  %v335_v17 = vld [vmem:[%s4929_s14 + $0x3b8] sm:$0xff] }
 0x406   : > { %v3342_v37 = vpop.f32.mrf.mxu1  ;;  %v2216_v41 = vpop.xlane.xlu1 %2215  ;;  %v3014_v28 = vadd.f32 %v7511_v40, %v3013_v61  ;;  %v7701_v61 = vmul.f32 %v4945_v6, %v334_v16 }
 0x407   : > { %v3503_v56 = vadd.f32 %v3502_v36, %v3174_v13  ;;  %2038 = vadd.xlane.f32.xlu1 %v2037_v22  ;;  %4562 = vrcp.f32 %v2216_v41  ;;  %v337_v13 = vld [vmem:[%s4929_s14 + $0x3c8] sm:$0xff] }
 0x408   : > { %v3343_v55 = vadd.f32 %v3342_v37, %v3014_v28  ;;  %v2219_v50 = vpop.xlane.xlu2 %2218  ;;  %4564 = vrcp.f32 %v2024_v49  ;;  %v7704_v37 = vmul.f32 %v4945_v6, %v335_v17  ;;  %v8664_v28 = vld [vmem:[#allocation37_spill] sm:$0xff]  ;;  %v7711_v49 = vmul.f32 %v4945_v6, %v337_v13 }
 0x409   : > { %v7679_v53 = vpop.eup %4556  ;;  %3670 = vst.msk [vmem:[%s6173_s11 + $0x330] sm:$0xff] %vm3567_vm0, %v3503_v56  ;;  %913 = vmax.xlane.f32.xlu2 %v912_v2  ;;  %v1094_v5 = vpop.xlane.xlu0 %1093 }
 0x40a   : > { %v7683_v42 = vpop.eup %4558  ;;  %v1355_v58 = vsub.f32 %v7396_v8, %v1094_v5  ;;  %v1356_v12 = vsub.f32 %v7399_v20, %v1094_v5  ;;  %3606 = vst.msk [vmem:[%s6173_s11 + $0x130] sm:$0xff] %vm3567_vm0, %v3343_v55  ;;  %v1107_v8 = vmax.f32 %v7674_v33, %v7677_v24  ;;  %v7708_v5 = vmul.f32 %v4945_v6, %v336_v30 }
 0x40b   : > { %v4561_v25 = vpop.eup %4560  ;;  %v2229_v36 = vadd.f32 %v7683_v42, %v7679_v53 }
 0x40c   : > { %v1853_v22 = vmul.f32 1.442695, %v1355_v58  ;;  %v1855_v2 = vmul.f32 1.442695, %v1356_v12  ;;  %v3175_v21 = vpop.f32.mrf.mxu2  ;;  %v2613_v55 = vmul.f32 %v4561_v25, %v8664_v28 }
 0x40d   : > { %v3504_v63 = vpop.f32.mrf.mxu3  ;;  %2230 = vadd.xlane.f32.xlu0 %v2229_v36  ;;  %v3176_v20 = vadd.f32 %v7511_v40, %v3175_v21  ;;  %v4563_v56 = vpop.eup %4562 }
 0x40e   : > { %4566 = vpow2.f32 %v1853_v22  ;;  %v3015_v41 = vpop.f32.mrf.mxu0  ;;  %v2021_v12 = vpop.xlane.xlu1 %2020  ;;  %v2615_v17 = vmul.f32 %v4563_v56, %v7401_v46  ;;  %v8665_v22 = vld [vmem:[#allocation39_spill] sm:$0xff]  ;;  %v2616_v30 = vmul.f32 %v4563_v56, %v7403_v19  ;;  %v464_v19 = vld [vmem:[%s4929_s14 + $0x7c0] sm:$0xff] }
 0x40f   : > { %4568 = vpow2.f32 %v1855_v2  ;;  %v3505_v58 = vadd.f32 %v3504_v63, %v3176_v20  ;;  %1105 = vmax.xlane.f32.xlu1 %v1104_v34  ;;  %v3016_v16 = vadd.f32 %v7511_v40, %v3015_v41  ;;  %v3344_v36 = vpop.f32.mrf.mxu1  ;;  %v2614_v21 = vmul.f32 %v4561_v25, %v8665_v22  ;;  %v465_v56 = vld [vmem:[%s4929_s14 + $0x7c8] sm:$0xff] }
 0x410   : > { %4570 = vrcp.f32 %v2021_v12  ;;  %v896_v2 = vpop.xlane.xlu2 %895  ;;  %v2759_v63 = vpack.c.bf16 %v2615_v17, %v2613_v55  ;;  %v906_v20 = vmax.f32 %v7701_v61, %v7704_v37  ;;  %v4565_v12 = vpop.eup %4564  ;;  %v909_v55 = vmax.f32 %v7708_v5, %v7711_v49 }
 0x411   : > { %3671 = vst.msk [vmem:[%s6173_s11 + $0x338] sm:$0xff] %vm3567_vm0, %v3505_v58  ;;  %1108 = vmax.xlane.f32.xlu2 %v1107_v8  ;;  %v3345_v13 = vadd.f32 %v3344_v36, %v3016_v16  ;;  %v899_v34 = vpop.xlane.xlu0 %898  ;;  %v1223_v46 = vsub.f32 %v7426_v14, %v896_v2  ;;  %v1224_v41 = vsub.f32 %v7429_v38, %v896_v2  ;;  %4572 = vrcp.f32 %v7614_v1 }
 0x412   : > { %v1225_v28 = vsub.f32 %v7420_v27, %v899_v34  ;;  %v1226_v25 = vsub.f32 %v7423_v57, %v899_v34  ;;  %3192 = vmatmul.bf16.gmra.mxu2 %v2759_v63  ;;  %v2760_v8 = vpack.c.bf16 %v2616_v30, %v2614_v21  ;;  %4574 = vrcp.f32 %v2219_v50 }
 0x413   : > { %3607 = vst.msk [vmem:[%s6173_s11 + $0x138] sm:$0xff] %vm3567_vm0, %v3345_v13  ;;  %v1589_v14 = vmul.f32 1.442695, %v1223_v46  ;;  %v1591_v38 = vmul.f32 1.442695, %v1224_v41  ;;  %v7738_v22 = vmul.f32 %v4945_v6, %v464_v19  ;;  %v7741_v21 = vmul.f32 %v4945_v6, %v465_v56 }
 0x414   : > { %v7732_v58 = vpop.eup %4566  ;;  %v1593_v27 = vmul.f32 1.442695, %v1225_v28  ;;  %v3178_v16 = vpop.f32.mrf.mxu2  ;;  %v1595_v36 = vmul.f32 1.442695, %v1226_v25  ;;  %3521 = vmatmul.bf16.gmra.mxu3 %v2760_v8  ;;  %v2487_v13 = vmul.f32 %v4565_v12, %v7372_v51  ;;  %v2488_v2 = vmul.f32 %v4565_v12, %v7374_v47 }
 0x415   : > { %8666 = vst [vmem:[#allocation62_spill] sm:$0xff] %v7732_v58  ;;  %v3507_v57 = vpop.f32.mrf.mxu3  ;;  %v7734_v17 = vpop.eup %4568  ;;  %907 = vmax.xlane.f32.xlu0 %v906_v20  ;;  %v3179_v1 = vadd.f32 %v7511_v40, %v3178_v16  ;;  %4576 = vpow2.f32 %v1589_v14  ;;  %v1101_v56 = vmax.f32 %v7738_v22, %v7741_v21 }
 0x416   : > { %8667 = vst [vmem:[#allocation42_spill] sm:$0xff] %v7734_v17  ;;  %v4571_v30 = vpop.eup %4570  ;;  %v2244_v50 = vadd.f32 %v7734_v17, %v7732_v58  ;;  %4578 = vpow2.f32 %v1591_v38  ;;  %v1088_v63 = vpop.xlane.xlu1 %1087 }
 0x417   : > { %910 = vmax.xlane.f32.xlu1 %v909_v55  ;;  %v3508_v34 = vadd.f32 %v3507_v57, %v3179_v1  ;;  %v2485_v20 = vmul.f32 %v4571_v30, %v7431_v54  ;;  %v2486_v46 = vmul.f32 %v4571_v30, %v7433_v29  ;;  %4580 = vpow2.f32 %v1593_v27  ;;  %v4573_v25 = vpop.eup %4572  ;;  %v8668_v55 = vld [vmem:[#allocation10_spill] sm:$0xff] }
 0x418   : > { %v1351_v41 = vsub.f32 %v7446_v52, %v1088_v63  ;;  %v1352_v28 = vsub.f32 %v7449_v0, %v1088_v63  ;;  %4582 = vpow2.f32 %v1595_v36  ;;  %v1091_v51 = vpop.xlane.xlu2 %1090  ;;  %v4575_v12 = vpop.eup %4574  ;;  %v8669_v36 = vld [vmem:[#allocation13_spill] sm:$0xff]  ;;  %v8672_v63 = vld [vmem:[#allocation27_spill] sm:$0xff] }
 0x419   : > { %3672 = vst.msk [vmem:[%s6173_s11 + $0x340] sm:$0xff] %vm3567_vm0, %v3508_v34  ;;  %2245 = vadd.xlane.f32.xlu2 %v2244_v50  ;;  %v2695_v47 = vpack.c.bf16 %v2487_v13, %v2485_v20  ;;  %v2696_v19 = vpack.c.bf16 %v2488_v2, %v2486_v46  ;;  %v1353_v29 = vsub.f32 %v7452_v23, %v1091_v51  ;;  %v8673_v46 = vld [vmem:[#allocation50_spill] sm:$0xff] }
 0x41a   : > { %v1845_v54 = vmul.f32 1.442695, %v1351_v41  ;;  %v1847_v8 = vmul.f32 1.442695, %v1352_v28  ;;  %v1354_v52 = vsub.f32 %v8668_v55, %v1091_v51  ;;  %v2617_v1 = vmul.f32 %v4575_v12, %v8669_v36  ;;  %v8674_v51 = vld [vmem:[#allocation51_spill] sm:$0xff] }
 0x41b   : > { %3032 = vmatmul.bf16.gmra.mxu0 %v2695_v47  ;;  %3361 = vmatmul.bf16.gmra.mxu1 %v2696_v19  ;;  %v7757_v0 = vpop.eup %4576  ;;  %v1849_v14 = vmul.f32 1.442695, %v1353_v29  ;;  %v2619_v20 = vmul.f32 %v4573_v25, %v8672_v63  ;;  %v2618_v41 = vmul.f32 %v4575_v12, %v8673_v46  ;;  %v8675_v19 = vld [vmem:[#allocation29_spill] sm:$0xff] }
 0x41c   : > { %4584 = vpow2.f32 %v1845_v54  ;;  %v1851_v38 = vmul.f32 1.442695, %v1354_v52  ;;  %v3180_v27 = vpop.f32.mrf.mxu2  ;;  %v7759_v16 = vpop.eup %4578  ;;  %v471_v46 = vld [vmem:[%s4929_s14 + $0x7f8] sm:$0xff] }
 0x41d   : > { %4586 = vpow2.f32 %v1847_v8  ;;  %1102 = vmax.xlane.f32.xlu0 %v1101_v56  ;;  %v3181_v57 = vadd.f32 %v7511_v40, %v3180_v27  ;;  %v7763_v23 = vpop.eup %4580  ;;  %v3509_v30 = vpop.f32.mrf.mxu3  ;;  %v2046_v50 = vadd.f32 %v7759_v16, %v7757_v0  ;;  %v2761_v54 = vpack.c.bf16 %v2619_v20, %v2617_v1  ;;  %v8676_v8 = vld [vmem:[#allocation46_spill] sm:$0xff]  ;;  %v343_v1 = vld [vmem:[%s4929_s14 + $0x3f8] sm:$0xff]  ;;  %v470_v20 = vld [vmem:[%s4929_s14 + $0x7f0] sm:$0xff] }
 0x41e   : > { %8670 = vst [vmem:[#allocation26_spill] sm:$0xff] %v7763_v23  ;;  %4588 = vpow2.f32 %v1849_v14  ;;  %v7767_v13 = vpop.eup %4582  ;;  %v893_v34 = vpop.xlane.xlu1 %892  ;;  %v2620_v29 = vmul.f32 %v4573_v25, %v8676_v8  ;;  %v342_v25 = vld [vmem:[%s4929_s14 + $0x3f0] sm:$0xff]  ;;  %v341_v8 = vld [vmem:[%s4929_s14 + $0x3e8] sm:$0xff] }
 0x41f   : > { %8671 = vst [vmem:[#allocation12_spill] sm:$0xff] %v7767_v13  ;;  %4590 = vpow2.f32 %v1851_v38  ;;  %v3510_v2 = vadd.f32 %v3509_v30, %v3181_v57  ;;  %2047 = vadd.xlane.f32.xlu1 %v2046_v50  ;;  %v2049_v28 = vadd.f32 %v7767_v13, %v7763_v23  ;;  %v1221_v47 = vsub.f32 %v8674_v51, %v893_v34 }
 0x420   : > { %v1222_v56 = vsub.f32 %v8675_v19, %v893_v34  ;;  %v2762_v38 = vpack.c.bf16 %v2620_v29, %v2618_v41  ;;  %v7793_v50 = vmul.f32 %v4945_v6, %v342_v25  ;;  %v7809_v51 = vmul.f32 %v4945_v6, %v470_v20 }
 0x421   : > { %3673 = vst.msk [vmem:[%s6173_s11 + $0x348] sm:$0xff] %vm3567_vm0, %v3510_v2  ;;  %2050 = vadd.xlane.f32.xlu2 %v2049_v28  ;;  %v1585_v52 = vmul.f32 1.442695, %v1221_v47  ;;  %v7796_v2 = vmul.f32 %v4945_v6, %v343_v1  ;;  %v7812_v47 = vmul.f32 %v4945_v6, %v471_v46  ;;  %v8679_v1 = vld [vmem:[#allocation17_spill] sm:$0xff] }
 0x422   : > { %v7778_v55 = vpop.eup %4584  ;;  %v1587_v12 = vmul.f32 1.442695, %v1222_v56  ;;  %3197 = vmatmul.bf16.gmra.mxu2 %v2761_v54  ;;  %v340_v54 = vld [vmem:[%s4929_s14 + $0x3e0] sm:$0xff] }
 0x423   : > { %v7780_v14 = vpop.eup %4586  ;;  %4592 = vpow2.f32 %v1585_v52  ;;  %v918_v28 = vmax.f32 %v7793_v50, %v7796_v2  ;;  %v1110_v56 = vmax.f32 %v7809_v51, %v7812_v47  ;;  %v7819_v29 = vmul.f32 %v4945_v6, %v340_v54 }
 0x424   : > { %v7782_v27 = vpop.eup %4588  ;;  %v2238_v57 = vadd.f32 %v7780_v14, %v7778_v55  ;;  %4594 = vpow2.f32 %v1587_v12  ;;  %3526 = vmatmul.bf16.gmra.mxu3 %v2762_v38  ;;  %v7822_v52 = vmul.f32 %v4945_v6, %v341_v8 }
 0x425   : > { %v7786_v36 = vpop.eup %4590  ;;  %8677 = vst [vmem:[#allocation63_spill] sm:$0xff] %v7819_v29 }
 0x426   : > { %2239 = vadd.xlane.f32.xlu0 %v2238_v57  ;;  %v2241_v30 = vadd.f32 %v7786_v36, %v7782_v27  ;;  %8678 = vst [vmem:[#allocation64_spill] sm:$0xff] %v7822_v52  ;;  %v915_v38 = vmax.f32 %v7819_v29, %v7822_v52  ;;  %v8690_v52 = vld [vmem:[#allocation54_spill] sm:$0xff] }
 0x428   : > { %2242 = vadd.xlane.f32.xlu1 %v2241_v30 }
 0x429   : > { %v7798_v34 = vpop.eup %4592 }
 0x42a   : > { %v7800_v63 = vpop.eup %4594 }
 0x42b   : > { %v2043_v41 = vadd.f32 %v7800_v63, %v7798_v34 }
 0x42e   : > { %2044 = vadd.xlane.f32.xlu0 %v2043_v41  ;;  %v2228_v19 = vpop.xlane.xlu2 %2227 }
 0x430   : > { %919 = vmax.xlane.f32.xlu1 %v918_v28 }
 0x436   : > { %1111 = vmax.xlane.f32.xlu0 %v1110_v56  ;;  %v7824_v12 = vpop.xlane.xlu2 %2032 }
 0x43e   : > { %916 = vmax.xlane.f32.xlu0 %v915_v38  ;;  %v1100_v57 = vpop.xlane.xlu2 %1099 }
 0x43f   : > { %v1359_v25 = vsub.f32 %v7506_v3, %v1100_v57  ;;  %v1360_v30 = vsub.f32 %v8679_v1, %v1100_v57 }
 0x441   : > { %v1861_v20 = vmul.f32 1.442695, %v1359_v25  ;;  %v1863_v46 = vmul.f32 1.442695, %v1360_v30 }
 0x443   : > { %4596 = vpow2.f32 %v1861_v20  ;;  %v3018_v41 = vpop.f32.mrf.mxu0  ;;  %v3347_v28 = vpop.f32.mrf.mxu1 }
 0x444   : > { %4598 = vpow2.f32 %v1863_v46  ;;  %v3019_v6 = vadd.f32 %v7511_v40, %v3018_v41 }
 0x445   : > { %4600 = vrcp.f32 %v7640_v18 }
 0x446   : > { %v3348_v56 = vadd.f32 %v3347_v28, %v3019_v6  ;;  %v8682_v6 = vld [vmem:[#allocation43_spill] sm:$0xff] }
 0x448   : > { %3608 = vst.msk [vmem:[%s6173_s11 + $0x140] sm:$0xff] %vm3567_vm0, %v3348_v56 }
 0x449   : > { %v7833_v54 = vpop.eup %4596 }
 0x44a   : > { %8680 = vst [vmem:[#allocation57_spill] sm:$0xff] %v7833_v54  ;;  %v7836_v8 = vpop.eup %4598 }
 0x44b   : > { %8681 = vst [vmem:[#allocation59_spill] sm:$0xff] %v7836_v8  ;;  %v2250_v3 = vadd.f32 %v7836_v8, %v7833_v54  ;;  %v3020_v57 = vpop.f32.mrf.mxu0  ;;  %v3349_v1 = vpop.f32.mrf.mxu1 }
 0x44c   : > { %v2030_v38 = vpop.xlane.xlu1 %2029  ;;  %v3021_v25 = vadd.f32 %v7511_v40, %v3020_v57  ;;  %v4601_v20 = vpop.eup %4600  ;;  %v8683_v57 = vld [vmem:[#allocation30_spill] sm:$0xff] }
 0x44d   : > { %4602 = vrcp.f32 %v2030_v38  ;;  %2251 = vadd.xlane.f32.xlu2 %v2250_v3  ;;  %v2489_v56 = vmul.f32 %v4601_v20, %v8682_v6  ;;  %v2490_v3 = vmul.f32 %v4601_v20, %v8683_v57  ;;  %v8684_v6 = vld [vmem:[#allocation48_spill] sm:$0xff]  ;;  %v905_v57 = vpop.xlane.xlu2 %904 }
 0x44e   : > { %v3350_v30 = vadd.f32 %v3349_v1, %v3021_v25  ;;  %4604 = vrcp.f32 %v2228_v19  ;;  %v1229_v29 = vsub.f32 %v8690_v52, %v905_v57 }
 0x450   : > { %3609 = vst.msk [vmem:[%s6173_s11 + $0x148] sm:$0xff] %vm3567_vm0, %v3350_v30 }
 0x451   : > { %v3183_v46 = vpop.f32.mrf.mxu2  ;;  %v3512_v41 = vpop.f32.mrf.mxu3 }
 0x452   : > { %v3184_v18 = vadd.f32 %v7511_v40, %v3183_v46 }
 0x453   : > { %v4603_v28 = vpop.eup %4602 }
 0x454   : > { %v3513_v8 = vadd.f32 %v3512_v41, %v3184_v18  ;;  %v2225_v54 = vpop.xlane.xlu1 %2224  ;;  %v2491_v38 = vmul.f32 %v4603_v28, %v7536_v11  ;;  %v2492_v13 = vmul.f32 %v4603_v28, %v7538_v60  ;;  %v4605_v30 = vpop.eup %4604  ;;  %v8685_v60 = vld [vmem:[#allocation49_spill] sm:$0xff] }
 0x455   : > { %4606 = vrcp.f32 %v2225_v54  ;;  %v2623_v11 = vmul.f32 %v4605_v30, %v8684_v6  ;;  %v8686_v28 = vld [vmem:[#allocation53_spill] sm:$0xff] }
 0x456   : > { %3674 = vst.msk [vmem:[%s6173_s11 + $0x350] sm:$0xff] %vm3567_vm0, %v3513_v8  ;;  %v2697_v25 = vpack.c.bf16 %v2491_v38, %v2489_v56  ;;  %v2698_v1 = vpack.c.bf16 %v2492_v13, %v2490_v3  ;;  %v8687_v56 = vld [vmem:[#allocation22_spill] sm:$0xff]  ;;  %v8688_v38 = vld [vmem:[#allocation28_spill] sm:$0xff] }
 0x457   : > { %v2624_v13 = vmul.f32 %v4605_v30, %v8687_v56 }
 0x458   : > { %3037 = vmatmul.bf16.gmra.mxu0 %v2697_v25  ;;  %3366 = vmatmul.bf16.gmra.mxu1 %v2698_v1  ;;  %v8689_v25 = vld [vmem:[#allocation41_spill] sm:$0xff] }
 0x459   : > { %v3185_v19 = vpop.f32.mrf.mxu2  ;;  %v3514_v18 = vpop.f32.mrf.mxu3 }
 0x45a   : > { %v3186_v46 = vadd.f32 %v7511_v40, %v3185_v19  ;;  %v8691_v19 = vld [vmem:[#allocation52_spill] sm:$0xff] }
 0x45b   : > { %v4607_v41 = vpop.eup %4606  ;;  %v1230_v17 = vsub.f32 %v8691_v19, %v905_v57 }
 0x45c   : > { %v3515_v23 = vadd.f32 %v3514_v18, %v3186_v46  ;;  %v902_v20 = vpop.xlane.xlu1 %901  ;;  %v2621_v54 = vmul.f32 %v4607_v41, %v8685_v60  ;;  %v2622_v8 = vmul.f32 %v4607_v41, %v8686_v28  ;;  %v1601_v41 = vmul.f32 1.442695, %v1229_v29 }
 0x45d   : > { %v1227_v3 = vsub.f32 %v8688_v38, %v902_v20  ;;  %v1228_v1 = vsub.f32 %v8689_v25, %v902_v20  ;;  %v1603_v30 = vmul.f32 1.442695, %v1230_v17 }
 0x45e   : > { %3675 = vst.msk [vmem:[%s6173_s11 + $0x358] sm:$0xff] %vm3567_vm0, %v3515_v23  ;;  %v2763_v6 = vpack.c.bf16 %v2623_v11, %v2621_v54  ;;  %v2764_v46 = vpack.c.bf16 %v2624_v13, %v2622_v8 }
 0x45f   : > { %v1597_v18 = vmul.f32 1.442695, %v1227_v3  ;;  %v1599_v58 = vmul.f32 1.442695, %v1228_v1 }
 0x460   : > { %3202 = vmatmul.bf16.gmra.mxu2 %v2763_v6  ;;  %3531 = vmatmul.bf16.gmra.mxu3 %v2764_v46 }
 0x461   : > { %4608 = vpow2.f32 %v1597_v18 }
 0x462   : > { %4610 = vpow2.f32 %v1599_v58 }
 0x463   : > { %4612 = vpow2.f32 %v1601_v41 }
 0x464   : > { %4614 = vpow2.f32 %v1603_v30 }
 0x466   : > { %v1097_v60 = vpop.xlane.xlu1 %1096 }
 0x467   : > { %v1357_v20 = vsub.f32 %v7574_v31, %v1097_v60  ;;  %v1358_v52 = vsub.f32 %v7577_v43, %v1097_v60  ;;  %v7863_v23 = vpop.eup %4608 }
 0x468   : > { %v7865_v54 = vpop.eup %4610 }
 0x469   : > { %v1857_v57 = vmul.f32 1.442695, %v1357_v20  ;;  %v1859_v11 = vmul.f32 1.442695, %v1358_v52  ;;  %v2052_v58 = vadd.f32 %v7865_v54, %v7863_v23  ;;  %v7869_v17 = vpop.eup %4612 }
 0x46a   : > { %v2042_v28 = vpop.xlane.xlu2 %2041  ;;  %8692 = vst [vmem:[#allocation60_spill] sm:$0xff] %v7869_v17  ;;  %v7871_v31 = vpop.eup %4614 }
 0x46b   : > { %4616 = vpow2.f32 %v1857_v57  ;;  %2053 = vadd.xlane.f32.xlu0 %v2052_v58  ;;  %8693 = vst [vmem:[#allocation58_spill] sm:$0xff] %v7871_v31  ;;  %v2055_v13 = vadd.f32 %v7871_v31, %v7869_v17 }
 0x46c   : > { %4618 = vpow2.f32 %v1859_v11 }
 0x46d   : > { %4620 = vrcp.f32 %v7824_v12 }
 0x46f   : > { %v3023_v43 = vpop.f32.mrf.mxu0  ;;  %v3352_v29 = vpop.f32.mrf.mxu1 }
 0x470   : > { %v3024_v8 = vadd.f32 %v7511_v40, %v3023_v43  ;;  %v8696_v43 = vld [vmem:[#allocation20_spill] sm:$0xff] }
 0x471   : > { %v7874_v56 = vpop.eup %4616 }
 0x472   : > { %8694 = vst [vmem:[#allocation61_spill] sm:$0xff] %v7874_v56  ;;  %v7878_v38 = vpop.eup %4618  ;;  %v2234_v3 = vpop.xlane.xlu1 %2233  ;;  %v3353_v25 = vadd.f32 %v3352_v29, %v3024_v8 }
 0x473   : > { %8695 = vst [vmem:[#allocation66_spill] sm:$0xff] %v7878_v38  ;;  %v2247_v1 = vadd.f32 %v7878_v38, %v7874_v56  ;;  %2056 = vadd.xlane.f32.xlu0 %v2055_v13  ;;  %v4621_v20 = vpop.eup %4620 }
 0x474   : > { %3610 = vst.msk [vmem:[%s6173_s11 + $0x150] sm:$0xff] %vm3567_vm0, %v3353_v25  ;;  %v7884_v19 = vpop.xlane.xlu2 %2236  ;;  %v2493_v29 = vmul.f32 %v4621_v20, %v8696_v43 }
 0x475   : > { %2248 = vadd.xlane.f32.xlu1 %v2247_v1  ;;  %v8697_v1 = vld [vmem:[#allocation19_spill] sm:$0xff] }
 0x477   : > { %v3025_v6 = vpop.f32.mrf.mxu0  ;;  %v3354_v46 = vpop.f32.mrf.mxu1 }
 0x478   : > { %v3026_v18 = vadd.f32 %v7511_v40, %v3025_v6  ;;  %v2036_v41 = vpop.xlane.xlu0 %2035  ;;  %v2494_v6 = vmul.f32 %v4621_v20, %v8697_v1 }
 0x479   : > { %4622 = vrcp.f32 %v2036_v41 }
 0x47a   : > { %v2039_v30 = vpop.xlane.xlu1 %2038  ;;  %v3355_v60 = vadd.f32 %v3354_v46, %v3026_v18  ;;  %4624 = vrcp.f32 %v2234_v3 }
 0x47c   : > { %3611 = vst.msk [vmem:[%s6173_s11 + $0x158] sm:$0xff] %vm3567_vm0, %v3355_v60  ;;  %v7890_v52 = vpop.xlane.xlu2 %913 }
 0x47d   : > { %v3188_v11 = vpop.f32.mrf.mxu2  ;;  %v3517_v58 = vpop.f32.mrf.mxu3 }
 0x47e   : > { %v3189_v12 = vadd.f32 %v7511_v40, %v3188_v11 }
 0x47f   : > { %v4623_v57 = vpop.eup %4622  ;;  %v3028_v8 = vpop.f32.mrf.mxu0 }
 0x480   : > { %v3357_v13 = vpop.f32.mrf.mxu1  ;;  %v2495_v25 = vmul.f32 %v4623_v57, %v7638_v44  ;;  %v2496_v46 = vmul.f32 %v4623_v57, %v7648_v9  ;;  %v3029_v18 = vadd.f32 %v7511_v40, %v3028_v8  ;;  %v2231_v41 = vpop.xlane.xlu0 %2230  ;;  %v3518_v60 = vadd.f32 %v3517_v58, %v3189_v12  ;;  %v7906_v57 = vld [vmem:[#allocation6] ss:$0 sm:$0xff] }
 0x481   : > { %4626 = vrcp.f32 %v2231_v41 }
 0x482   : > { %v1106_v31 = vpop.xlane.xlu1 %1105  ;;  %v2699_v17 = vpack.c.bf16 %v2495_v25, %v2493_v29  ;;  %v2700_v43 = vpack.c.bf16 %v2496_v46, %v2494_v6  ;;  %v3358_v56 = vadd.f32 %v3357_v13, %v3029_v18  ;;  %4628 = vrcp.f32 %v2039_v30  ;;  %3676 = vst.msk [vmem:[%s6173_s11 + $0x360] sm:$0xff] %vm3567_vm0, %v3518_v60 }
 0x483   : > { %v1363_v11 = vsub.f32 %v7668_v35, %v1106_v31  ;;  %v1364_v38 = vsub.f32 %v7671_v48, %v1106_v31  ;;  %4630 = vrcp.f32 %v2042_v28  ;;  %v4625_v35 = vpop.eup %4624 }
 0x484   : > { %v1109_v44 = vpop.xlane.xlu2 %1108  ;;  %3042 = vmatmul.bf16.gmra.mxu0 %v2699_v17  ;;  %3371 = vmatmul.bf16.gmra.mxu1 %v2700_v43  ;;  %3612 = vst.msk [vmem:[%s6173_s11 + $0x160] sm:$0xff] %vm3567_vm0, %v3358_v56  ;;  %v2627_v1 = vmul.f32 %v4625_v35, %v7618_v39  ;;  %v2628_v18 = vmul.f32 %v4625_v35, %v7620_v10 }
 0x485   : > { %v1869_v9 = vmul.f32 1.442695, %v1363_v11  ;;  %v1871_v40 = vmul.f32 1.442695, %v1364_v38  ;;  %v1365_v3 = vsub.f32 %v7674_v33, %v1109_v44  ;;  %v1366_v20 = vsub.f32 %v7677_v24, %v1109_v44  ;;  %v3190_v31 = vpop.f32.mrf.mxu2  ;;  %v3519_v38 = vpop.f32.mrf.mxu3 }
 0x486   : > { %v3191_v17 = vadd.f32 %v7906_v57, %v3190_v31 }
 0x487   : > { %4632 = vpow2.f32 %v1869_v9  ;;  %v1873_v48 = vmul.f32 1.442695, %v1365_v3  ;;  %v1875_v30 = vmul.f32 1.442695, %v1366_v20  ;;  %v3030_v58 = vpop.f32.mrf.mxu0  ;;  %v4627_v29 = vpop.eup %4626 }
 0x488   : > { %4634 = vpow2.f32 %v1871_v40  ;;  %v3031_v56 = vadd.f32 %v7906_v57, %v3030_v58  ;;  %v908_v33 = vpop.xlane.xlu0 %907  ;;  %v4629_v12 = vpop.eup %4628  ;;  %v3520_v24 = vadd.f32 %v3519_v38, %v3191_v17  ;;  %v2625_v46 = vmul.f32 %v4627_v29, %v7679_v53 }
 0x489   : > { %v3359_v8 = vpop.f32.mrf.mxu1  ;;  %v1231_v13 = vsub.f32 %v7701_v61, %v908_v33  ;;  %v1232_v25 = vsub.f32 %v7704_v37, %v908_v33  ;;  %4636 = vpow2.f32 %v1873_v48  ;;  %v4631_v41 = vpop.eup %4630  ;;  %v2626_v11 = vmul.f32 %v4627_v29, %v7683_v42 }
 0x48a   : > { %v911_v28 = vpop.xlane.xlu1 %910  ;;  %v3360_v6 = vadd.f32 %v3359_v8, %v3031_v56  ;;  %4638 = vpow2.f32 %v1875_v30  ;;  %3677 = vst.msk [vmem:[%s6173_s11 + $0x368] sm:$0xff] %vm3567_vm0, %v3520_v24  ;;  %v2765_v44 = vpack.c.bf16 %v2627_v1, %v2625_v46  ;;  %v2497_v9 = vmul.f32 %v4629_v12, %v7650_v26 }
 0x48b   : > { %v1233_v60 = vsub.f32 %v7708_v5, %v911_v28  ;;  %v1605_v43 = vmul.f32 1.442695, %v1231_v13  ;;  %v1234_v37 = vsub.f32 %v7711_v49, %v911_v28  ;;  %v1607_v39 = vmul.f32 1.442695, %v1232_v25 }
 0x48c   : > { %3613 = vst.msk [vmem:[%s6173_s11 + $0x168] sm:$0xff] %vm3567_vm0, %v3360_v6  ;;  %v2766_v10 = vpack.c.bf16 %v2628_v18, %v2626_v11  ;;  %v2498_v40 = vmul.f32 %v4629_v12, %v7654_v15  ;;  %3207 = vmatmul.bf16.gmra.mxu2 %v2765_v44  ;;  %v2499_v49 = vmul.f32 %v4631_v41, %v7595_v59 }
 0x48d   : > { %v7919_v61 = vpop.eup %4632  ;;  %4640 = vpow2.f32 %v1605_v43  ;;  %v1609_v5 = vmul.f32 1.442695, %v1233_v60  ;;  %v2500_v3 = vmul.f32 %v4631_v41, %v7598_v32  ;;  %v1611_v35 = vmul.f32 1.442695, %v1234_v37 }
 0x48e   : > { %v7924_v53 = vpop.eup %4634  ;;  %3536 = vmatmul.bf16.gmra.mxu3 %v2766_v10  ;;  %4642 = vpow2.f32 %v1607_v39  ;;  %v2701_v30 = vpack.c.bf16 %v2499_v49, %v2497_v9  ;;  %v1235_v58 = vsub.f32 %v7643_v45, %v7890_v52  ;;  %v1236_v32 = vsub.f32 %v7646_v7, %v7890_v52 }
 0x48f   : > { %v2256_v42 = vadd.f32 %v7924_v53, %v7919_v61  ;;  %v7932_v20 = vpop.eup %4636  ;;  %v2702_v17 = vpack.c.bf16 %v2500_v3, %v2498_v40  ;;  %4644 = vpow2.f32 %v1609_v5 }
 0x490   : > { %v1103_v48 = vpop.xlane.xlu0 %1102  ;;  %v7934_v26 = vpop.eup %4638  ;;  %4646 = vpow2.f32 %v1611_v35  ;;  %v1613_v45 = vmul.f32 1.442695, %v1235_v58  ;;  %v1615_v52 = vmul.f32 1.442695, %v1236_v32 }
 0x491   : > { %2257 = vadd.xlane.f32.xlu0 %v2256_v42  ;;  %v1361_v15 = vsub.f32 %v7738_v22, %v1103_v48  ;;  %v1362_v31 = vsub.f32 %v7741_v21, %v1103_v48  ;;  %v2259_v22 = vadd.f32 %v7934_v26, %v7932_v20  ;;  %4648 = vrcp.f32 %v7884_v19  ;;  %v2246_v32 = vpop.xlane.xlu2 %2245 }
 0x492   : > { %v2048_v59 = vpop.xlane.xlu1 %2047 }
 0x493   : > { %v1865_v29 = vmul.f32 1.442695, %v1361_v15  ;;  %v1867_v38 = vmul.f32 1.442695, %v1362_v31  ;;  %v7942_v56 = vpop.eup %4640 }
 0x494   : > { %3047 = vmatmul.bf16.gmra.mxu0 %v2701_v30  ;;  %3376 = vmatmul.bf16.gmra.mxu1 %v2702_v17  ;;  %v7947_v33 = vpop.eup %4642 }
 0x495   : > { %v3193_v21 = vpop.f32.mrf.mxu2  ;;  %4650 = vpow2.f32 %v1865_v29  ;;  %v2058_v24 = vadd.f32 %v7947_v33, %v7942_v56  ;;  %v7953_v1 = vpop.eup %4644 }
 0x496   : > { %v3194_v7 = vadd.f32 %v7906_v57, %v3193_v21  ;;  %4652 = vpow2.f32 %v1867_v38  ;;  %v7955_v6 = vpop.eup %4646 }
 0x497   : > { %v3522_v12 = vpop.f32.mrf.mxu3  ;;  %2059 = vadd.xlane.f32.xlu1 %v2058_v24  ;;  %v4649_v41 = vpop.eup %4648  ;;  %v2061_v37 = vadd.f32 %v7955_v6, %v7953_v1 }
 0x498   : > { %v3033_v28 = vpop.f32.mrf.mxu0  ;;  %v3523_v8 = vadd.f32 %v3522_v12, %v3194_v7  ;;  %v3362_v13 = vpop.f32.mrf.mxu1  ;;  %v2629_v42 = vmul.f32 %v4649_v41, %v7624_v4  ;;  %v2630_v5 = vmul.f32 %v4649_v41, %v7628_v62 }
 0x499   : > { %2260 = vadd.xlane.f32.xlu0 %v2259_v22  ;;  %v3034_v19 = vadd.f32 %v7906_v57, %v3033_v28  ;;  %v2240_v25 = vpop.xlane.xlu0 %2239 }
 0x49a   : > { %4654 = vrcp.f32 %v2240_v25  ;;  %3678 = vst.msk [vmem:[%s6173_s11 + $0x370] sm:$0xff] %vm3567_vm0, %v3523_v8 }
 0x49b   : > { %4656 = vpow2.f32 %v1613_v45  ;;  %v2243_v46 = vpop.xlane.xlu1 %2242  ;;  %v3363_v18 = vadd.f32 %v3362_v13, %v3034_v19  ;;  %v7959_v60 = vpop.eup %4650 }
 0x49c   : > { %4658 = vpow2.f32 %v1615_v52  ;;  %v7963_v43 = vpop.eup %4652 }
 0x49d   : > { %3614 = vst.msk [vmem:[%s6173_s11 + $0x170] sm:$0xff] %vm3567_vm0, %v3363_v18  ;;  %v3195_v11 = vpop.f32.mrf.mxu2  ;;  %4660 = vrcp.f32 %v2048_v59  ;;  %v2253_v44 = vadd.f32 %v7963_v43, %v7959_v60 }
 0x49e   : > { %v3196_v39 = vadd.f32 %v7906_v57, %v3195_v11 }
 0x49f   : > { %v3524_v9 = vpop.f32.mrf.mxu3  ;;  %2254 = vadd.xlane.f32.xlu2 %v2253_v44  ;;  %2062 = vadd.xlane.f32.xlu1 %v2061_v37 }
 0x4a0   : > { %v4655_v10 = vpop.eup %4654  ;;  %v3035_v40 = vpop.f32.mrf.mxu0  ;;  %v3525_v3 = vadd.f32 %v3524_v9, %v3196_v39 }
 0x4a1   : > { %v7972_v49 = vpop.eup %4656  ;;  %v3036_v35 = vadd.f32 %v7906_v57, %v3035_v40  ;;  %v2045_v48 = vpop.xlane.xlu0 %2044  ;;  %v2631_v15 = vmul.f32 %v4655_v10, %v7778_v55  ;;  %v2632_v31 = vmul.f32 %v4655_v10, %v7780_v14 }
 0x4a2   : > { %v7977_v30 = vpop.eup %4658  ;;  %v3364_v17 = vpop.f32.mrf.mxu1  ;;  %4662 = vrcp.f32 %v2045_v48  ;;  %3679 = vst.msk [vmem:[%s6173_s11 + $0x378] sm:$0xff] %vm3567_vm0, %v3525_v3  ;;  %v8699_v3 = vld [vmem:[#allocation42_spill] sm:$0xff]  ;;  %v8700_v48 = vld [vmem:[#allocation63_spill] sm:$0xff] }
 0x4a3   : > { %v920_v4 = vpop.xlane.xlu1 %919  ;;  %v3365_v62 = vadd.f32 %v3364_v17, %v3036_v35  ;;  %v2767_v58 = vpack.c.bf16 %v2631_v15, %v2629_v42  ;;  %v2768_v59 = vpack.c.bf16 %v2632_v31, %v2630_v5  ;;  %v4661_v22 = vpop.eup %4660  ;;  %v2064_v55 = vadd.f32 %v7977_v30, %v7972_v49  ;;  %v8698_v42 = vld [vmem:[#allocation62_spill] sm:$0xff]  ;;  %v8701_v31 = vld [vmem:[#allocation64_spill] sm:$0xff] }
 0x4a4   : > { %v1239_v29 = vsub.f32 %v7793_v50, %v920_v4  ;;  %v1240_v38 = vsub.f32 %v7796_v2, %v920_v4  ;;  %4664 = vrcp.f32 %v2243_v46  ;;  %v2503_v2 = vmul.f32 %v4661_v22, %v7757_v0 }
 0x4a5   : > { %3615 = vst.msk [vmem:[%s6173_s11 + $0x178] sm:$0xff] %vm3567_vm0, %v3365_v62  ;;  %3212 = vmatmul.bf16.gmra.mxu2 %v2767_v58  ;;  %3541 = vmatmul.bf16.gmra.mxu3 %v2768_v59  ;;  %v3198_v45 = vpop.f32.mrf.mxu2  ;;  %4666 = vrcp.f32 %v2246_v32  ;;  %v2504_v12 = vmul.f32 %v4661_v22, %v7759_v16 }
 0x4a6   : > { %v1621_v14 = vmul.f32 1.442695, %v1239_v29  ;;  %v1623_v21 = vmul.f32 1.442695, %v1240_v38  ;;  %v3199_v7 = vadd.f32 %v7906_v57, %v3198_v45 }
 0x4a7   : > { %v3527_v50 = vpop.f32.mrf.mxu3  ;;  %2065 = vadd.xlane.f32.xlu2 %v2064_v55 }
 0x4a8   : > { %v4663_v52 = vpop.eup %4662  ;;  %4668 = vpow2.f32 %v1621_v14  ;;  %v3528_v24 = vadd.f32 %v3527_v50, %v3199_v7  ;;  %v2051_v7 = vpop.xlane.xlu2 %2050 }
 0x4a9   : > { %4670 = vpow2.f32 %v1623_v21  ;;  %v1112_v28 = vpop.xlane.xlu0 %1111  ;;  %v2501_v8 = vmul.f32 %v4663_v52, %v7798_v34  ;;  %v2502_v19 = vmul.f32 %v4663_v52, %v7800_v63 }
 0x4aa   : > { %v1367_v13 = vsub.f32 %v7809_v51, %v1112_v28  ;;  %v1368_v25 = vsub.f32 %v7812_v47, %v1112_v28  ;;  %3680 = vst.msk [vmem:[%s6173_s11 + $0x380] sm:$0xff] %vm3567_vm0, %v3528_v24  ;;  %v4665_v41 = vpop.eup %4664 }
 0x4ab   : > { %v2703_v46 = vpack.c.bf16 %v2503_v2, %v2501_v8  ;;  %v2704_v18 = vpack.c.bf16 %v2504_v12, %v2502_v19  ;;  %v4667_v16 = vpop.eup %4666  ;;  %v2633_v47 = vmul.f32 %v4665_v41, %v7782_v27  ;;  %v2634_v39 = vmul.f32 %v4665_v41, %v7786_v36 }
 0x4ac   : > { %v1877_v0 = vmul.f32 1.442695, %v1367_v13  ;;  %v1879_v11 = vmul.f32 1.442695, %v1368_v25  ;;  %v2635_v5 = vmul.f32 %v4667_v16, %v8698_v42  ;;  %v2636_v35 = vmul.f32 %v4667_v16, %v8699_v3 }
 0x4ad   : > { %3052 = vmatmul.bf16.gmra.mxu0 %v2703_v46  ;;  %3381 = vmatmul.bf16.gmra.mxu1 %v2704_v18  ;;  %v3200_v34 = vpop.f32.mrf.mxu2  ;;  %v8702_v18 = vld [vmem:[#allocation26_spill] sm:$0xff] }
 0x4ae   : > { %v7996_v37 = vpop.eup %4668  ;;  %4672 = vpow2.f32 %v1877_v0  ;;  %v3201_v51 = vadd.f32 %v7906_v57, %v3200_v34  ;;  %v2769_v27 = vpack.c.bf16 %v2635_v5, %v2633_v47  ;;  %v2770_v4 = vpack.c.bf16 %v2636_v35, %v2634_v39  ;;  %v8703_v34 = vld [vmem:[#allocation12_spill] sm:$0xff] }
 0x4af   : > { %v7998_v63 = vpop.eup %4670  ;;  %4674 = vpow2.f32 %v1879_v11  ;;  %v3529_v10 = vpop.f32.mrf.mxu3 }
 0x4b0   : > { %v2070_v44 = vadd.f32 %v7998_v63, %v7996_v37  ;;  %v3530_v9 = vadd.f32 %v3529_v10, %v3201_v51 }
 0x4b1   : > { %v917_v40 = vpop.xlane.xlu0 %916 }
 0x4b2   : > { %2071 = vadd.xlane.f32.xlu0 %v2070_v44  ;;  %v1237_v15 = vsub.f32 %v8700_v48, %v917_v40  ;;  %v1238_v17 = vsub.f32 %v8701_v31, %v917_v40  ;;  %3681 = vst.msk [vmem:[%s6173_s11 + $0x388] sm:$0xff] %vm3567_vm0, %v3530_v9  ;;  %v8705_v48 = vld [vmem:[#allocation61_spill] sm:$0xff] }
 0x4b4   : > { %v8011_v36 = vpop.eup %4672  ;;  %v1617_v62 = vmul.f32 1.442695, %v1237_v15  ;;  %v1619_v58 = vmul.f32 1.442695, %v1238_v17  ;;  %v8706_v15 = vld [vmem:[#allocation66_spill] sm:$0xff]  ;;  %v8707_v17 = vld [vmem:[#allocation59_spill] sm:$0xff] }
 0x4b5   : > { %v8013_v59 = vpop.eup %4674  ;;  %3217 = vmatmul.bf16.gmra.mxu2 %v2769_v27  ;;  %3546 = vmatmul.bf16.gmra.mxu3 %v2770_v4 }
 0x4b6   : > { %4676 = vpow2.f32 %v1617_v62  ;;  %v2262_v32 = vadd.f32 %v8013_v59, %v8011_v36 }
 0x4b7   : > { %4678 = vpow2.f32 %v1619_v58 }
 0x4b8   : > { %2263 = vadd.xlane.f32.xlu1 %v2262_v32  ;;  %4680 = vrcp.f32 %v2051_v7 }
 0x4bc   : > { %v8017_v29 = vpop.eup %4676 }
 0x4bd   : > { %v8019_v38 = vpop.eup %4678 }
 0x4be   : > { %v2067_v22 = vadd.f32 %v8019_v38, %v8017_v29  ;;  %v4681_v8 = vpop.eup %4680 }
 0x4bf   : > { %v2505_v41 = vmul.f32 %v4681_v8, %v8702_v18  ;;  %v2506_v51 = vmul.f32 %v4681_v8, %v8703_v34 }
 0x4c0   : > { %2068 = vadd.xlane.f32.xlu2 %v2067_v22  ;;  %v2252_v28 = vpop.xlane.xlu2 %2251 }
 0x4d5   : > { %v3038_v55 = vpop.f32.mrf.mxu0  ;;  %v3367_v14 = vpop.f32.mrf.mxu1 }
 0x4d6   : > { %v3039_v21 = vadd.f32 %v7906_v57, %v3038_v55 }
 0x4d8   : > { %v3368_v45 = vadd.f32 %v3367_v14, %v3039_v21 }
 0x4da   : > { %3616 = vst.msk [vmem:[%s6173_s11 + $0x180] sm:$0xff] %vm3567_vm0, %v3368_v45 }
 0x4dd   : > { %v3040_v52 = vpop.f32.mrf.mxu0  ;;  %v3369_v12 = vpop.f32.mrf.mxu1 }
 0x4de   : > { %v3041_v50 = vadd.f32 %v7906_v57, %v3040_v52  ;;  %v2054_v2 = vpop.xlane.xlu0 %2053 }
 0x4df   : > { %4682 = vrcp.f32 %v2054_v2 }
 0x4e0   : > { %v3370_v24 = vadd.f32 %v3369_v12, %v3041_v50  ;;  %4684 = vrcp.f32 %v2252_v28 }
 0x4e2   : > { %3617 = vst.msk [vmem:[%s6173_s11 + $0x188] sm:$0xff] %vm3567_vm0, %v3370_v24 }
 0x4e3   : > { %v3203_v19 = vpop.f32.mrf.mxu2  ;;  %v3532_v13 = vpop.f32.mrf.mxu3 }
 0x4e4   : > { %v3204_v25 = vadd.f32 %v7906_v57, %v3203_v19 }
 0x4e5   : > { %v4683_v46 = vpop.eup %4682 }
 0x4e6   : > { %v3533_v0 = vadd.f32 %v3532_v13, %v3204_v25  ;;  %v2507_v16 = vmul.f32 %v4683_v46, %v7863_v23  ;;  %v2508_v47 = vmul.f32 %v4683_v46, %v7865_v54  ;;  %v4685_v10 = vpop.eup %4684  ;;  %v8704_v23 = vld [vmem:[#allocation57_spill] sm:$0xff]  ;;  %v2057_v14 = vpop.xlane.xlu0 %2056 }
 0x4e7   : > { %v2639_v3 = vmul.f32 %v4685_v10, %v8704_v23  ;;  %v2640_v27 = vmul.f32 %v4685_v10, %v8707_v17 }
 0x4e8   : > { %v2249_v11 = vpop.xlane.xlu1 %2248  ;;  %3682 = vst.msk [vmem:[%s6173_s11 + $0x390] sm:$0xff] %vm3567_vm0, %v3533_v0  ;;  %v2705_v39 = vpack.c.bf16 %v2507_v16, %v2505_v41  ;;  %v2706_v44 = vpack.c.bf16 %v2508_v47, %v2506_v51  ;;  %v8708_v0 = vld [vmem:[#allocation60_spill] sm:$0xff]  ;;  %v8709_v16 = vld [vmem:[#allocation58_spill] sm:$0xff] }
 0x4e9   : > { %4686 = vrcp.f32 %v2249_v11 }
 0x4ea   : > { %3057 = vmatmul.bf16.gmra.mxu0 %v2705_v39  ;;  %3386 = vmatmul.bf16.gmra.mxu1 %v2706_v44  ;;  %4688 = vrcp.f32 %v2057_v14 }
 0x4eb   : > { %v3205_v9 = vpop.f32.mrf.mxu2  ;;  %v3534_v5 = vpop.f32.mrf.mxu3 }
 0x4ec   : > { %v3206_v40 = vadd.f32 %v7906_v57, %v3205_v9 }
 0x4ee   : > { %v3535_v35 = vadd.f32 %v3534_v5, %v3206_v40 }
 0x4ef   : > { %v4687_v42 = vpop.eup %4686 }
 0x4f0   : > { %v2637_v54 = vmul.f32 %v4687_v42, %v8705_v48  ;;  %v2638_v31 = vmul.f32 %v4687_v42, %v8706_v15  ;;  %3683 = vst.msk [vmem:[%s6173_s11 + $0x398] sm:$0xff] %vm3567_vm0, %v3535_v35  ;;  %v4689_v12 = vpop.eup %4688 }
 0x4f1   : > { %v2509_v11 = vmul.f32 %v4689_v12, %v8708_v0  ;;  %v2510_v34 = vmul.f32 %v4689_v12, %v8709_v16 }
 0x4f2   : > { %v2771_v4 = vpack.c.bf16 %v2639_v3, %v2637_v54  ;;  %v2772_v62 = vpack.c.bf16 %v2640_v27, %v2638_v31 }
 0x4f4   : > { %3222 = vmatmul.bf16.gmra.mxu2 %v2771_v4  ;;  %3551 = vmatmul.bf16.gmra.mxu3 %v2772_v62 }
 0x501   : > { %v3043_v58 = vpop.f32.mrf.mxu0  ;;  %v3372_v32 = vpop.f32.mrf.mxu1 }
 0x502   : > { %v3044_v22 = vadd.f32 %v7906_v57, %v3043_v58 }
 0x504   : > { %v3373_v55 = vadd.f32 %v3372_v32, %v3044_v22  ;;  %v2258_v2 = vpop.xlane.xlu0 %2257 }
 0x506   : > { %3618 = vst.msk [vmem:[%s6173_s11 + $0x190] sm:$0xff] %vm3567_vm0, %v3373_v55 }
 0x509   : > { %v3045_v21 = vpop.f32.mrf.mxu0  ;;  %v3374_v45 = vpop.f32.mrf.mxu1 }
 0x50a   : > { %v3046_v7 = vadd.f32 %v7906_v57, %v3045_v21  ;;  %v2060_v50 = vpop.xlane.xlu1 %2059 }
 0x50b   : > { %4690 = vrcp.f32 %v2060_v50 }
 0x50c   : > { %v3375_v52 = vadd.f32 %v3374_v45, %v3046_v7  ;;  %4692 = vrcp.f32 %v2258_v2  ;;  %v2261_v55 = vpop.xlane.xlu0 %2260 }
 0x50e   : > { %3619 = vst.msk [vmem:[%s6173_s11 + $0x198] sm:$0xff] %vm3567_vm0, %v3375_v52 }
 0x50f   : > { %v3208_v8 = vpop.f32.mrf.mxu2 }
 0x510   : > { %v3209_v13 = vadd.f32 %v7906_v57, %v3208_v8 }
 0x511   : > { %v3048_v24 = vpop.f32.mrf.mxu0  ;;  %v3377_v28 = vpop.f32.mrf.mxu1 }
 0x512   : > { %v3049_v19 = vadd.f32 %v7906_v57, %v3048_v24  ;;  %v3537_v25 = vpop.f32.mrf.mxu3  ;;  %v4691_v46 = vpop.eup %4690 }
 0x513   : > { %v2255_v41 = vpop.xlane.xlu2 %2254  ;;  %v3538_v51 = vadd.f32 %v3537_v25, %v3209_v13  ;;  %v2511_v47 = vmul.f32 %v4691_v46, %v7942_v56  ;;  %v2512_v39 = vmul.f32 %v4691_v46, %v7947_v33  ;;  %v4693_v9 = vpop.eup %4692 }
 0x514   : > { %v3378_v18 = vadd.f32 %v3377_v28, %v3049_v19  ;;  %4694 = vrcp.f32 %v2255_v41  ;;  %v2063_v40 = vpop.xlane.xlu1 %2062  ;;  %v2643_v35 = vmul.f32 %v4693_v9, %v7919_v61  ;;  %v2644_v27 = vmul.f32 %v4693_v9, %v7924_v53 }
 0x515   : > { %3684 = vst.msk [vmem:[%s6173_s11 + $0x3a0] sm:$0xff] %vm3567_vm0, %v3538_v51  ;;  %v2707_v44 = vpack.c.bf16 %v2511_v47, %v2509_v11  ;;  %v2708_v10 = vpack.c.bf16 %v2512_v39, %v2510_v34  ;;  %4696 = vrcp.f32 %v2063_v40 }
 0x516   : > { %3620 = vst.msk [vmem:[%s6173_s11 + $0x1a0] sm:$0xff] %vm3567_vm0, %v3378_v18 }
 0x517   : > { %3062 = vmatmul.bf16.gmra.mxu0 %v2707_v44  ;;  %3391 = vmatmul.bf16.gmra.mxu1 %v2708_v10  ;;  %v3210_v5 = vpop.f32.mrf.mxu2 }
 0x518   : > { %v3211_v56 = vadd.f32 %v7906_v57, %v3210_v5 }
 0x519   : > { %v3050_v42 = vpop.f32.mrf.mxu0  ;;  %v3379_v33 = vpop.f32.mrf.mxu1 }
 0x51a   : > { %v3051_v23 = vadd.f32 %v7906_v57, %v3050_v42  ;;  %v4695_v3 = vpop.eup %4694  ;;  %v3539_v48 = vpop.f32.mrf.mxu3 }
 0x51b   : > { %v2066_v15 = vpop.xlane.xlu2 %2065  ;;  %v2641_v31 = vmul.f32 %v4695_v3, %v7959_v60  ;;  %v2642_v17 = vmul.f32 %v4695_v3, %v7963_v43  ;;  %v3540_v4 = vadd.f32 %v3539_v48, %v3211_v56  ;;  %v4697_v61 = vpop.eup %4696 }
 0x51c   : > { %v3380_v54 = vadd.f32 %v3379_v33, %v3051_v23  ;;  %4698 = vrcp.f32 %v2066_v15  ;;  %v2513_v22 = vmul.f32 %v4697_v61, %v7953_v1  ;;  %v2514_v43 = vmul.f32 %v4697_v61, %v7955_v6 }
 0x51d   : > { %v2773_v62 = vpack.c.bf16 %v2643_v35, %v2641_v31  ;;  %v2774_v58 = vpack.c.bf16 %v2644_v27, %v2642_v17  ;;  %3685 = vst.msk [vmem:[%s6173_s11 + $0x3a8] sm:$0xff] %vm3567_vm0, %v3540_v4  ;;  %4700 = vrcp.f32 %v2261_v55 }
 0x51e   : > { %3621 = vst.msk [vmem:[%s6173_s11 + $0x1a8] sm:$0xff] %vm3567_vm0, %v3380_v54 }
 0x51f   : > { %3227 = vmatmul.bf16.gmra.mxu2 %v2773_v62  ;;  %3556 = vmatmul.bf16.gmra.mxu3 %v2774_v58 }
 0x522   : > { %v4699_v32 = vpop.eup %4698 }
 0x523   : > { %v2515_v60 = vmul.f32 %v4699_v32, %v7972_v49  ;;  %v2516_v53 = vmul.f32 %v4699_v32, %v7977_v30  ;;  %v4701_v24 = vpop.eup %4700 }
 0x524   : > { %v2645_v46 = vmul.f32 %v4701_v24, %v7932_v20  ;;  %v2646_v18 = vmul.f32 %v4701_v24, %v7934_v26 }
 0x525   : > { %v2709_v14 = vpack.c.bf16 %v2515_v60, %v2513_v22  ;;  %v2710_v21 = vpack.c.bf16 %v2516_v53, %v2514_v43  ;;  %v2072_v12 = vpop.xlane.xlu0 %2071 }
 0x527   : > { %3067 = vmatmul.bf16.gmra.mxu0 %v2709_v14  ;;  %3396 = vmatmul.bf16.gmra.mxu1 %v2710_v21 }
 0x528   : > { %v3213_v45 = vpop.f32.mrf.mxu2  ;;  %v3542_v7 = vpop.f32.mrf.mxu3 }
 0x529   : > { %v3214_v52 = vadd.f32 %v7906_v57, %v3213_v45 }
 0x52a   : > { %v3053_v50 = vpop.f32.mrf.mxu0  ;;  %v3382_v1 = vpop.f32.mrf.mxu1 }
 0x52b   : > { %v3543_v2 = vadd.f32 %v3542_v7, %v3214_v52  ;;  %v3054_v49 = vadd.f32 %v7906_v57, %v3053_v50  ;;  %v2264_v6 = vpop.xlane.xlu1 %2263 }
 0x52c   : > { %4702 = vrcp.f32 %v2264_v6 }
 0x52d   : > { %3686 = vst.msk [vmem:[%s6173_s11 + $0x3b0] sm:$0xff] %vm3567_vm0, %v3543_v2  ;;  %v3383_v30 = vadd.f32 %v3382_v1, %v3054_v49  ;;  %4704 = vrcp.f32 %v2072_v12 }
 0x52f   : > { %3622 = vst.msk [vmem:[%s6173_s11 + $0x1b0] sm:$0xff] %vm3567_vm0, %v3383_v30 }
 0x530   : > { %v3215_v28 = vpop.f32.mrf.mxu2  ;;  %v3544_v8 = vpop.f32.mrf.mxu3 }
 0x531   : > { %v3216_v19 = vadd.f32 %v7906_v57, %v3215_v28 }
 0x532   : > { %v4703_v13 = vpop.eup %4702  ;;  %v3055_v25 = vpop.f32.mrf.mxu0 }
 0x533   : > { %v3545_v41 = vadd.f32 %v3544_v8, %v3216_v19  ;;  %v3056_v0 = vadd.f32 %v7906_v57, %v3055_v25  ;;  %v2069_v11 = vpop.xlane.xlu2 %2068  ;;  %v2647_v16 = vmul.f32 %v4703_v13, %v8011_v36  ;;  %v2648_v34 = vmul.f32 %v4703_v13, %v8013_v59  ;;  %v3384_v51 = vpop.f32.mrf.mxu1 }
 0x534   : > { %4706 = vrcp.f32 %v2069_v11  ;;  %v4705_v10 = vpop.eup %4704 }
 0x535   : > { %3687 = vst.msk [vmem:[%s6173_s11 + $0x3b8] sm:$0xff] %vm3567_vm0, %v3545_v41  ;;  %v3385_v47 = vadd.f32 %v3384_v51, %v3056_v0  ;;  %v2775_v39 = vpack.c.bf16 %v2647_v16, %v2645_v46  ;;  %v2776_v44 = vpack.c.bf16 %v2648_v34, %v2646_v18  ;;  %v2519_v59 = vmul.f32 %v4705_v10, %v7996_v37 }
 0x536   : > { %v2520_v23 = vmul.f32 %v4705_v10, %v7998_v63 }
 0x537   : > { %3623 = vst.msk [vmem:[%s6173_s11 + $0x1b8] sm:$0xff] %vm3567_vm0, %v3385_v47  ;;  %3232 = vmatmul.bf16.gmra.mxu2 %v2775_v39  ;;  %3561 = vmatmul.bf16.gmra.mxu3 %v2776_v44 }
 0x538   : > { %v3218_v20 = vpop.f32.mrf.mxu2  ;;  %v3547_v26 = vpop.f32.mrf.mxu3 }
 0x539   : > { %v3219_v9 = vadd.f32 %v7906_v57, %v3218_v20 }
 0x53a   : > { %v4707_v36 = vpop.eup %4706 }
 0x53b   : > { %v3548_v40 = vadd.f32 %v3547_v26, %v3219_v9  ;;  %v2517_v42 = vmul.f32 %v4707_v36, %v8017_v29  ;;  %v2518_v5 = vmul.f32 %v4707_v36, %v8019_v38 }
 0x53d   : > { %3688 = vst.msk [vmem:[%s6173_s11 + $0x3c0] sm:$0xff] %vm3567_vm0, %v3548_v40  ;;  %v2711_v3 = vpack.c.bf16 %v2519_v59, %v2517_v42  ;;  %v2712_v56 = vpack.c.bf16 %v2520_v23, %v2518_v5 }
 0x53f   : > { %3072 = vmatmul.bf16.gmra.mxu0 %v2711_v3  ;;  %3401 = vmatmul.bf16.gmra.mxu1 %v2712_v56 }
 0x540   : > { %v3220_v33 = vpop.f32.mrf.mxu2  ;;  %v3549_v48 = vpop.f32.mrf.mxu3 }
 0x541   : > { %v3221_v35 = vadd.f32 %v7906_v57, %v3220_v33 }
 0x543   : > { %v3550_v37 = vadd.f32 %v3549_v48, %v3221_v35 }
 0x545   : > { %3689 = vst.msk [vmem:[%s6173_s11 + $0x3c8] sm:$0xff] %vm3567_vm0, %v3550_v37 }
 0x567   : > { %v3058_v29 = vpop.f32.mrf.mxu0  ;;  %v3387_v38 = vpop.f32.mrf.mxu1 }
 0x568   : > { %v3059_v54 = vadd.f32 %v7906_v57, %v3058_v29 }
 0x56a   : > { %v3388_v63 = vadd.f32 %v3387_v38, %v3059_v54 }
 0x56c   : > { %3624 = vst.msk [vmem:[%s6173_s11 + $0x1c0] sm:$0xff] %vm3567_vm0, %v3388_v63 }
 0x56f   : > { %v3060_v15 = vpop.f32.mrf.mxu0  ;;  %v3389_v17 = vpop.f32.mrf.mxu1 }
 0x570   : > { %v3061_v31 = vadd.f32 %v7906_v57, %v3060_v15 }
 0x572   : > { %v3390_v27 = vadd.f32 %v3389_v17, %v3061_v31 }
 0x574   : > { %3625 = vst.msk [vmem:[%s6173_s11 + $0x1c8] sm:$0xff] %vm3567_vm0, %v3390_v27 }
 0x577   : > { %v3223_v4 = vpop.f32.mrf.mxu2  ;;  %v3552_v62 = vpop.f32.mrf.mxu3 }
 0x578   : > { %v3224_v58 = vadd.f32 %v7906_v57, %v3223_v4 }
 0x57a   : > { %v3553_v61 = vadd.f32 %v3552_v62, %v3224_v58 }
 0x57c   : > { %3690 = vst.msk [vmem:[%s6173_s11 + $0x3d0] sm:$0xff] %vm3567_vm0, %v3553_v61 }
 0x57f   : > { %v3225_v32 = vpop.f32.mrf.mxu2  ;;  %v3554_v60 = vpop.f32.mrf.mxu3 }
 0x580   : > { %v3226_v22 = vadd.f32 %v7906_v57, %v3225_v32 }
 0x582   : > { %v3555_v43 = vadd.f32 %v3554_v60, %v3226_v22 }
 0x584   : > { %3691 = vst.msk [vmem:[%s6173_s11 + $0x3d8] sm:$0xff] %vm3567_vm0, %v3555_v43 }
 0x594   : > { %v3063_v53 = vpop.f32.mrf.mxu0  ;;  %v3392_v55 = vpop.f32.mrf.mxu1 }
 0x595   : > { %v3064_v14 = vadd.f32 %v7906_v57, %v3063_v53 }
 0x597   : > { %v3393_v21 = vadd.f32 %v3392_v55, %v3064_v14 }
 0x599   : > { %3626 = vst.msk [vmem:[%s6173_s11 + $0x1d0] sm:$0xff] %vm3567_vm0, %v3393_v21 }
 0x59c   : > { %v3065_v45 = vpop.f32.mrf.mxu0  ;;  %v3394_v7 = vpop.f32.mrf.mxu1 }
 0x59d   : > { %v3066_v52 = vadd.f32 %v7906_v57, %v3065_v45 }
 0x59f   : > { %v3395_v50 = vadd.f32 %v3394_v7, %v3066_v52 }
 0x5a1   : > { %3627 = vst.msk [vmem:[%s6173_s11 + $0x1d8] sm:$0xff] %vm3567_vm0, %v3395_v50 }
 0x5a2   : > { %v3228_v1 = vpop.f32.mrf.mxu2  ;;  %v3557_v2 = vpop.f32.mrf.mxu3 }
 0x5a3   : > { %v3229_v49 = vadd.f32 %v7906_v57, %v3228_v1 }
 0x5a4   : > { %v3068_v30 = vpop.f32.mrf.mxu0  ;;  %v3397_v12 = vpop.f32.mrf.mxu1 }
 0x5a5   : > { %v3558_v6 = vadd.f32 %v3557_v2, %v3229_v49  ;;  %v3069_v24 = vadd.f32 %v7906_v57, %v3068_v30 }
 0x5a7   : > { %3692 = vst.msk [vmem:[%s6173_s11 + $0x3e0] sm:$0xff] %vm3567_vm0, %v3558_v6  ;;  %v3398_v28 = vadd.f32 %v3397_v12, %v3069_v24 }
 0x5a9   : > { %3628 = vst.msk [vmem:[%s6173_s11 + $0x1e0] sm:$0xff] %vm3567_vm0, %v3398_v28 }
 0x5aa   : > { %v3230_v8 = vpop.f32.mrf.mxu2  ;;  %v3559_v13 = vpop.f32.mrf.mxu3 }
 0x5ab   : > { %v3231_v19 = vadd.f32 %v7906_v57, %v3230_v8 }
 0x5ac   : > { %v3070_v46 = vpop.f32.mrf.mxu0  ;;  %v3399_v41 = vpop.f32.mrf.mxu1 }
 0x5ad   : > { %v3560_v25 = vadd.f32 %v3559_v13, %v3231_v19  ;;  %v3071_v18 = vadd.f32 %v7906_v57, %v3070_v46 }
 0x5af   : > { %3693 = vst.msk [vmem:[%s6173_s11 + $0x3e8] sm:$0xff] %vm3567_vm0, %v3560_v25  ;;  %v3400_v0 = vadd.f32 %v3399_v41, %v3071_v18 }
 0x5b1   : > { %3629 = vst.msk [vmem:[%s6173_s11 + $0x1e8] sm:$0xff] %vm3567_vm0, %v3400_v0 }
 0x5ba   : > { %v3233_v11 = vpop.f32.mrf.mxu2  ;;  %v3562_v16 = vpop.f32.mrf.mxu3 }
 0x5bb   : > { %v3234_v34 = vadd.f32 %v7906_v57, %v3233_v11 }
 0x5bc   : > { %v3073_v51 = vpop.f32.mrf.mxu0  ;;  %v3402_v47 = vpop.f32.mrf.mxu1 }
 0x5bd   : > { %v3563_v39 = vadd.f32 %v3562_v16, %v3234_v34  ;;  %v3074_v44 = vadd.f32 %v7906_v57, %v3073_v51 }
 0x5bf   : > { %3694 = vst.msk [vmem:[%s6173_s11 + $0x3f0] sm:$0xff] %vm3567_vm0, %v3563_v39  ;;  %v3403_v10 = vadd.f32 %v3402_v47, %v3074_v44 }
 0x5c1   : > { %3630 = vst.msk [vmem:[%s6173_s11 + $0x1f0] sm:$0xff] %vm3567_vm0, %v3403_v10 }
 0x5c2   : > { %v3235_v20 = vpop.f32.mrf.mxu2  ;;  %v3564_v9 = vpop.f32.mrf.mxu3 }
 0x5c3   : > { %v3236_v26 = vadd.f32 %v7906_v57, %v3235_v20 }
 0x5c4   : > { %v3075_v36 = vpop.f32.mrf.mxu0  ;;  %v3404_v42 = vpop.f32.mrf.mxu1 }
 0x5c5   : > { %v3565_v59 = vadd.f32 %v3564_v9, %v3236_v26  ;;  %v3076_v40 = vadd.f32 %v7906_v57, %v3075_v36 }
 0x5c7   : > { %3695 = vst.msk [vmem:[%s6173_s11 + $0x3f8] sm:$0xff] %vm3567_vm0, %v3565_v59  ;;  %v3405_v5 = vadd.f32 %v3404_v42, %v3076_v40 }
 0x5c9   : > { %3631 = vst.msk [vmem:[%s6173_s11 + $0x1f8] sm:$0xff] %vm3567_vm0, %v3405_v5 }
 0x5ca PF: > { %p16_p8 = scmp.ge.s32.totalorder %s4863_s21, 4   ;;  %s8710_s17 = smov %s4802_s18 }
 0x5cb   : > { %s8711_s18 = smov %s4806_s19  ;;  %s8712_s19 = smov %s4873_s24 }
 0x5cc   : > { %s8713_s20 = smov %s4863_s21  ;;  %18 = sbr.rel (!%p16_p8) target bundleno = 6 (0x6), region = 76 }
 0x5d1   :  { %3718 = vsyncpa [#allocation5], 1 }
 0x5d2   :  { %3720 = vsyncpa [#allocation5 + $0x1], 1 }
 0x5d3   :  { %3721 = vsyncpa [#allocation7], 1 }

</bundles_post_ra>
